<compile_context>
chip_gen: v5e
topology: v5e:2x2
jax: 0.10.0
libtpu: 0.0.40
codegen_flags: <defaults>
</compile_context>

<pallas_src>
import math

import jax
import jax.numpy as jnp
from jax.experimental import pallas as pl
from jax.experimental.pallas import tpu as pltpu


def make_kernel(look_back, pre_len, h_dim, num_layers):
    T, P, H = look_back, pre_len, h_dim
    f32 = jnp.float32
    bf16 = jnp.bfloat16

    def fused_gates(pre):
        # pre: (B, 4H) f32, PyTorch gate order i, f, g, o along lanes.
        # One full-width sigmoid + one full-width tanh (2 EUP pushes), then lane-slice.
        sg = jax.nn.sigmoid(pre)
        th = jnp.tanh(pre)
        i_g = sg[:, 0 * H:1 * H]
        f_g = sg[:, 1 * H:2 * H]
        g_g = th[:, 2 * H:3 * H]
        o_g = sg[:, 3 * H:4 * H]
        return i_g, f_g, g_g, o_g

    def kernel(*refs):
        idx = 0
        x_ref = refs[idx]; idx += 1
        enc_refs = []
        for _ in range(num_layers):
            enc_refs.append((refs[idx], refs[idx + 1], refs[idx + 2]))
            idx += 3
        cell_w_ref, cell_b_ref = refs[idx], refs[idx + 1]; idx += 2
        fc13_wT_ref, fc13_b_ref = refs[idx], refs[idx + 1]; idx += 2
        fc2_w_ref, fc2_b_ref = refs[idx], refs[idx + 1]; idx += 2
        out_ref = refs[idx]

        B = x_ref.shape[1]          # padded to a multiple of 8 by the wrapper
        F = x_ref.shape[2]

        # ---- Encoder: stacked LSTM, fully unrolled (T, num_layers static) --------
        # Layer input as a (T*B, in_dim) bf16 slab -> ONE batched input projection per
        # layer (off the serial chain); only h @ W_hh sits on the recurrence.
        flat_in = x_ref[...].reshape(T * B, F).astype(bf16)
        h_last = c_last = None
        H_all = None
        for layer_i, (w_ih_ref, w_hh_ref, b_ref) in enumerate(enc_refs):
            w_ih = w_ih_ref[...]                                   # (in_dim, 4H) bf16
            w_hh = w_hh_ref[...]                                   # (H, 4H) bf16
            b = b_ref[...]                                         # (1, 4H) f32
            xproj = jnp.dot(flat_in, w_ih, preferred_element_type=f32) + b   # (T*B, 4H)

            h = jnp.zeros((B, H), f32)
            c = jnp.zeros((B, H), f32)
            outs = []
            for t in range(T):
                pre = xproj[t * B:(t + 1) * B, :] + jnp.dot(
                    h.astype(bf16), w_hh, preferred_element_type=f32)
                i_g, f_g, g_g, o_g = fused_gates(pre)
                c = f_g * c + i_g * g_g
                h = o_g * jnp.tanh(c)
                outs.append(h)
            h_last, c_last = h, c
            if layer_i + 1 < num_layers:
                flat_in = jnp.stack(outs, axis=0).reshape(T * B, H).astype(bf16)
            else:
                H_all = jnp.stack(outs, axis=1)                    # (B, T, H) f32

        # ---- Decoder: LSTMCell + dot-product attention, unrolled over pre_len ----
        cell_w = cell_w_ref[...]                                   # (2H, 4H) bf16
        cell_b = cell_b_ref[...]                                   # (1, 4H) f32
        fc13_wT = fc13_wT_ref[...]                                 # (2H, 128+H) bf16
        fc13_b = fc13_b_ref[...]                                   # (1, 128+H) f32
        fc2_w = fc2_w_ref[...]                                     # (1, 128) f32
        fc2_b = fc2_b_ref[...]                                     # (1, 1) f32

        h, c = h_last, c_last                                      # torch: h[-1], c[-1]
        h_in = h
        cols = []
        for _ in range(P):
            # Fused LSTMCell: concat([x, h]) against stacked (2H,4H) weights -> 1 matmul.
            xh = jnp.concatenate([h_in, h], axis=1).astype(bf16)                # (B, 2H)
            pre = jnp.dot(xh, cell_w, preferred_element_type=f32) + cell_b
            i_g, f_g, g_g, o_g = fused_gates(pre)
            c_t = f_g * c + i_g * g_g
            h_t = o_g * jnp.tanh(c_t)

            # Dot-product attention of h_t over encoder outputs (B, T, H), softmax over T.
            scores = jnp.sum(H_all * h_t[:, None, :], axis=-1)                  # (B, T)
            m = jnp.max(scores, axis=-1, keepdims=True)
            e = jnp.exp(scores - m)
            att = e / jnp.sum(e, axis=-1, keepdims=True)                        # exact div
            atten_H = jnp.sum(att[:, :, None] * H_all, axis=1)                  # (B, H)

            h_atten = jnp.concatenate([atten_H, h_t], axis=1).astype(bf16)      # (B, 2H)

            # fc1 + fc3 fused into one matmul; split at the lane-tile boundary (128).
            y = jnp.dot(h_atten, fc13_wT, preferred_element_type=f32) + fc13_b  # (B,128+H)
            y1 = y[:, :128]                                                     # fc1 out
            h_in = y[:, 128:128 + H]                                            # fc3 out
            # TODO(synk): nn.Dropout(0.5) treated as identity (inference/eval semantics).
            # fc2 as VPU multiply + lane reduce instead of an N=1 MXU matmul.
            y2 = jnp.sum(y1 * fc2_w, axis=-1, keepdims=True) + fc2_b            # (B, 1)
            cols.append(y2)

            h, c = h_t, c_t

        # Single store at the end, already in (B, pre_len) order.
        out_ref[...] = jnp.concatenate(cols, axis=1)

    return kernel


def lstm_atten_forward(x, params, *, look_back, pre_len, f_dim, h_dim, num_layers):
    B = x.shape[0]
    B_pad = ((max(B, 1) + 7) // 8) * 8                          # sublane-align the batch
    x_tm = jnp.transpose(x, (1, 0, 2)).astype(jnp.float32)      # (T, B, F) time-major
    if B_pad != B:
        x_tm = jnp.pad(x_tm, ((0, 0), (0, B_pad - B), (0, 0)))

    inputs = [x_tm]
    for l in range(num_layers):
        inputs += [params[f"enc_w_ih_{l}"], params[f"enc_w_hh_{l}"], params[f"enc_b_{l}"]]
    inputs += [params["cell_w"], params["cell_b"],
               params["fc13_wT"], params["fc13_b"],
               params["fc2_w"], params["fc2_b"]]

    vmem = pl.BlockSpec(memory_space=pltpu.MemorySpace.VMEM)
    out = pl.pallas_call(
        make_kernel(look_back, pre_len, h_dim, num_layers),
        out_shape=jax.ShapeDtypeStruct((B_pad, pre_len), jnp.float32),
        in_specs=[vmem] * len(inputs),
        out_specs=vmem,
    )(*inputs)
    return out[:B]                                              # (B, pre_len)


def init_params(key, f_dim, h_dim, num_layers):
    """Deterministic synthetic parameters (PyTorch-style uniform init), pre-packed into
    the fused lane-dense layout the kernel expects.  Matmul weights are stored in bf16
    (MXU-native); biases / fc2 stay f32."""
    params = {}

    def u(k, shape, bound):
        return jax.random.uniform(k, shape, jnp.float32, -bound, bound)

    keys = iter(jax.random.split(key, 4 * (num_layers + 1) + 6))
    k_lstm = 1.0 / math.sqrt(h_dim)

    def lstm_mats(in_dim):
        w_ih = u(next(keys), (4 * h_dim, in_dim), k_lstm)       # torch weight_ih (4H, in)
        w_hh = u(next(keys), (4 * h_dim, h_dim), k_lstm)        # torch weight_hh (4H, H)
        b_ih = u(next(keys), (4 * h_dim,), k_lstm)
        b_hh = u(next(keys), (4 * h_dim,), k_lstm)
        # Transpose -> (in, 4H) / (H, 4H): gate blocks i,f,g,o stay contiguous on lanes.
        return w_ih.T, w_hh.T, (b_ih + b_hh).reshape(1, 4 * h_dim)

    for l in range(num_layers):
        in_dim = f_dim if l == 0 else h_dim
        w_ih_t, w_hh_t, b = lstm_mats(in_dim)
        params[f"enc_w_ih_{l}"] = w_ih_t.astype(jnp.bfloat16)   # (in_dim, 4H)
        params[f"enc_w_hh_{l}"] = w_hh_t.astype(jnp.bfloat16)   # (H, 4H)
        params[f"enc_b_{l}"] = b                                # (1, 4H) f32

    w_ih_t, w_hh_t, b = lstm_mats(h_dim)                        # decoder LSTMCell
    params["cell_w"] = jnp.concatenate([w_ih_t, w_hh_t], axis=0).astype(jnp.bfloat16)
    params["cell_b"] = b                                        # (1, 4H) f32

    k1 = 1.0 / math.sqrt(2 * h_dim)
    fc1_w = u(next(keys), (128, 2 * h_dim), k1)
    fc1_b = u(next(keys), (128,), k1)

    k2 = 1.0 / math.sqrt(128)
    fc2_w = u(next(keys), (1, 128), k2)
    fc2_b = u(next(keys), (1,), k2)
    params["fc2_w"] = fc2_w                                     # (1, 128) f32 (VPU reduce)
    params["fc2_b"] = fc2_b.reshape(1, 1)

    k3 = 1.0 / math.sqrt(2 * h_dim)
    fc3_w = u(next(keys), (h_dim, 2 * h_dim), k3)
    fc3_b = u(next(keys), (h_dim,), k3)

    # fc1 and fc3 fused column-wise: (2H, 128+H) weight, (1, 128+H) bias.
    params["fc13_wT"] = jnp.concatenate([fc1_w.T, fc3_w.T], axis=1).astype(jnp.bfloat16)
    params["fc13_b"] = jnp.concatenate([fc1_b.reshape(1, 128),
                                        fc3_b.reshape(1, h_dim)], axis=1)

    return params


if __name__ == "__main__":
    look_back, pre_len, f_dim, h_dim, layer = 8, 4, 4, 32, 2
    B = 2

    key = jax.random.PRNGKey(0)
    k_x, k_p = jax.random.split(key)
    x = jax.random.normal(k_x, (B, look_back, f_dim), jnp.float32)
    params = init_params(k_p, f_dim, h_dim, layer)

    out = lstm_atten_forward(x, params, look_back=look_back, pre_len=pre_len,
                             f_dim=f_dim, h_dim=h_dim, num_layers=layer)
    jax.block_until_ready(out)
    assert out.shape == (B, pre_len) and out.dtype == jnp.float32
    print("KERNEL_OK")
</pallas_src>

<mosaic_0001>
module attributes {stable_mosaic.version = 11 : i64} {
  func.func @kernel(%arg0: memref<8x8x4xf32, #tpu.memory_space<vmem>>, %arg1: memref<4x128xbf16, #tpu.memory_space<vmem>>, %arg2: memref<32x128xbf16, #tpu.memory_space<vmem>>, %arg3: memref<1x128xf32, #tpu.memory_space<vmem>>, %arg4: memref<32x128xbf16, #tpu.memory_space<vmem>>, %arg5: memref<32x128xbf16, #tpu.memory_space<vmem>>, %arg6: memref<1x128xf32, #tpu.memory_space<vmem>>, %arg7: memref<64x128xbf16, #tpu.memory_space<vmem>>, %arg8: memref<1x128xf32, #tpu.memory_space<vmem>>, %arg9: memref<64x160xbf16, #tpu.memory_space<vmem>>, %arg10: memref<1x160xf32, #tpu.memory_space<vmem>>, %arg11: memref<1x128xf32, #tpu.memory_space<vmem>>, %arg12: memref<1x1xf32, #tpu.memory_space<vmem>>, %arg13: memref<8x4xf32, #tpu.memory_space<vmem>>) attributes {dimension_semantics = [], scalar_prefetch = 0 : i64, scratch_operands = 0 : i64, tpu.core_type = #tpu.core_type<tc>} {
    %c0 = arith.constant 0 : index
    %c0_0 = arith.constant 0 : index
    %c0_1 = arith.constant 0 : index
    %0 = vector.load %arg0[%c0, %c0_0, %c0_1] : memref<8x8x4xf32, #tpu.memory_space<vmem>>, vector<8x8x4xf32>
    %1 = vector.shape_cast %0 : vector<8x8x4xf32> to vector<64x4xf32>
    %2 = arith.truncf %1 : vector<64x4xf32> to vector<64x4xbf16>
    %c0_2 = arith.constant 0 : index
    %c0_3 = arith.constant 0 : index
    %3 = vector.load %arg1[%c0_2, %c0_3] : memref<4x128xbf16, #tpu.memory_space<vmem>>, vector<4x128xbf16>
    %c0_4 = arith.constant 0 : index
    %c0_5 = arith.constant 0 : index
    %4 = vector.load %arg2[%c0_4, %c0_5] : memref<32x128xbf16, #tpu.memory_space<vmem>>, vector<32x128xbf16>
    %c0_6 = arith.constant 0 : index
    %c0_7 = arith.constant 0 : index
    %5 = vector.load %arg3[%c0_6, %c0_7] : memref<1x128xf32, #tpu.memory_space<vmem>>, vector<1x128xf32>
    %cst = arith.constant dense<0.000000e+00> : vector<64x128xf32>
    %6 = tpu.matmul %2, %3, %cst {dimension_numbers = #tpu.dot_dimension_numbers<[1], [0], [0], [1], [0, 0, 1, 1], [], []>} : vector<64x4xbf16>, vector<4x128xbf16>, vector<64x128xf32> -> vector<64x128xf32>
    %7 = vector.broadcast %5 : vector<1x128xf32> to vector<64x128xf32>
    %8 = arith.addf %6, %7 : vector<64x128xf32>
    %cst_8 = arith.constant 0.000000e+00 : f32
    %9 = vector.broadcast %cst_8 : f32 to vector<8x32xf32>
    %cst_9 = arith.constant 0.000000e+00 : f32
    %10 = vector.broadcast %cst_9 : f32 to vector<8x32xf32>
    %11 = vector.extract_strided_slice %8 {offsets = [0, 0], sizes = [8, 128], strides = [1, 1]} : vector<64x128xf32> to vector<8x128xf32>
    %12 = arith.truncf %9 : vector<8x32xf32> to vector<8x32xbf16>
    %cst_10 = arith.constant dense<0.000000e+00> : vector<8x128xf32>
    %13 = tpu.matmul %12, %4, %cst_10 {dimension_numbers = #tpu.dot_dimension_numbers<[1], [0], [0], [1], [0, 0, 1, 1], [], []>} : vector<8x32xbf16>, vector<32x128xbf16>, vector<8x128xf32> -> vector<8x128xf32>
    %14 = arith.addf %11, %13 : vector<8x128xf32>
    %15 = arith.negf %14 : vector<8x128xf32>
    %16 = math.exp %15 : vector<8x128xf32>
    %cst_11 = arith.constant 1.000000e+00 : f32
    %17 = vector.broadcast %cst_11 : f32 to vector<8x128xf32>
    %18 = arith.addf %17, %16 : vector<8x128xf32>
    %19 = arith.divf %17, %18 : vector<8x128xf32>
    %20 = math.tanh %14 : vector<8x128xf32>
    %21 = vector.extract_strided_slice %19 {offsets = [0, 0], sizes = [8, 32], strides = [1, 1]} : vector<8x128xf32> to vector<8x32xf32>
    %22 = vector.extract_strided_slice %19 {offsets = [0, 32], sizes = [8, 32], strides = [1, 1]} : vector<8x128xf32> to vector<8x32xf32>
    %23 = vector.extract_strided_slice %20 {offsets = [0, 64], sizes = [8, 32], strides = [1, 1]} : vector<8x128xf32> to vector<8x32xf32>
    %24 = vector.extract_strided_slice %19 {offsets = [0, 96], sizes = [8, 32], strides = [1, 1]} : vector<8x128xf32> to vector<8x32xf32>
    %25 = arith.mulf %22, %10 : vector<8x32xf32>
    %26 = arith.mulf %21, %23 : vector<8x32xf32>
    %27 = arith.addf %25, %26 : vector<8x32xf32>
    %28 = math.tanh %27 : vector<8x32xf32>
    %29 = arith.mulf %24, %28 : vector<8x32xf32>
    %30 = vector.extract_strided_slice %8 {offsets = [8, 0], sizes = [8, 128], strides = [1, 1]} : vector<64x128xf32> to vector<8x128xf32>
    %31 = arith.truncf %29 : vector<8x32xf32> to vector<8x32xbf16>
    %cst_12 = arith.constant dense<0.000000e+00> : vector<8x128xf32>
    %32 = tpu.matmul %31, %4, %cst_12 {dimension_numbers = #tpu.dot_dimension_numbers<[1], [0], [0], [1], [0, 0, 1, 1], [], []>} : vector<8x32xbf16>, vector<32x128xbf16>, vector<8x128xf32> -> vector<8x128xf32>
    %33 = arith.addf %30, %32 : vector<8x128xf32>
    %34 = arith.negf %33 : vector<8x128xf32>
    %35 = math.exp %34 : vector<8x128xf32>
    %cst_13 = arith.constant 1.000000e+00 : f32
    %36 = vector.broadcast %cst_13 : f32 to vector<8x128xf32>
    %37 = arith.addf %36, %35 : vector<8x128xf32>
    %38 = arith.divf %36, %37 : vector<8x128xf32>
    %39 = math.tanh %33 : vector<8x128xf32>
    %40 = vector.extract_strided_slice %38 {offsets = [0, 0], sizes = [8, 32], strides = [1, 1]} : vector<8x128xf32> to vector<8x32xf32>
    %41 = vector.extract_strided_slice %38 {offsets = [0, 32], sizes = [8, 32], strides = [1, 1]} : vector<8x128xf32> to vector<8x32xf32>
    %42 = vector.extract_strided_slice %39 {offsets = [0, 64], sizes = [8, 32], strides = [1, 1]} : vector<8x128xf32> to vector<8x32xf32>
    %43 = vector.extract_strided_slice %38 {offsets = [0, 96], sizes = [8, 32], strides = [1, 1]} : vector<8x128xf32> to vector<8x32xf32>
    %44 = arith.mulf %41, %27 : vector<8x32xf32>
    %45 = arith.mulf %40, %42 : vector<8x32xf32>
    %46 = arith.addf %44, %45 : vector<8x32xf32>
    %47 = math.tanh %46 : vector<8x32xf32>
    %48 = arith.mulf %43, %47 : vector<8x32xf32>
    %49 = vector.extract_strided_slice %8 {offsets = [16, 0], sizes = [8, 128], strides = [1, 1]} : vector<64x128xf32> to vector<8x128xf32>
    %50 = arith.truncf %48 : vector<8x32xf32> to vector<8x32xbf16>
    %cst_14 = arith.constant dense<0.000000e+00> : vector<8x128xf32>
    %51 = tpu.matmul %50, %4, %cst_14 {dimension_numbers = #tpu.dot_dimension_numbers<[1], [0], [0], [1], [0, 0, 1, 1], [], []>} : vector<8x32xbf16>, vector<32x128xbf16>, vector<8x128xf32> -> vector<8x128xf32>
    %52 = arith.addf %49, %51 : vector<8x128xf32>
    %53 = arith.negf %52 : vector<8x128xf32>
    %54 = math.exp %53 : vector<8x128xf32>
    %cst_15 = arith.constant 1.000000e+00 : f32
    %55 = vector.broadcast %cst_15 : f32 to vector<8x128xf32>
    %56 = arith.addf %55, %54 : vector<8x128xf32>
    %57 = arith.divf %55, %56 : vector<8x128xf32>
    %58 = math.tanh %52 : vector<8x128xf32>
    %59 = vector.extract_strided_slice %57 {offsets = [0, 0], sizes = [8, 32], strides = [1, 1]} : vector<8x128xf32> to vector<8x32xf32>
    %60 = vector.extract_strided_slice %57 {offsets = [0, 32], sizes = [8, 32], strides = [1, 1]} : vector<8x128xf32> to vector<8x32xf32>
    %61 = vector.extract_strided_slice %58 {offsets = [0, 64], sizes = [8, 32], strides = [1, 1]} : vector<8x128xf32> to vector<8x32xf32>
    %62 = vector.extract_strided_slice %57 {offsets = [0, 96], sizes = [8, 32], strides = [1, 1]} : vector<8x128xf32> to vector<8x32xf32>
    %63 = arith.mulf %60, %46 : vector<8x32xf32>
    %64 = arith.mulf %59, %61 : vector<8x32xf32>
    %65 = arith.addf %63, %64 : vector<8x32xf32>
    %66 = math.tanh %65 : vector<8x32xf32>
    %67 = arith.mulf %62, %66 : vector<8x32xf32>
    %68 = vector.extract_strided_slice %8 {offsets = [24, 0], sizes = [8, 128], strides = [1, 1]} : vector<64x128xf32> to vector<8x128xf32>
    %69 = arith.truncf %67 : vector<8x32xf32> to vector<8x32xbf16>
    %cst_16 = arith.constant dense<0.000000e+00> : vector<8x128xf32>
    %70 = tpu.matmul %69, %4, %cst_16 {dimension_numbers = #tpu.dot_dimension_numbers<[1], [0], [0], [1], [0, 0, 1, 1], [], []>} : vector<8x32xbf16>, vector<32x128xbf16>, vector<8x128xf32> -> vector<8x128xf32>
    %71 = arith.addf %68, %70 : vector<8x128xf32>
    %72 = arith.negf %71 : vector<8x128xf32>
    %73 = math.exp %72 : vector<8x128xf32>
    %cst_17 = arith.constant 1.000000e+00 : f32
    %74 = vector.broadcast %cst_17 : f32 to vector<8x128xf32>
    %75 = arith.addf %74, %73 : vector<8x128xf32>
    %76 = arith.divf %74, %75 : vector<8x128xf32>
    %77 = math.tanh %71 : vector<8x128xf32>
    %78 = vector.extract_strided_slice %76 {offsets = [0, 0], sizes = [8, 32], strides = [1, 1]} : vector<8x128xf32> to vector<8x32xf32>
    %79 = vector.extract_strided_slice %76 {offsets = [0, 32], sizes = [8, 32], strides = [1, 1]} : vector<8x128xf32> to vector<8x32xf32>
    %80 = vector.extract_strided_slice %77 {offsets = [0, 64], sizes = [8, 32], strides = [1, 1]} : vector<8x128xf32> to vector<8x32xf32>
    %81 = vector.extract_strided_slice %76 {offsets = [0, 96], sizes = [8, 32], strides = [1, 1]} : vector<8x128xf32> to vector<8x32xf32>
    %82 = arith.mulf %79, %65 : vector<8x32xf32>
    %83 = arith.mulf %78, %80 : vector<8x32xf32>
    %84 = arith.addf %82, %83 : vector<8x32xf32>
    %85 = math.tanh %84 : vector<8x32xf32>
    %86 = arith.mulf %81, %85 : vector<8x32xf32>
    %87 = vector.extract_strided_slice %8 {offsets = [32, 0], sizes = [8, 128], strides = [1, 1]} : vector<64x128xf32> to vector<8x128xf32>
    %88 = arith.truncf %86 : vector<8x32xf32> to vector<8x32xbf16>
    %cst_18 = arith.constant dense<0.000000e+00> : vector<8x128xf32>
    %89 = tpu.matmul %88, %4, %cst_18 {dimension_numbers = #tpu.dot_dimension_numbers<[1], [0], [0], [1], [0, 0, 1, 1], [], []>} : vector<8x32xbf16>, vector<32x128xbf16>, vector<8x128xf32> -> vector<8x128xf32>
    %90 = arith.addf %87, %89 : vector<8x128xf32>
    %91 = arith.negf %90 : vector<8x128xf32>
    %92 = math.exp %91 : vector<8x128xf32>
    %cst_19 = arith.constant 1.000000e+00 : f32
    %93 = vector.broadcast %cst_19 : f32 to vector<8x128xf32>
    %94 = arith.addf %93, %92 : vector<8x128xf32>
    %95 = arith.divf %93, %94 : vector<8x128xf32>
    %96 = math.tanh %90 : vector<8x128xf32>
    %97 = vector.extract_strided_slice %95 {offsets = [0, 0], sizes = [8, 32], strides = [1, 1]} : vector<8x128xf32> to vector<8x32xf32>
    %98 = vector.extract_strided_slice %95 {offsets = [0, 32], sizes = [8, 32], strides = [1, 1]} : vector<8x128xf32> to vector<8x32xf32>
    %99 = vector.extract_strided_slice %96 {offsets = [0, 64], sizes = [8, 32], strides = [1, 1]} : vector<8x128xf32> to vector<8x32xf32>
    %100 = vector.extract_strided_slice %95 {offsets = [0, 96], sizes = [8, 32], strides = [1, 1]} : vector<8x128xf32> to vector<8x32xf32>
    %101 = arith.mulf %98, %84 : vector<8x32xf32>
    %102 = arith.mulf %97, %99 : vector<8x32xf32>
    %103 = arith.addf %101, %102 : vector<8x32xf32>
    %104 = math.tanh %103 : vector<8x32xf32>
    %105 = arith.mulf %100, %104 : vector<8x32xf32>
    %106 = vector.extract_strided_slice %8 {offsets = [40, 0], sizes = [8, 128], strides = [1, 1]} : vector<64x128xf32> to vector<8x128xf32>
    %107 = arith.truncf %105 : vector<8x32xf32> to vector<8x32xbf16>
    %cst_20 = arith.constant dense<0.000000e+00> : vector<8x128xf32>
    %108 = tpu.matmul %107, %4, %cst_20 {dimension_numbers = #tpu.dot_dimension_numbers<[1], [0], [0], [1], [0, 0, 1, 1], [], []>} : vector<8x32xbf16>, vector<32x128xbf16>, vector<8x128xf32> -> vector<8x128xf32>
    %109 = arith.addf %106, %108 : vector<8x128xf32>
    %110 = arith.negf %109 : vector<8x128xf32>
    %111 = math.exp %110 : vector<8x128xf32>
    %cst_21 = arith.constant 1.000000e+00 : f32
    %112 = vector.broadcast %cst_21 : f32 to vector<8x128xf32>
    %113 = arith.addf %112, %111 : vector<8x128xf32>
    %114 = arith.divf %112, %113 : vector<8x128xf32>
    %115 = math.tanh %109 : vector<8x128xf32>
    %116 = vector.extract_strided_slice %114 {offsets = [0, 0], sizes = [8, 32], strides = [1, 1]} : vector<8x128xf32> to vector<8x32xf32>
    %117 = vector.extract_strided_slice %114 {offsets = [0, 32], sizes = [8, 32], strides = [1, 1]} : vector<8x128xf32> to vector<8x32xf32>
    %118 = vector.extract_strided_slice %115 {offsets = [0, 64], sizes = [8, 32], strides = [1, 1]} : vector<8x128xf32> to vector<8x32xf32>
    %119 = vector.extract_strided_slice %114 {offsets = [0, 96], sizes = [8, 32], strides = [1, 1]} : vector<8x128xf32> to vector<8x32xf32>
    %120 = arith.mulf %117, %103 : vector<8x32xf32>
    %121 = arith.mulf %116, %118 : vector<8x32xf32>
    %122 = arith.addf %120, %121 : vector<8x32xf32>
    %123 = math.tanh %122 : vector<8x32xf32>
    %124 = arith.mulf %119, %123 : vector<8x32xf32>
    %125 = vector.extract_strided_slice %8 {offsets = [48, 0], sizes = [8, 128], strides = [1, 1]} : vector<64x128xf32> to vector<8x128xf32>
    %126 = arith.truncf %124 : vector<8x32xf32> to vector<8x32xbf16>
    %cst_22 = arith.constant dense<0.000000e+00> : vector<8x128xf32>
    %127 = tpu.matmul %126, %4, %cst_22 {dimension_numbers = #tpu.dot_dimension_numbers<[1], [0], [0], [1], [0, 0, 1, 1], [], []>} : vector<8x32xbf16>, vector<32x128xbf16>, vector<8x128xf32> -> vector<8x128xf32>
    %128 = arith.addf %125, %127 : vector<8x128xf32>
    %129 = arith.negf %128 : vector<8x128xf32>
    %130 = math.exp %129 : vector<8x128xf32>
    %cst_23 = arith.constant 1.000000e+00 : f32
    %131 = vector.broadcast %cst_23 : f32 to vector<8x128xf32>
    %132 = arith.addf %131, %130 : vector<8x128xf32>
    %133 = arith.divf %131, %132 : vector<8x128xf32>
    %134 = math.tanh %128 : vector<8x128xf32>
    %135 = vector.extract_strided_slice %133 {offsets = [0, 0], sizes = [8, 32], strides = [1, 1]} : vector<8x128xf32> to vector<8x32xf32>
    %136 = vector.extract_strided_slice %133 {offsets = [0, 32], sizes = [8, 32], strides = [1, 1]} : vector<8x128xf32> to vector<8x32xf32>
    %137 = vector.extract_strided_slice %134 {offsets = [0, 64], sizes = [8, 32], strides = [1, 1]} : vector<8x128xf32> to vector<8x32xf32>
    %138 = vector.extract_strided_slice %133 {offsets = [0, 96], sizes = [8, 32], strides = [1, 1]} : vector<8x128xf32> to vector<8x32xf32>
    %139 = arith.mulf %136, %122 : vector<8x32xf32>
    %140 = arith.mulf %135, %137 : vector<8x32xf32>
    %141 = arith.addf %139, %140 : vector<8x32xf32>
    %142 = math.tanh %141 : vector<8x32xf32>
    %143 = arith.mulf %138, %142 : vector<8x32xf32>
    %144 = vector.extract_strided_slice %8 {offsets = [56, 0], sizes = [8, 128], strides = [1, 1]} : vector<64x128xf32> to vector<8x128xf32>
    %145 = arith.truncf %143 : vector<8x32xf32> to vector<8x32xbf16>
    %cst_24 = arith.constant dense<0.000000e+00> : vector<8x128xf32>
    %146 = tpu.matmul %145, %4, %cst_24 {dimension_numbers = #tpu.dot_dimension_numbers<[1], [0], [0], [1], [0, 0, 1, 1], [], []>} : vector<8x32xbf16>, vector<32x128xbf16>, vector<8x128xf32> -> vector<8x128xf32>
    %147 = arith.addf %144, %146 : vector<8x128xf32>
    %148 = arith.negf %147 : vector<8x128xf32>
    %149 = math.exp %148 : vector<8x128xf32>
    %cst_25 = arith.constant 1.000000e+00 : f32
    %150 = vector.broadcast %cst_25 : f32 to vector<8x128xf32>
    %151 = arith.addf %150, %149 : vector<8x128xf32>
    %152 = arith.divf %150, %151 : vector<8x128xf32>
    %153 = math.tanh %147 : vector<8x128xf32>
    %154 = vector.extract_strided_slice %152 {offsets = [0, 0], sizes = [8, 32], strides = [1, 1]} : vector<8x128xf32> to vector<8x32xf32>
    %155 = vector.extract_strided_slice %152 {offsets = [0, 32], sizes = [8, 32], strides = [1, 1]} : vector<8x128xf32> to vector<8x32xf32>
    %156 = vector.extract_strided_slice %153 {offsets = [0, 64], sizes = [8, 32], strides = [1, 1]} : vector<8x128xf32> to vector<8x32xf32>
    %157 = vector.extract_strided_slice %152 {offsets = [0, 96], sizes = [8, 32], strides = [1, 1]} : vector<8x128xf32> to vector<8x32xf32>
    %158 = arith.mulf %155, %141 : vector<8x32xf32>
    %159 = arith.mulf %154, %156 : vector<8x32xf32>
    %160 = arith.addf %158, %159 : vector<8x32xf32>
    %161 = math.tanh %160 : vector<8x32xf32>
    %162 = arith.mulf %157, %161 : vector<8x32xf32>
    %163 = vector.shape_cast %29 : vector<8x32xf32> to vector<1x8x32xf32>
    %164 = vector.shape_cast %48 : vector<8x32xf32> to vector<1x8x32xf32>
    %165 = vector.shape_cast %67 : vector<8x32xf32> to vector<1x8x32xf32>
    %166 = vector.shape_cast %86 : vector<8x32xf32> to vector<1x8x32xf32>
    %167 = vector.shape_cast %105 : vector<8x32xf32> to vector<1x8x32xf32>
    %168 = vector.shape_cast %124 : vector<8x32xf32> to vector<1x8x32xf32>
    %169 = vector.shape_cast %143 : vector<8x32xf32> to vector<1x8x32xf32>
    %170 = vector.shape_cast %162 : vector<8x32xf32> to vector<1x8x32xf32>
    %171 = tpu.concatenate %163, %164, %165, %166, %167, %168, %169, %170 in 0 : vector<1x8x32xf32>, vector<1x8x32xf32>, vector<1x8x32xf32>, vector<1x8x32xf32>, vector<1x8x32xf32>, vector<1x8x32xf32>, vector<1x8x32xf32>, vector<1x8x32xf32> -> vector<8x8x32xf32>
    %172 = vector.shape_cast %171 : vector<8x8x32xf32> to vector<64x32xf32>
    %173 = arith.truncf %172 : vector<64x32xf32> to vector<64x32xbf16>
    %c0_26 = arith.constant 0 : index
    %c0_27 = arith.constant 0 : index
    %174 = vector.load %arg4[%c0_26, %c0_27] : memref<32x128xbf16, #tpu.memory_space<vmem>>, vector<32x128xbf16>
    %c0_28 = arith.constant 0 : index
    %c0_29 = arith.constant 0 : index
    %175 = vector.load %arg5[%c0_28, %c0_29] : memref<32x128xbf16, #tpu.memory_space<vmem>>, vector<32x128xbf16>
    %c0_30 = arith.constant 0 : index
    %c0_31 = arith.constant 0 : index
    %176 = vector.load %arg6[%c0_30, %c0_31] : memref<1x128xf32, #tpu.memory_space<vmem>>, vector<1x128xf32>
    %cst_32 = arith.constant dense<0.000000e+00> : vector<64x128xf32>
    %177 = tpu.matmul %173, %174, %cst_32 {dimension_numbers = #tpu.dot_dimension_numbers<[1], [0], [0], [1], [0, 0, 1, 1], [], []>} : vector<64x32xbf16>, vector<32x128xbf16>, vector<64x128xf32> -> vector<64x128xf32>
    %178 = vector.broadcast %176 : vector<1x128xf32> to vector<64x128xf32>
    %179 = arith.addf %177, %178 : vector<64x128xf32>
    %cst_33 = arith.constant 0.000000e+00 : f32
    %180 = vector.broadcast %cst_33 : f32 to vector<8x32xf32>
    %cst_34 = arith.constant 0.000000e+00 : f32
    %181 = vector.broadcast %cst_34 : f32 to vector<8x32xf32>
    %182 = vector.extract_strided_slice %179 {offsets = [0, 0], sizes = [8, 128], strides = [1, 1]} : vector<64x128xf32> to vector<8x128xf32>
    %183 = arith.truncf %180 : vector<8x32xf32> to vector<8x32xbf16>
    %cst_35 = arith.constant dense<0.000000e+00> : vector<8x128xf32>
    %184 = tpu.matmul %183, %175, %cst_35 {dimension_numbers = #tpu.dot_dimension_numbers<[1], [0], [0], [1], [0, 0, 1, 1], [], []>} : vector<8x32xbf16>, vector<32x128xbf16>, vector<8x128xf32> -> vector<8x128xf32>
    %185 = arith.addf %182, %184 : vector<8x128xf32>
    %186 = arith.negf %185 : vector<8x128xf32>
    %187 = math.exp %186 : vector<8x128xf32>
    %cst_36 = arith.constant 1.000000e+00 : f32
    %188 = vector.broadcast %cst_36 : f32 to vector<8x128xf32>
    %189 = arith.addf %188, %187 : vector<8x128xf32>
    %190 = arith.divf %188, %189 : vector<8x128xf32>
    %191 = math.tanh %185 : vector<8x128xf32>
    %192 = vector.extract_strided_slice %190 {offsets = [0, 0], sizes = [8, 32], strides = [1, 1]} : vector<8x128xf32> to vector<8x32xf32>
    %193 = vector.extract_strided_slice %190 {offsets = [0, 32], sizes = [8, 32], strides = [1, 1]} : vector<8x128xf32> to vector<8x32xf32>
    %194 = vector.extract_strided_slice %191 {offsets = [0, 64], sizes = [8, 32], strides = [1, 1]} : vector<8x128xf32> to vector<8x32xf32>
    %195 = vector.extract_strided_slice %190 {offsets = [0, 96], sizes = [8, 32], strides = [1, 1]} : vector<8x128xf32> to vector<8x32xf32>
    %196 = arith.mulf %193, %181 : vector<8x32xf32>
    %197 = arith.mulf %192, %194 : vector<8x32xf32>
    %198 = arith.addf %196, %197 : vector<8x32xf32>
    %199 = math.tanh %198 : vector<8x32xf32>
    %200 = arith.mulf %195, %199 : vector<8x32xf32>
    %201 = vector.extract_strided_slice %179 {offsets = [8, 0], sizes = [8, 128], strides = [1, 1]} : vector<64x128xf32> to vector<8x128xf32>
    %202 = arith.truncf %200 : vector<8x32xf32> to vector<8x32xbf16>
    %cst_37 = arith.constant dense<0.000000e+00> : vector<8x128xf32>
    %203 = tpu.matmul %202, %175, %cst_37 {dimension_numbers = #tpu.dot_dimension_numbers<[1], [0], [0], [1], [0, 0, 1, 1], [], []>} : vector<8x32xbf16>, vector<32x128xbf16>, vector<8x128xf32> -> vector<8x128xf32>
    %204 = arith.addf %201, %203 : vector<8x128xf32>
    %205 = arith.negf %204 : vector<8x128xf32>
    %206 = math.exp %205 : vector<8x128xf32>
    %cst_38 = arith.constant 1.000000e+00 : f32
    %207 = vector.broadcast %cst_38 : f32 to vector<8x128xf32>
    %208 = arith.addf %207, %206 : vector<8x128xf32>
    %209 = arith.divf %207, %208 : vector<8x128xf32>
    %210 = math.tanh %204 : vector<8x128xf32>
    %211 = vector.extract_strided_slice %209 {offsets = [0, 0], sizes = [8, 32], strides = [1, 1]} : vector<8x128xf32> to vector<8x32xf32>
    %212 = vector.extract_strided_slice %209 {offsets = [0, 32], sizes = [8, 32], strides = [1, 1]} : vector<8x128xf32> to vector<8x32xf32>
    %213 = vector.extract_strided_slice %210 {offsets = [0, 64], sizes = [8, 32], strides = [1, 1]} : vector<8x128xf32> to vector<8x32xf32>
    %214 = vector.extract_strided_slice %209 {offsets = [0, 96], sizes = [8, 32], strides = [1, 1]} : vector<8x128xf32> to vector<8x32xf32>
    %215 = arith.mulf %212, %198 : vector<8x32xf32>
    %216 = arith.mulf %211, %213 : vector<8x32xf32>
    %217 = arith.addf %215, %216 : vector<8x32xf32>
    %218 = math.tanh %217 : vector<8x32xf32>
    %219 = arith.mulf %214, %218 : vector<8x32xf32>
    %220 = vector.extract_strided_slice %179 {offsets = [16, 0], sizes = [8, 128], strides = [1, 1]} : vector<64x128xf32> to vector<8x128xf32>
    %221 = arith.truncf %219 : vector<8x32xf32> to vector<8x32xbf16>
    %cst_39 = arith.constant dense<0.000000e+00> : vector<8x128xf32>
    %222 = tpu.matmul %221, %175, %cst_39 {dimension_numbers = #tpu.dot_dimension_numbers<[1], [0], [0], [1], [0, 0, 1, 1], [], []>} : vector<8x32xbf16>, vector<32x128xbf16>, vector<8x128xf32> -> vector<8x128xf32>
    %223 = arith.addf %220, %222 : vector<8x128xf32>
    %224 = arith.negf %223 : vector<8x128xf32>
    %225 = math.exp %224 : vector<8x128xf32>
    %cst_40 = arith.constant 1.000000e+00 : f32
    %226 = vector.broadcast %cst_40 : f32 to vector<8x128xf32>
    %227 = arith.addf %226, %225 : vector<8x128xf32>
    %228 = arith.divf %226, %227 : vector<8x128xf32>
    %229 = math.tanh %223 : vector<8x128xf32>
    %230 = vector.extract_strided_slice %228 {offsets = [0, 0], sizes = [8, 32], strides = [1, 1]} : vector<8x128xf32> to vector<8x32xf32>
    %231 = vector.extract_strided_slice %228 {offsets = [0, 32], sizes = [8, 32], strides = [1, 1]} : vector<8x128xf32> to vector<8x32xf32>
    %232 = vector.extract_strided_slice %229 {offsets = [0, 64], sizes = [8, 32], strides = [1, 1]} : vector<8x128xf32> to vector<8x32xf32>
    %233 = vector.extract_strided_slice %228 {offsets = [0, 96], sizes = [8, 32], strides = [1, 1]} : vector<8x128xf32> to vector<8x32xf32>
    %234 = arith.mulf %231, %217 : vector<8x32xf32>
    %235 = arith.mulf %230, %232 : vector<8x32xf32>
    %236 = arith.addf %234, %235 : vector<8x32xf32>
    %237 = math.tanh %236 : vector<8x32xf32>
    %238 = arith.mulf %233, %237 : vector<8x32xf32>
    %239 = vector.extract_strided_slice %179 {offsets = [24, 0], sizes = [8, 128], strides = [1, 1]} : vector<64x128xf32> to vector<8x128xf32>
    %240 = arith.truncf %238 : vector<8x32xf32> to vector<8x32xbf16>
    %cst_41 = arith.constant dense<0.000000e+00> : vector<8x128xf32>
    %241 = tpu.matmul %240, %175, %cst_41 {dimension_numbers = #tpu.dot_dimension_numbers<[1], [0], [0], [1], [0, 0, 1, 1], [], []>} : vector<8x32xbf16>, vector<32x128xbf16>, vector<8x128xf32> -> vector<8x128xf32>
    %242 = arith.addf %239, %241 : vector<8x128xf32>
    %243 = arith.negf %242 : vector<8x128xf32>
    %244 = math.exp %243 : vector<8x128xf32>
    %cst_42 = arith.constant 1.000000e+00 : f32
    %245 = vector.broadcast %cst_42 : f32 to vector<8x128xf32>
    %246 = arith.addf %245, %244 : vector<8x128xf32>
    %247 = arith.divf %245, %246 : vector<8x128xf32>
    %248 = math.tanh %242 : vector<8x128xf32>
    %249 = vector.extract_strided_slice %247 {offsets = [0, 0], sizes = [8, 32], strides = [1, 1]} : vector<8x128xf32> to vector<8x32xf32>
    %250 = vector.extract_strided_slice %247 {offsets = [0, 32], sizes = [8, 32], strides = [1, 1]} : vector<8x128xf32> to vector<8x32xf32>
    %251 = vector.extract_strided_slice %248 {offsets = [0, 64], sizes = [8, 32], strides = [1, 1]} : vector<8x128xf32> to vector<8x32xf32>
    %252 = vector.extract_strided_slice %247 {offsets = [0, 96], sizes = [8, 32], strides = [1, 1]} : vector<8x128xf32> to vector<8x32xf32>
    %253 = arith.mulf %250, %236 : vector<8x32xf32>
    %254 = arith.mulf %249, %251 : vector<8x32xf32>
    %255 = arith.addf %253, %254 : vector<8x32xf32>
    %256 = math.tanh %255 : vector<8x32xf32>
    %257 = arith.mulf %252, %256 : vector<8x32xf32>
    %258 = vector.extract_strided_slice %179 {offsets = [32, 0], sizes = [8, 128], strides = [1, 1]} : vector<64x128xf32> to vector<8x128xf32>
    %259 = arith.truncf %257 : vector<8x32xf32> to vector<8x32xbf16>
    %cst_43 = arith.constant dense<0.000000e+00> : vector<8x128xf32>
    %260 = tpu.matmul %259, %175, %cst_43 {dimension_numbers = #tpu.dot_dimension_numbers<[1], [0], [0], [1], [0, 0, 1, 1], [], []>} : vector<8x32xbf16>, vector<32x128xbf16>, vector<8x128xf32> -> vector<8x128xf32>
    %261 = arith.addf %258, %260 : vector<8x128xf32>
    %262 = arith.negf %261 : vector<8x128xf32>
    %263 = math.exp %262 : vector<8x128xf32>
    %cst_44 = arith.constant 1.000000e+00 : f32
    %264 = vector.broadcast %cst_44 : f32 to vector<8x128xf32>
    %265 = arith.addf %264, %263 : vector<8x128xf32>
    %266 = arith.divf %264, %265 : vector<8x128xf32>
    %267 = math.tanh %261 : vector<8x128xf32>
    %268 = vector.extract_strided_slice %266 {offsets = [0, 0], sizes = [8, 32], strides = [1, 1]} : vector<8x128xf32> to vector<8x32xf32>
    %269 = vector.extract_strided_slice %266 {offsets = [0, 32], sizes = [8, 32], strides = [1, 1]} : vector<8x128xf32> to vector<8x32xf32>
    %270 = vector.extract_strided_slice %267 {offsets = [0, 64], sizes = [8, 32], strides = [1, 1]} : vector<8x128xf32> to vector<8x32xf32>
    %271 = vector.extract_strided_slice %266 {offsets = [0, 96], sizes = [8, 32], strides = [1, 1]} : vector<8x128xf32> to vector<8x32xf32>
    %272 = arith.mulf %269, %255 : vector<8x32xf32>
    %273 = arith.mulf %268, %270 : vector<8x32xf32>
    %274 = arith.addf %272, %273 : vector<8x32xf32>
    %275 = math.tanh %274 : vector<8x32xf32>
    %276 = arith.mulf %271, %275 : vector<8x32xf32>
    %277 = vector.extract_strided_slice %179 {offsets = [40, 0], sizes = [8, 128], strides = [1, 1]} : vector<64x128xf32> to vector<8x128xf32>
    %278 = arith.truncf %276 : vector<8x32xf32> to vector<8x32xbf16>
    %cst_45 = arith.constant dense<0.000000e+00> : vector<8x128xf32>
    %279 = tpu.matmul %278, %175, %cst_45 {dimension_numbers = #tpu.dot_dimension_numbers<[1], [0], [0], [1], [0, 0, 1, 1], [], []>} : vector<8x32xbf16>, vector<32x128xbf16>, vector<8x128xf32> -> vector<8x128xf32>
    %280 = arith.addf %277, %279 : vector<8x128xf32>
    %281 = arith.negf %280 : vector<8x128xf32>
    %282 = math.exp %281 : vector<8x128xf32>
    %cst_46 = arith.constant 1.000000e+00 : f32
    %283 = vector.broadcast %cst_46 : f32 to vector<8x128xf32>
    %284 = arith.addf %283, %282 : vector<8x128xf32>
    %285 = arith.divf %283, %284 : vector<8x128xf32>
    %286 = math.tanh %280 : vector<8x128xf32>
    %287 = vector.extract_strided_slice %285 {offsets = [0, 0], sizes = [8, 32], strides = [1, 1]} : vector<8x128xf32> to vector<8x32xf32>
    %288 = vector.extract_strided_slice %285 {offsets = [0, 32], sizes = [8, 32], strides = [1, 1]} : vector<8x128xf32> to vector<8x32xf32>
    %289 = vector.extract_strided_slice %286 {offsets = [0, 64], sizes = [8, 32], strides = [1, 1]} : vector<8x128xf32> to vector<8x32xf32>
    %290 = vector.extract_strided_slice %285 {offsets = [0, 96], sizes = [8, 32], strides = [1, 1]} : vector<8x128xf32> to vector<8x32xf32>
    %291 = arith.mulf %288, %274 : vector<8x32xf32>
    %292 = arith.mulf %287, %289 : vector<8x32xf32>
    %293 = arith.addf %291, %292 : vector<8x32xf32>
    %294 = math.tanh %293 : vector<8x32xf32>
    %295 = arith.mulf %290, %294 : vector<8x32xf32>
    %296 = vector.extract_strided_slice %179 {offsets = [48, 0], sizes = [8, 128], strides = [1, 1]} : vector<64x128xf32> to vector<8x128xf32>
    %297 = arith.truncf %295 : vector<8x32xf32> to vector<8x32xbf16>
    %cst_47 = arith.constant dense<0.000000e+00> : vector<8x128xf32>
    %298 = tpu.matmul %297, %175, %cst_47 {dimension_numbers = #tpu.dot_dimension_numbers<[1], [0], [0], [1], [0, 0, 1, 1], [], []>} : vector<8x32xbf16>, vector<32x128xbf16>, vector<8x128xf32> -> vector<8x128xf32>
    %299 = arith.addf %296, %298 : vector<8x128xf32>
    %300 = arith.negf %299 : vector<8x128xf32>
    %301 = math.exp %300 : vector<8x128xf32>
    %cst_48 = arith.constant 1.000000e+00 : f32
    %302 = vector.broadcast %cst_48 : f32 to vector<8x128xf32>
    %303 = arith.addf %302, %301 : vector<8x128xf32>
    %304 = arith.divf %302, %303 : vector<8x128xf32>
    %305 = math.tanh %299 : vector<8x128xf32>
    %306 = vector.extract_strided_slice %304 {offsets = [0, 0], sizes = [8, 32], strides = [1, 1]} : vector<8x128xf32> to vector<8x32xf32>
    %307 = vector.extract_strided_slice %304 {offsets = [0, 32], sizes = [8, 32], strides = [1, 1]} : vector<8x128xf32> to vector<8x32xf32>
    %308 = vector.extract_strided_slice %305 {offsets = [0, 64], sizes = [8, 32], strides = [1, 1]} : vector<8x128xf32> to vector<8x32xf32>
    %309 = vector.extract_strided_slice %304 {offsets = [0, 96], sizes = [8, 32], strides = [1, 1]} : vector<8x128xf32> to vector<8x32xf32>
    %310 = arith.mulf %307, %293 : vector<8x32xf32>
    %311 = arith.mulf %306, %308 : vector<8x32xf32>
    %312 = arith.addf %310, %311 : vector<8x32xf32>
    %313 = math.tanh %312 : vector<8x32xf32>
    %314 = arith.mulf %309, %313 : vector<8x32xf32>
    %315 = vector.extract_strided_slice %179 {offsets = [56, 0], sizes = [8, 128], strides = [1, 1]} : vector<64x128xf32> to vector<8x128xf32>
    %316 = arith.truncf %314 : vector<8x32xf32> to vector<8x32xbf16>
    %cst_49 = arith.constant dense<0.000000e+00> : vector<8x128xf32>
    %317 = tpu.matmul %316, %175, %cst_49 {dimension_numbers = #tpu.dot_dimension_numbers<[1], [0], [0], [1], [0, 0, 1, 1], [], []>} : vector<8x32xbf16>, vector<32x128xbf16>, vector<8x128xf32> -> vector<8x128xf32>
    %318 = arith.addf %315, %317 : vector<8x128xf32>
    %319 = arith.negf %318 : vector<8x128xf32>
    %320 = math.exp %319 : vector<8x128xf32>
    %cst_50 = arith.constant 1.000000e+00 : f32
    %321 = vector.broadcast %cst_50 : f32 to vector<8x128xf32>
    %322 = arith.addf %321, %320 : vector<8x128xf32>
    %323 = arith.divf %321, %322 : vector<8x128xf32>
    %324 = math.tanh %318 : vector<8x128xf32>
    %325 = vector.extract_strided_slice %323 {offsets = [0, 0], sizes = [8, 32], strides = [1, 1]} : vector<8x128xf32> to vector<8x32xf32>
    %326 = vector.extract_strided_slice %323 {offsets = [0, 32], sizes = [8, 32], strides = [1, 1]} : vector<8x128xf32> to vector<8x32xf32>
    %327 = vector.extract_strided_slice %324 {offsets = [0, 64], sizes = [8, 32], strides = [1, 1]} : vector<8x128xf32> to vector<8x32xf32>
    %328 = vector.extract_strided_slice %323 {offsets = [0, 96], sizes = [8, 32], strides = [1, 1]} : vector<8x128xf32> to vector<8x32xf32>
    %329 = arith.mulf %326, %312 : vector<8x32xf32>
    %330 = arith.mulf %325, %327 : vector<8x32xf32>
    %331 = arith.addf %329, %330 : vector<8x32xf32>
    %332 = math.tanh %331 : vector<8x32xf32>
    %333 = arith.mulf %328, %332 : vector<8x32xf32>
    %334 = vector.shape_cast %200 : vector<8x32xf32> to vector<8x1x32xf32>
    %335 = vector.shape_cast %219 : vector<8x32xf32> to vector<8x1x32xf32>
    %336 = vector.shape_cast %238 : vector<8x32xf32> to vector<8x1x32xf32>
    %337 = vector.shape_cast %257 : vector<8x32xf32> to vector<8x1x32xf32>
    %338 = vector.shape_cast %276 : vector<8x32xf32> to vector<8x1x32xf32>
    %339 = vector.shape_cast %295 : vector<8x32xf32> to vector<8x1x32xf32>
    %340 = vector.shape_cast %314 : vector<8x32xf32> to vector<8x1x32xf32>
    %341 = vector.shape_cast %333 : vector<8x32xf32> to vector<8x1x32xf32>
    %342 = tpu.concatenate %334, %335, %336, %337, %338, %339, %340, %341 in 1 : vector<8x1x32xf32>, vector<8x1x32xf32>, vector<8x1x32xf32>, vector<8x1x32xf32>, vector<8x1x32xf32>, vector<8x1x32xf32>, vector<8x1x32xf32>, vector<8x1x32xf32> -> vector<8x8x32xf32>
    %c0_51 = arith.constant 0 : index
    %c0_52 = arith.constant 0 : index
    %343 = vector.load %arg7[%c0_51, %c0_52] : memref<64x128xbf16, #tpu.memory_space<vmem>>, vector<64x128xbf16>
    %c0_53 = arith.constant 0 : index
    %c0_54 = arith.constant 0 : index
    %344 = vector.load %arg8[%c0_53, %c0_54] : memref<1x128xf32, #tpu.memory_space<vmem>>, vector<1x128xf32>
    %c0_55 = arith.constant 0 : index
    %c0_56 = arith.constant 0 : index
    %345 = vector.load %arg9[%c0_55, %c0_56] : memref<64x160xbf16, #tpu.memory_space<vmem>>, vector<64x160xbf16>
    %c0_57 = arith.constant 0 : index
    %c0_58 = arith.constant 0 : index
    %346 = vector.load %arg10[%c0_57, %c0_58] : memref<1x160xf32, #tpu.memory_space<vmem>>, vector<1x160xf32>
    %c0_59 = arith.constant 0 : index
    %c0_60 = arith.constant 0 : index
    %347 = vector.load %arg11[%c0_59, %c0_60] : memref<1x128xf32, #tpu.memory_space<vmem>>, vector<1x128xf32>
    %c0_61 = arith.constant 0 : index
    %c0_62 = arith.constant 0 : index
    %348 = vector.load %arg12[%c0_61, %c0_62] : memref<1x1xf32, #tpu.memory_space<vmem>>, vector<1x1xf32>
    %349 = tpu.concatenate %333, %333 in 1 : vector<8x32xf32>, vector<8x32xf32> -> vector<8x64xf32>
    %350 = arith.truncf %349 : vector<8x64xf32> to vector<8x64xbf16>
    %cst_63 = arith.constant dense<0.000000e+00> : vector<8x128xf32>
    %351 = tpu.matmul %350, %343, %cst_63 {dimension_numbers = #tpu.dot_dimension_numbers<[1], [0], [0], [1], [0, 0, 1, 1], [], []>} : vector<8x64xbf16>, vector<64x128xbf16>, vector<8x128xf32> -> vector<8x128xf32>
    %352 = vector.broadcast %344 : vector<1x128xf32> to vector<8x128xf32>
    %353 = arith.addf %351, %352 : vector<8x128xf32>
    %354 = arith.negf %353 : vector<8x128xf32>
    %355 = math.exp %354 : vector<8x128xf32>
    %cst_64 = arith.constant 1.000000e+00 : f32
    %356 = vector.broadcast %cst_64 : f32 to vector<8x128xf32>
    %357 = arith.addf %356, %355 : vector<8x128xf32>
    %358 = arith.divf %356, %357 : vector<8x128xf32>
    %359 = math.tanh %353 : vector<8x128xf32>
    %360 = vector.extract_strided_slice %358 {offsets = [0, 0], sizes = [8, 32], strides = [1, 1]} : vector<8x128xf32> to vector<8x32xf32>
    %361 = vector.extract_strided_slice %358 {offsets = [0, 32], sizes = [8, 32], strides = [1, 1]} : vector<8x128xf32> to vector<8x32xf32>
    %362 = vector.extract_strided_slice %359 {offsets = [0, 64], sizes = [8, 32], strides = [1, 1]} : vector<8x128xf32> to vector<8x32xf32>
    %363 = vector.extract_strided_slice %358 {offsets = [0, 96], sizes = [8, 32], strides = [1, 1]} : vector<8x128xf32> to vector<8x32xf32>
    %364 = arith.mulf %361, %331 : vector<8x32xf32>
    %365 = arith.mulf %360, %362 : vector<8x32xf32>
    %366 = arith.addf %364, %365 : vector<8x32xf32>
    %367 = math.tanh %366 : vector<8x32xf32>
    %368 = arith.mulf %363, %367 : vector<8x32xf32>
    %369 = vector.shape_cast %368 : vector<8x32xf32> to vector<8x1x32xf32>
    %370 = vector.broadcast %369 : vector<8x1x32xf32> to vector<8x8x32xf32>
    %371 = arith.mulf %342, %370 : vector<8x8x32xf32>
    %cst_65 = arith.constant dense<0.000000e+00> : vector<8x8xf32>
    %372 = vector.multi_reduction <add>, %371, %cst_65 [2] : vector<8x8x32xf32> to vector<8x8xf32>
    %cst_66 = arith.constant dense<0xFF800000> : vector<8xf32>
    %373 = vector.multi_reduction <maximumf>, %372, %cst_66 [1] : vector<8x8xf32> to vector<8xf32>
    %374 = vector.shape_cast %373 : vector<8xf32> to vector<8x1xf32>
    %375 = vector.broadcast %374 : vector<8x1xf32> to vector<8x8xf32>
    %376 = arith.subf %372, %375 : vector<8x8xf32>
    %377 = math.exp %376 : vector<8x8xf32>
    %cst_67 = arith.constant dense<0.000000e+00> : vector<8xf32>
    %378 = vector.multi_reduction <add>, %377, %cst_67 [1] : vector<8x8xf32> to vector<8xf32>
    %379 = vector.shape_cast %378 : vector<8xf32> to vector<8x1xf32>
    %380 = vector.broadcast %379 : vector<8x1xf32> to vector<8x8xf32>
    %381 = arith.divf %377, %380 : vector<8x8xf32>
    %382 = vector.shape_cast %381 : vector<8x8xf32> to vector<8x8x1xf32>
    %383 = vector.broadcast %382 : vector<8x8x1xf32> to vector<8x8x32xf32>
    %384 = arith.mulf %383, %342 : vector<8x8x32xf32>
    %cst_68 = arith.constant dense<0.000000e+00> : vector<8x32xf32>
    %385 = vector.multi_reduction <add>, %384, %cst_68 [1] : vector<8x8x32xf32> to vector<8x32xf32>
    %386 = tpu.concatenate %385, %368 in 1 : vector<8x32xf32>, vector<8x32xf32> -> vector<8x64xf32>
    %387 = arith.truncf %386 : vector<8x64xf32> to vector<8x64xbf16>
    %cst_69 = arith.constant dense<0.000000e+00> : vector<8x160xf32>
    %388 = tpu.matmul %387, %345, %cst_69 {dimension_numbers = #tpu.dot_dimension_numbers<[1], [0], [0], [1], [0, 0, 1, 1], [], []>} : vector<8x64xbf16>, vector<64x160xbf16>, vector<8x160xf32> -> vector<8x160xf32>
    %389 = vector.broadcast %346 : vector<1x160xf32> to vector<8x160xf32>
    %390 = arith.addf %388, %389 : vector<8x160xf32>
    %391 = vector.extract_strided_slice %390 {offsets = [0, 0], sizes = [8, 128], strides = [1, 1]} : vector<8x160xf32> to vector<8x128xf32>
    %392 = vector.extract_strided_slice %390 {offsets = [0, 128], sizes = [8, 32], strides = [1, 1]} : vector<8x160xf32> to vector<8x32xf32>
    %393 = vector.broadcast %347 : vector<1x128xf32> to vector<8x128xf32>
    %394 = arith.mulf %391, %393 : vector<8x128xf32>
    %cst_70 = arith.constant dense<0.000000e+00> : vector<8xf32>
    %395 = vector.multi_reduction <add>, %394, %cst_70 [1] : vector<8x128xf32> to vector<8xf32>
    %396 = vector.shape_cast %395 : vector<8xf32> to vector<8x1xf32>
    %397 = vector.broadcast %348 : vector<1x1xf32> to vector<8x1xf32>
    %398 = arith.addf %396, %397 : vector<8x1xf32>
    %399 = tpu.concatenate %392, %368 in 1 : vector<8x32xf32>, vector<8x32xf32> -> vector<8x64xf32>
    %400 = arith.truncf %399 : vector<8x64xf32> to vector<8x64xbf16>
    %cst_71 = arith.constant dense<0.000000e+00> : vector<8x128xf32>
    %401 = tpu.matmul %400, %343, %cst_71 {dimension_numbers = #tpu.dot_dimension_numbers<[1], [0], [0], [1], [0, 0, 1, 1], [], []>} : vector<8x64xbf16>, vector<64x128xbf16>, vector<8x128xf32> -> vector<8x128xf32>
    %402 = vector.broadcast %344 : vector<1x128xf32> to vector<8x128xf32>
    %403 = arith.addf %401, %402 : vector<8x128xf32>
    %404 = arith.negf %403 : vector<8x128xf32>
    %405 = math.exp %404 : vector<8x128xf32>
    %cst_72 = arith.constant 1.000000e+00 : f32
    %406 = vector.broadcast %cst_72 : f32 to vector<8x128xf32>
    %407 = arith.addf %406, %405 : vector<8x128xf32>
    %408 = arith.divf %406, %407 : vector<8x128xf32>
    %409 = math.tanh %403 : vector<8x128xf32>
    %410 = vector.extract_strided_slice %408 {offsets = [0, 0], sizes = [8, 32], strides = [1, 1]} : vector<8x128xf32> to vector<8x32xf32>
    %411 = vector.extract_strided_slice %408 {offsets = [0, 32], sizes = [8, 32], strides = [1, 1]} : vector<8x128xf32> to vector<8x32xf32>
    %412 = vector.extract_strided_slice %409 {offsets = [0, 64], sizes = [8, 32], strides = [1, 1]} : vector<8x128xf32> to vector<8x32xf32>
    %413 = vector.extract_strided_slice %408 {offsets = [0, 96], sizes = [8, 32], strides = [1, 1]} : vector<8x128xf32> to vector<8x32xf32>
    %414 = arith.mulf %411, %366 : vector<8x32xf32>
    %415 = arith.mulf %410, %412 : vector<8x32xf32>
    %416 = arith.addf %414, %415 : vector<8x32xf32>
    %417 = math.tanh %416 : vector<8x32xf32>
    %418 = arith.mulf %413, %417 : vector<8x32xf32>
    %419 = vector.shape_cast %418 : vector<8x32xf32> to vector<8x1x32xf32>
    %420 = vector.broadcast %419 : vector<8x1x32xf32> to vector<8x8x32xf32>
    %421 = arith.mulf %342, %420 : vector<8x8x32xf32>
    %cst_73 = arith.constant dense<0.000000e+00> : vector<8x8xf32>
    %422 = vector.multi_reduction <add>, %421, %cst_73 [2] : vector<8x8x32xf32> to vector<8x8xf32>
    %cst_74 = arith.constant dense<0xFF800000> : vector<8xf32>
    %423 = vector.multi_reduction <maximumf>, %422, %cst_74 [1] : vector<8x8xf32> to vector<8xf32>
    %424 = vector.shape_cast %423 : vector<8xf32> to vector<8x1xf32>
    %425 = vector.broadcast %424 : vector<8x1xf32> to vector<8x8xf32>
    %426 = arith.subf %422, %425 : vector<8x8xf32>
    %427 = math.exp %426 : vector<8x8xf32>
    %cst_75 = arith.constant dense<0.000000e+00> : vector<8xf32>
    %428 = vector.multi_reduction <add>, %427, %cst_75 [1] : vector<8x8xf32> to vector<8xf32>
    %429 = vector.shape_cast %428 : vector<8xf32> to vector<8x1xf32>
    %430 = vector.broadcast %429 : vector<8x1xf32> to vector<8x8xf32>
    %431 = arith.divf %427, %430 : vector<8x8xf32>
    %432 = vector.shape_cast %431 : vector<8x8xf32> to vector<8x8x1xf32>
    %433 = vector.broadcast %432 : vector<8x8x1xf32> to vector<8x8x32xf32>
    %434 = arith.mulf %433, %342 : vector<8x8x32xf32>
    %cst_76 = arith.constant dense<0.000000e+00> : vector<8x32xf32>
    %435 = vector.multi_reduction <add>, %434, %cst_76 [1] : vector<8x8x32xf32> to vector<8x32xf32>
    %436 = tpu.concatenate %435, %418 in 1 : vector<8x32xf32>, vector<8x32xf32> -> vector<8x64xf32>
    %437 = arith.truncf %436 : vector<8x64xf32> to vector<8x64xbf16>
    %cst_77 = arith.constant dense<0.000000e+00> : vector<8x160xf32>
    %438 = tpu.matmul %437, %345, %cst_77 {dimension_numbers = #tpu.dot_dimension_numbers<[1], [0], [0], [1], [0, 0, 1, 1], [], []>} : vector<8x64xbf16>, vector<64x160xbf16>, vector<8x160xf32> -> vector<8x160xf32>
    %439 = vector.broadcast %346 : vector<1x160xf32> to vector<8x160xf32>
    %440 = arith.addf %438, %439 : vector<8x160xf32>
    %441 = vector.extract_strided_slice %440 {offsets = [0, 0], sizes = [8, 128], strides = [1, 1]} : vector<8x160xf32> to vector<8x128xf32>
    %442 = vector.extract_strided_slice %440 {offsets = [0, 128], sizes = [8, 32], strides = [1, 1]} : vector<8x160xf32> to vector<8x32xf32>
    %443 = vector.broadcast %347 : vector<1x128xf32> to vector<8x128xf32>
    %444 = arith.mulf %441, %443 : vector<8x128xf32>
    %cst_78 = arith.constant dense<0.000000e+00> : vector<8xf32>
    %445 = vector.multi_reduction <add>, %444, %cst_78 [1] : vector<8x128xf32> to vector<8xf32>
    %446 = vector.shape_cast %445 : vector<8xf32> to vector<8x1xf32>
    %447 = vector.broadcast %348 : vector<1x1xf32> to vector<8x1xf32>
    %448 = arith.addf %446, %447 : vector<8x1xf32>
    %449 = tpu.concatenate %442, %418 in 1 : vector<8x32xf32>, vector<8x32xf32> -> vector<8x64xf32>
    %450 = arith.truncf %449 : vector<8x64xf32> to vector<8x64xbf16>
    %cst_79 = arith.constant dense<0.000000e+00> : vector<8x128xf32>
    %451 = tpu.matmul %450, %343, %cst_79 {dimension_numbers = #tpu.dot_dimension_numbers<[1], [0], [0], [1], [0, 0, 1, 1], [], []>} : vector<8x64xbf16>, vector<64x128xbf16>, vector<8x128xf32> -> vector<8x128xf32>
    %452 = vector.broadcast %344 : vector<1x128xf32> to vector<8x128xf32>
    %453 = arith.addf %451, %452 : vector<8x128xf32>
    %454 = arith.negf %453 : vector<8x128xf32>
    %455 = math.exp %454 : vector<8x128xf32>
    %cst_80 = arith.constant 1.000000e+00 : f32
    %456 = vector.broadcast %cst_80 : f32 to vector<8x128xf32>
    %457 = arith.addf %456, %455 : vector<8x128xf32>
    %458 = arith.divf %456, %457 : vector<8x128xf32>
    %459 = math.tanh %453 : vector<8x128xf32>
    %460 = vector.extract_strided_slice %458 {offsets = [0, 0], sizes = [8, 32], strides = [1, 1]} : vector<8x128xf32> to vector<8x32xf32>
    %461 = vector.extract_strided_slice %458 {offsets = [0, 32], sizes = [8, 32], strides = [1, 1]} : vector<8x128xf32> to vector<8x32xf32>
    %462 = vector.extract_strided_slice %459 {offsets = [0, 64], sizes = [8, 32], strides = [1, 1]} : vector<8x128xf32> to vector<8x32xf32>
    %463 = vector.extract_strided_slice %458 {offsets = [0, 96], sizes = [8, 32], strides = [1, 1]} : vector<8x128xf32> to vector<8x32xf32>
    %464 = arith.mulf %461, %416 : vector<8x32xf32>
    %465 = arith.mulf %460, %462 : vector<8x32xf32>
    %466 = arith.addf %464, %465 : vector<8x32xf32>
    %467 = math.tanh %466 : vector<8x32xf32>
    %468 = arith.mulf %463, %467 : vector<8x32xf32>
    %469 = vector.shape_cast %468 : vector<8x32xf32> to vector<8x1x32xf32>
    %470 = vector.broadcast %469 : vector<8x1x32xf32> to vector<8x8x32xf32>
    %471 = arith.mulf %342, %470 : vector<8x8x32xf32>
    %cst_81 = arith.constant dense<0.000000e+00> : vector<8x8xf32>
    %472 = vector.multi_reduction <add>, %471, %cst_81 [2] : vector<8x8x32xf32> to vector<8x8xf32>
    %cst_82 = arith.constant dense<0xFF800000> : vector<8xf32>
    %473 = vector.multi_reduction <maximumf>, %472, %cst_82 [1] : vector<8x8xf32> to vector<8xf32>
    %474 = vector.shape_cast %473 : vector<8xf32> to vector<8x1xf32>
    %475 = vector.broadcast %474 : vector<8x1xf32> to vector<8x8xf32>
    %476 = arith.subf %472, %475 : vector<8x8xf32>
    %477 = math.exp %476 : vector<8x8xf32>
    %cst_83 = arith.constant dense<0.000000e+00> : vector<8xf32>
    %478 = vector.multi_reduction <add>, %477, %cst_83 [1] : vector<8x8xf32> to vector<8xf32>
    %479 = vector.shape_cast %478 : vector<8xf32> to vector<8x1xf32>
    %480 = vector.broadcast %479 : vector<8x1xf32> to vector<8x8xf32>
    %481 = arith.divf %477, %480 : vector<8x8xf32>
    %482 = vector.shape_cast %481 : vector<8x8xf32> to vector<8x8x1xf32>
    %483 = vector.broadcast %482 : vector<8x8x1xf32> to vector<8x8x32xf32>
    %484 = arith.mulf %483, %342 : vector<8x8x32xf32>
    %cst_84 = arith.constant dense<0.000000e+00> : vector<8x32xf32>
    %485 = vector.multi_reduction <add>, %484, %cst_84 [1] : vector<8x8x32xf32> to vector<8x32xf32>
    %486 = tpu.concatenate %485, %468 in 1 : vector<8x32xf32>, vector<8x32xf32> -> vector<8x64xf32>
    %487 = arith.truncf %486 : vector<8x64xf32> to vector<8x64xbf16>
    %cst_85 = arith.constant dense<0.000000e+00> : vector<8x160xf32>
    %488 = tpu.matmul %487, %345, %cst_85 {dimension_numbers = #tpu.dot_dimension_numbers<[1], [0], [0], [1], [0, 0, 1, 1], [], []>} : vector<8x64xbf16>, vector<64x160xbf16>, vector<8x160xf32> -> vector<8x160xf32>
    %489 = vector.broadcast %346 : vector<1x160xf32> to vector<8x160xf32>
    %490 = arith.addf %488, %489 : vector<8x160xf32>
    %491 = vector.extract_strided_slice %490 {offsets = [0, 0], sizes = [8, 128], strides = [1, 1]} : vector<8x160xf32> to vector<8x128xf32>
    %492 = vector.extract_strided_slice %490 {offsets = [0, 128], sizes = [8, 32], strides = [1, 1]} : vector<8x160xf32> to vector<8x32xf32>
    %493 = vector.broadcast %347 : vector<1x128xf32> to vector<8x128xf32>
    %494 = arith.mulf %491, %493 : vector<8x128xf32>
    %cst_86 = arith.constant dense<0.000000e+00> : vector<8xf32>
    %495 = vector.multi_reduction <add>, %494, %cst_86 [1] : vector<8x128xf32> to vector<8xf32>
    %496 = vector.shape_cast %495 : vector<8xf32> to vector<8x1xf32>
    %497 = vector.broadcast %348 : vector<1x1xf32> to vector<8x1xf32>
    %498 = arith.addf %496, %497 : vector<8x1xf32>
    %499 = tpu.concatenate %492, %468 in 1 : vector<8x32xf32>, vector<8x32xf32> -> vector<8x64xf32>
    %500 = arith.truncf %499 : vector<8x64xf32> to vector<8x64xbf16>
    %cst_87 = arith.constant dense<0.000000e+00> : vector<8x128xf32>
    %501 = tpu.matmul %500, %343, %cst_87 {dimension_numbers = #tpu.dot_dimension_numbers<[1], [0], [0], [1], [0, 0, 1, 1], [], []>} : vector<8x64xbf16>, vector<64x128xbf16>, vector<8x128xf32> -> vector<8x128xf32>
    %502 = vector.broadcast %344 : vector<1x128xf32> to vector<8x128xf32>
    %503 = arith.addf %501, %502 : vector<8x128xf32>
    %504 = arith.negf %503 : vector<8x128xf32>
    %505 = math.exp %504 : vector<8x128xf32>
    %cst_88 = arith.constant 1.000000e+00 : f32
    %506 = vector.broadcast %cst_88 : f32 to vector<8x128xf32>
    %507 = arith.addf %506, %505 : vector<8x128xf32>
    %508 = arith.divf %506, %507 : vector<8x128xf32>
    %509 = math.tanh %503 : vector<8x128xf32>
    %510 = vector.extract_strided_slice %508 {offsets = [0, 0], sizes = [8, 32], strides = [1, 1]} : vector<8x128xf32> to vector<8x32xf32>
    %511 = vector.extract_strided_slice %508 {offsets = [0, 32], sizes = [8, 32], strides = [1, 1]} : vector<8x128xf32> to vector<8x32xf32>
    %512 = vector.extract_strided_slice %509 {offsets = [0, 64], sizes = [8, 32], strides = [1, 1]} : vector<8x128xf32> to vector<8x32xf32>
    %513 = vector.extract_strided_slice %508 {offsets = [0, 96], sizes = [8, 32], strides = [1, 1]} : vector<8x128xf32> to vector<8x32xf32>
    %514 = arith.mulf %511, %466 : vector<8x32xf32>
    %515 = arith.mulf %510, %512 : vector<8x32xf32>
    %516 = arith.addf %514, %515 : vector<8x32xf32>
    %517 = math.tanh %516 : vector<8x32xf32>
    %518 = arith.mulf %513, %517 : vector<8x32xf32>
    %519 = vector.shape_cast %518 : vector<8x32xf32> to vector<8x1x32xf32>
    %520 = vector.broadcast %519 : vector<8x1x32xf32> to vector<8x8x32xf32>
    %521 = arith.mulf %342, %520 : vector<8x8x32xf32>
    %cst_89 = arith.constant dense<0.000000e+00> : vector<8x8xf32>
    %522 = vector.multi_reduction <add>, %521, %cst_89 [2] : vector<8x8x32xf32> to vector<8x8xf32>
    %cst_90 = arith.constant dense<0xFF800000> : vector<8xf32>
    %523 = vector.multi_reduction <maximumf>, %522, %cst_90 [1] : vector<8x8xf32> to vector<8xf32>
    %524 = vector.shape_cast %523 : vector<8xf32> to vector<8x1xf32>
    %525 = vector.broadcast %524 : vector<8x1xf32> to vector<8x8xf32>
    %526 = arith.subf %522, %525 : vector<8x8xf32>
    %527 = math.exp %526 : vector<8x8xf32>
    %cst_91 = arith.constant dense<0.000000e+00> : vector<8xf32>
    %528 = vector.multi_reduction <add>, %527, %cst_91 [1] : vector<8x8xf32> to vector<8xf32>
    %529 = vector.shape_cast %528 : vector<8xf32> to vector<8x1xf32>
    %530 = vector.broadcast %529 : vector<8x1xf32> to vector<8x8xf32>
    %531 = arith.divf %527, %530 : vector<8x8xf32>
    %532 = vector.shape_cast %531 : vector<8x8xf32> to vector<8x8x1xf32>
    %533 = vector.broadcast %532 : vector<8x8x1xf32> to vector<8x8x32xf32>
    %534 = arith.mulf %533, %342 : vector<8x8x32xf32>
    %cst_92 = arith.constant dense<0.000000e+00> : vector<8x32xf32>
    %535 = vector.multi_reduction <add>, %534, %cst_92 [1] : vector<8x8x32xf32> to vector<8x32xf32>
    %536 = tpu.concatenate %535, %518 in 1 : vector<8x32xf32>, vector<8x32xf32> -> vector<8x64xf32>
    %537 = arith.truncf %536 : vector<8x64xf32> to vector<8x64xbf16>
    %cst_93 = arith.constant dense<0.000000e+00> : vector<8x160xf32>
    %538 = tpu.matmul %537, %345, %cst_93 {dimension_numbers = #tpu.dot_dimension_numbers<[1], [0], [0], [1], [0, 0, 1, 1], [], []>} : vector<8x64xbf16>, vector<64x160xbf16>, vector<8x160xf32> -> vector<8x160xf32>
    %539 = vector.broadcast %346 : vector<1x160xf32> to vector<8x160xf32>
    %540 = arith.addf %538, %539 : vector<8x160xf32>
    %541 = vector.extract_strided_slice %540 {offsets = [0, 0], sizes = [8, 128], strides = [1, 1]} : vector<8x160xf32> to vector<8x128xf32>
    %542 = vector.broadcast %347 : vector<1x128xf32> to vector<8x128xf32>
    %543 = arith.mulf %541, %542 : vector<8x128xf32>
    %cst_94 = arith.constant dense<0.000000e+00> : vector<8xf32>
    %544 = vector.multi_reduction <add>, %543, %cst_94 [1] : vector<8x128xf32> to vector<8xf32>
    %545 = vector.shape_cast %544 : vector<8xf32> to vector<8x1xf32>
    %546 = vector.broadcast %348 : vector<1x1xf32> to vector<8x1xf32>
    %547 = arith.addf %545, %546 : vector<8x1xf32>
    %548 = tpu.concatenate %398, %448, %498, %547 in 1 : vector<8x1xf32>, vector<8x1xf32>, vector<8x1xf32>, vector<8x1xf32> -> vector<8x4xf32>
    %c0_95 = arith.constant 0 : index
    %c0_96 = arith.constant 0 : index
    %549 = vector.load %arg13[%c0_95, %c0_96] : memref<8x4xf32, #tpu.memory_space<vmem>>, vector<8x4xf32>
    tpu.vector_store %arg13[%c0_95, %c0_96], %548 {strides = array<i32>} : memref<8x4xf32, #tpu.memory_space<vmem>>, vector<8x4xf32>,
    return
  }
}

</mosaic_0001>

<bundles_post_ra>
// kernel: tpu_custom_call.1
= control target key start
LH: loop header
LB: loop body
LE: loop exit
PB: predicated region body
PF: predicated region fallthrough
CT: control target
= control target key end

     0   :  { %s6031_s0 = inlined_call_operand.vmem [shape: f32[8,8,4], index: 0, kind: input, shape index: {}]   ;;  %s6032_s1 = inlined_call_operand.vmem [shape: bf16[4,128], index: 1, kind: input, shape index: {}]   ;;  %s6033_s2 = inlined_call_operand.hbm [shape: bf16[32,128], index: 2, kind: input, shape index: {}]   ;;  %s6034_s3 = inlined_call_operand.vmem [shape: f32[1,128], index: 3, kind: input, shape index: {}]   ;;  %s6035_s4 = inlined_call_operand.hbm [shape: bf16[32,128], index: 4, kind: input, shape index: {}]   ;;  %s6036_s5 = inlined_call_operand.hbm [shape: bf16[32,128], index: 5, kind: input, shape index: {}]   ;;  %s6037_s6 = inlined_call_operand.vmem [shape: f32[1,128], index: 6, kind: input, shape index: {}]   ;;  %s6038_s7 = inlined_call_operand.vmem [shape: bf16[64,128], index: 7, kind: input, shape index: {}]   ;;  %s6039_s8 = inlined_call_operand.vmem [shape: f32[1,128], index: 8, kind: input, shape index: {}]   ;;  %s6040_s9 = inlined_call_operand.vmem [shape: bf16[64,160], index: 9, kind: input, shape index: {}]   ;;  %s6041_s10 = inlined_call_operand.vmem [shape: f32[1,160], index: 10, kind: input, shape index: {}]   ;;  %s6042_s11 = inlined_call_operand.vmem [shape: f32[1,128], index: 11, kind: input, shape index: {}]   ;;  %s6043_s12 = inlined_call_operand.<no memory space> [shape: f32[1,1], index: 12, kind: input, shape index: {}]   ;;  %s6044_s13 = inlined_call_operand.vmem [shape: f32[8,4], index: 13, kind: output, shape index: {}]  }
   0x1   :  { %v18_v0 = vstv %s6043_s12 }
   0x2   :  { %19 = vst [vmem:[#allocation2] sm:$0x1] %v18_v0 }
   0x3   :  { %20 = vsyncpa [#allocation4], 0 }
   0x4   :  { %21 = vsyncpa [#allocation6], 0  ;;  %s45_s29 = sshll.u32 %s6035_s4, 4  ;;  %s4326_s30 = smov [#allocation5]   ;;  %s46_s29 = int_to_ptr.hbm [resolvable:$true] %s45_s29 }
   0x5   :  { %s47_s14 = sshll.u32 %s4326_s30, 4  ;;  %s30_s17 = sshll.u32 %s6033_s2, 4  ;;  %s48_s14 = int_to_ptr.vmem [resolvable:$true] %s47_s14  ;;  %s31_s17 = int_to_ptr.hbm [resolvable:$true] %s30_s17 }
   0x6   :  { %s4327_s18 = smov 64   ;;  %s4328_s19 = smov 4  }
   0x7   :  { %53 = dma.hbm_to_vmem [thread:$0]  %s46_s29, 256, %s48_s14, [#allocation6], %s4327_s18, %s4327_s18, %s4328_s19  }
   0x8   :  { %s4329_s12 = smov [#allocation3]   ;;  %s58_s4 = sshll.u32 %s6036_s5, 4  ;;  %s59_s4 = int_to_ptr.hbm [resolvable:$true] %s58_s4 }
   0x9   :  { %s32_s20 = sshll.u32 %s4329_s12, 4  ;;  %s4330_s23 = smov [#allocation7]   ;;  %s33_s20 = int_to_ptr.vmem [resolvable:$true] %s32_s20 }
   0xa   :  { %38 = dma.hbm_to_vmem [thread:$0]  %s31_s17, 256, %s33_s20, [#allocation4], %s4327_s18, %s4327_s18, %s4328_s19  }
   0xb   :  { %s60_s24 = sshll.u32 %s4330_s23, 4  ;;  %s61_s24 = int_to_ptr.vmem [resolvable:$true] %s60_s24 }
   0xc   :  { %66 = dma.hbm_to_vmem [thread:$0]  %s59_s4, 256, %s61_s24, [#allocation6], %s4327_s18, %s4327_s18, %s4328_s19  }
   0xd   :  { %4322 = dma.done.wait [#allocation4], 256  }
   0xe   :  { %4323 = vsyncadd [#allocation4], 4294967040 }
   0xf   :  { %4324 = dma.done.wait [#allocation6], 512  }
  0x10   :  { %4325 = vsyncadd [#allocation6], 4294966784  ;;  %v4331_v1 = vmov 0   ;;  %vm128_vm0 = vcmask 1041408   ;;  %v106_v2 = vld [vmem:[%s6032_s1] sm:$0x3] }
  0x11   :  { %3948 = vset.pattern.permute.xlu2 %v4331_v1  ;;  %3947 = vset.pattern.permute.xlu1 %v4331_v1  ;;  %v4430_v3 = vld [vmem:[#allocation3 + $0x8] sm:$0xff]  ;;  %v94_v4 = vld [vmem:[%s6031_s0] sm:$0xff]  ;;  %v130_v5 = vsel %vm128_vm0, %v106_v2, 0  ;;  %vm6045_vm1 = vcmask 31744   ;;  %s4332_s30 = smov 32   ;;  %vm6048_vm6 = vcmask 261120  }
  0x12   :  { %3946 = vset.pattern.permute.xlu0 %v4331_v1  ;;  %v95_v6 = vld [vmem:[%s6031_s0 + $0x8] sm:$0xff]  ;;  %139 = vmatpush.bf16.msra.mxu0 %v130_v5  ;;  %v4451_v9 = vld [vmem:[%s6034_s3] ss:$0 sm:$0xff]  ;;  %v96_v0 = vld [vmem:[%s6031_s0 + $0x10] sm:$0xff] }
  0x13   :  { %183 = vmatpush.bf16.msra.mxu1 %v4430_v3  ;;  %v102_v7 = vpack.c.bf16 %v95_v6, %v94_v4  ;;  %v3918_v8 = vld [vmem:[#allocation3] sm:$0xff]  ;;  %241 = vmatpush.bf16.msra.mxu2 %v4430_v3  ;;  %v97_v2 = vld [vmem:[%s6031_s0 + $0x18] sm:$0xff] }
  0x14   :  { %299 = vmatpush.bf16.msra.mxu3 %v4430_v3 }
  0x15   :  { %3793 = vmatmul.msk.bf16.vlgmr.msra.gmra.mxu0 %vm6045_vm1, %v102_v7 }
  0x17   :  { %184 = vmatpush.bf16.msra.mxu1 %v3918_v8  ;;  %242 = vmatpush.bf16.msra.mxu2 %v3918_v8 }
  0x18   :  { %300 = vmatpush.bf16.msra.mxu3 %v3918_v8 }
  0x1a   :  { %185 = vmatmul.bf16.vlgmr.msra.gmra.mxu1 %v4331_v1 }
  0x1b   :  { %357 = vmatpush.bf16.msrb.mxu1 %v4430_v3  ;;  %415 = vmatpush.bf16.msrb.mxu2 %v4430_v3 }
  0x1c   :  { %473 = vmatpush.bf16.msrb.mxu3 %v4430_v3 }
  0x1f   :  { %358 = vmatpush.bf16.msrb.mxu1 %v3918_v8  ;;  %416 = vmatpush.bf16.msrb.mxu2 %v3918_v8 }
  0x20   :  { %474 = vmatpush.bf16.msrb.mxu3 %v3918_v8 }
  0x23   :  { %531 = vmatpush.bf16.msra.mxu1 %v4430_v3 }
  0x27   :  { %532 = vmatpush.bf16.msra.mxu1 %v3918_v8 }
  0x92   :  { %v141_v10 = vpop.f32.mrf.mxu0 }
  0x93   :  { %v142_v11 = vadd.f32 %v4451_v9, %v141_v10 }
  0x97   :  { %v186_v12 = vpop.f32.mrf.mxu1 }
  0x98   :  { %v190_v13 = vadd.f32 %v186_v12, %v142_v11 }
  0x9a   :  { %3954 = vtanh.f32 %v190_v13  ;;  %v3805_v16 = vmul.f32 -1.442695, %v190_v13  ;;  %v143_v39 = vpop.f32.mrf.mxu0 }
  0x9b   :  { %v144_v40 = vadd.f32 %v4451_v9, %v143_v39 }
  0x9c   :  { %3956 = vpow2.f32 %v3805_v16 }
  0x9f   :  { %v188_v14 = vpop.f32.mrf.mxu1 }
  0xa0   :  { %v3955_v15 = vpop.eup %3954 }
  0xa1   :  { %213 = vrot.lane.b32.xlu0 %v3955_v15, %s4327_s18 }
  0xa2   :  { %v3957_v17 = vpop.eup %3956 }
  0xa3   :  { %v194_v18 = vadd.f32 1.0, %v3957_v17 }
  0xa5   :  { %3958 = vrcp.f32 %v194_v18  ;;  %v206_v24 = vand.u32 2147483648, %v194_v18  ;;  %vm200_vm3 = vweird.f32 %v194_v18  ;;  %v204_v25 = vand.u32 2147483647, %v194_v18 }
  0xa7   :  { %v207_v27 = vor.u32 1.1754944e-38, %v206_v24  ;;  %vm205_vm5 = vcmp.eq.f32.partialorder %v204_v25, 8.507059e+37 }
  0xab   :  { %v3959_v19 = vpop.eup %3958 }
  0xac   :  { %v196_v20 = vmul.f32 %v3959_v19, %v194_v18  ;;  %vm201_vm2 = vweird.f32 %v3959_v19 }
  0xad   :  { %vm202_vm4 = vmor %vm200_vm3, %vm201_vm2 }
  0xae   :  { %v197_v21 = vsub.f32 1.0, %v196_v20 }
  0xb0   :  { %v198_v22 = vmul.f32 %v3959_v19, %v197_v21 }
  0xb2   :  { %v199_v23 = vadd.f32 %v3959_v19, %v198_v22 }
  0xb4   :  { %v203_v26 = vsel %vm202_vm4, %v3959_v19, %v199_v23 }
  0xb5   :  { %v208_v29 = vsel %vm205_vm5, %v207_v27, %v203_v26 }
  0xb6   :  { %v211_v31 = vmul.f32 0.0, %v208_v29 }
 0x113   :  { %v214_v28 = vpop.permute.xlu0 %213 }
 0x114   :  { %v216_v30 = vmul.f32 %v214_v28, %v208_v29 }
 0x116   :  { %218 = vrot.lane.b32.xlu0 %v216_v30, %s4332_s30 }
 0x188   :  { %v219_v32 = vpop.permute.xlu0 %218 }
 0x189   :  { %v221_v33 = vadd.f32 %v219_v32, %v211_v31 }
 0x18b   :  { %3960 = vtanh.f32 %v221_v33 }
 0x191   :  { %v3961_v34 = vpop.eup %3960 }
 0x192   :  { %224 = vrot.lane.b32.xlu1 %v3961_v34, %s4327_s18 }
 0x204   :  { %v225_v35 = vpop.permute.xlu1 %224 }
 0x205   :  { %v4457_v36 = vmul.f32 %v225_v35, %v208_v29 }
 0x207   :  { %v228_v37 = vpack.c.bf16 %v4457_v36, %v4457_v36 }
 0x209   :  { %230 = vrot.lane.b32.xlu1 %v228_v37, %s4332_s30 }
 0x27b   :  { %v231_v38 = vpop.permute.xlu1 %230 }
 0x27c   :  { %3806 = vmatmul.msk.bf16.vlgmr.msra.gmra.mxu2 %vm6048_vm6, %v231_v38 }
 0x27d   :  { %589 = vmatpush.bf16.msra.mxu2 %v4430_v3  ;;  %v103_v3 = vpack.c.bf16 %v97_v2, %v96_v0  ;;  %v98_v0 = vld [vmem:[%s6031_s0 + $0x20] sm:$0xff]  ;;  %v99_v2 = vld [vmem:[%s6031_s0 + $0x28] sm:$0xff] }
 0x27f   :  { %3794 = vmatmul.msk.bf16.gmra.mxu0 %vm6045_vm1, %v103_v3  ;;  %v104_v3 = vpack.c.bf16 %v99_v2, %v98_v0  ;;  %v3920_v0 = vld [vmem:[#allocation5] sm:$0xff] }
 0x281   :  { %590 = vmatpush.bf16.msra.mxu2 %v3918_v8 }
 0x28f   :  { %3795 = vmatmul.msk.bf16.gmra.mxu0 %vm6045_vm1, %v104_v3 }
 0x2fc   :  { %v146_v8 = vpop.f32.mrf.mxu0 }
 0x2fd   :  { %v147_v10 = vadd.f32 %v4451_v9, %v146_v8 }
 0x2ff   :  { %v244_v41 = vpop.f32.mrf.mxu2 }
 0x300   :  { %v248_v42 = vadd.f32 %v244_v41, %v144_v40 }
 0x302   :  { %3962 = vtanh.f32 %v248_v42  ;;  %v3807_v45 = vmul.f32 -1.442695, %v248_v42 }
 0x304   :  { %3964 = vpow2.f32 %v3807_v45  ;;  %v148_v39 = vpop.f32.mrf.mxu0 }
 0x305   :  { %v149_v40 = vadd.f32 %v4451_v9, %v148_v39 }
 0x307   :  { %v246_v43 = vpop.f32.mrf.mxu2 }
 0x308   :  { %v3963_v44 = vpop.eup %3962 }
 0x309   :  { %271 = vrot.lane.b32.xlu2 %v3963_v44, %s4327_s18 }
 0x30a   :  { %v3965_v46 = vpop.eup %3964 }
 0x30b   :  { %v252_v47 = vadd.f32 1.0, %v3965_v46 }
 0x30d   :  { %3966 = vrcp.f32 %v252_v47  ;;  %v264_v53 = vand.u32 2147483648, %v252_v47  ;;  %vm258_vm8 = vweird.f32 %v252_v47  ;;  %v262_v54 = vand.u32 2147483647, %v252_v47 }
 0x30f   :  { %v265_v56 = vor.u32 1.1754944e-38, %v264_v53  ;;  %vm263_vm10 = vcmp.eq.f32.partialorder %v262_v54, 8.507059e+37 }
 0x313   :  { %v3967_v48 = vpop.eup %3966 }
 0x314   :  { %v254_v49 = vmul.f32 %v3967_v48, %v252_v47  ;;  %vm259_vm7 = vweird.f32 %v3967_v48 }
 0x315   :  { %vm260_vm9 = vmor %vm258_vm8, %vm259_vm7 }
 0x316   :  { %v255_v50 = vsub.f32 1.0, %v254_v49 }
 0x318   :  { %v256_v51 = vmul.f32 %v3967_v48, %v255_v50 }
 0x31a   :  { %v257_v52 = vadd.f32 %v3967_v48, %v256_v51 }
 0x31c   :  { %v261_v55 = vsel %vm260_vm9, %v3967_v48, %v257_v52 }
 0x31d   :  { %v266_v58 = vsel %vm263_vm10, %v265_v56, %v261_v55 }
 0x31e   :  { %v269_v60 = vmul.f32 %v266_v58, %v221_v33 }
 0x363   :  { %v272_v57 = vpop.permute.xlu2 %271 }
 0x364   :  { %v274_v59 = vmul.f32 %v272_v57, %v266_v58 }
 0x366   :  { %276 = vrot.lane.b32.xlu2 %v274_v59, %s4332_s30 }
 0x3c0   :  { %v277_v61 = vpop.permute.xlu2 %276 }
 0x3c1   :  { %v279_v62 = vadd.f32 %v277_v61, %v269_v60 }
 0x3c3   :  { %3968 = vtanh.f32 %v279_v62 }
 0x3c9   :  { %v3969_v63 = vpop.eup %3968 }
 0x3ca   :  { %282 = vrot.lane.b32.xlu0 %v3969_v63, %s4327_s18 }
 0x43c   :  { %v283_v4 = vpop.permute.xlu0 %282 }
 0x43d   :  { %v4475_v5 = vmul.f32 %v283_v4, %v266_v58 }
 0x43f   :  { %v286_v6 = vpack.c.bf16 %v4475_v5, %v4475_v5 }
 0x441   :  { %288 = vrot.lane.b32.xlu1 %v286_v6, %s4332_s30 }
 0x4b3   :  { %v289_v7 = vpop.permute.xlu1 %288 }
 0x4b4   :  { %3808 = vmatmul.msk.bf16.vlgmr.msra.gmra.mxu3 %vm6048_vm6, %v289_v7 }
 0x537   :  { %v302_v11 = vpop.f32.mrf.mxu3 }
 0x538   :  { %v306_v12 = vadd.f32 %v302_v11, %v147_v10  ;;  %v151_v10 = vpop.f32.mrf.mxu0 }
 0x539   :  { %v152_v11 = vadd.f32 %v4451_v9, %v151_v10 }
 0x53a   :  { %3970 = vtanh.f32 %v306_v12  ;;  %v3809_v15 = vmul.f32 -1.442695, %v306_v12 }
 0x53c   :  { %3972 = vpow2.f32 %v3809_v15 }
 0x53f   :  { %v304_v13 = vpop.f32.mrf.mxu3 }
 0x540   :  { %v3971_v14 = vpop.eup %3970 }
 0x541   :  { %329 = vrot.lane.b32.xlu2 %v3971_v14, %s4327_s18 }
 0x542   :  { %v3973_v16 = vpop.eup %3972 }
 0x543   :  { %v310_v17 = vadd.f32 1.0, %v3973_v16 }
 0x545   :  { %3974 = vrcp.f32 %v310_v17  ;;  %v322_v23 = vand.u32 2147483648, %v310_v17  ;;  %vm316_vm12 = vweird.f32 %v310_v17  ;;  %v320_v24 = vand.u32 2147483647, %v310_v17 }
 0x547   :  { %v323_v26 = vor.u32 1.1754944e-38, %v322_v23  ;;  %vm321_vm14 = vcmp.eq.f32.partialorder %v320_v24, 8.507059e+37 }
 0x54b   :  { %v3975_v18 = vpop.eup %3974 }
 0x54c   :  { %v312_v19 = vmul.f32 %v3975_v18, %v310_v17  ;;  %vm317_vm11 = vweird.f32 %v3975_v18 }
 0x54d   :  { %vm318_vm13 = vmor %vm316_vm12, %vm317_vm11 }
 0x54e   :  { %v313_v20 = vsub.f32 1.0, %v312_v19 }
 0x550   :  { %v314_v21 = vmul.f32 %v3975_v18, %v313_v20 }
 0x552   :  { %v315_v22 = vadd.f32 %v3975_v18, %v314_v21 }
 0x554   :  { %v319_v25 = vsel %vm318_vm13, %v3975_v18, %v315_v22 }
 0x555   :  { %v324_v28 = vsel %vm321_vm14, %v323_v26, %v319_v25 }
 0x556   :  { %v327_v30 = vmul.f32 %v324_v28, %v279_v62 }
 0x59b   :  { %v330_v27 = vpop.permute.xlu2 %329 }
 0x59c   :  { %v332_v29 = vmul.f32 %v330_v27, %v324_v28 }
 0x59e   :  { %334 = vrot.lane.b32.xlu0 %v332_v29, %s4332_s30 }
 0x610   :  { %v335_v31 = vpop.permute.xlu0 %334 }
 0x611   :  { %v337_v32 = vadd.f32 %v335_v31, %v327_v30 }
 0x613   :  { %3976 = vtanh.f32 %v337_v32 }
 0x619   :  { %v3977_v33 = vpop.eup %3976 }
 0x61a   :  { %340 = vrot.lane.b32.xlu1 %v3977_v33, %s4327_s18 }
 0x68c   :  { %v341_v34 = vpop.permute.xlu1 %340 }
 0x68d   :  { %v4485_v35 = vmul.f32 %v341_v34, %v324_v28 }
 0x68f   :  { %v344_v37 = vpack.c.bf16 %v4485_v35, %v4485_v35 }
 0x691   :  { %346 = vrot.lane.b32.xlu2 %v344_v37, %s4332_s30 }
 0x6eb   :  { %v347_v38 = vpop.permute.xlu2 %346 }
 0x6ec   :  { %3810 = vmatmul.msk.bf16.vlgmr.msrb.gmra.mxu1 %vm6048_vm6, %v347_v38 }
 0x769   :  { %v360_v41 = vpop.f32.mrf.mxu1 }
 0x76a   :  { %v364_v42 = vadd.f32 %v360_v41, %v149_v40  ;;  %v153_v41 = vpop.f32.mrf.mxu0 }
 0x76c   :  { %3978 = vtanh.f32 %v364_v42  ;;  %v3811_v45 = vmul.f32 -1.442695, %v364_v42  ;;  %v154_v42 = vadd.f32 %v4451_v9, %v153_v41 }
 0x76e   :  { %3980 = vpow2.f32 %v3811_v45 }
 0x771   :  { %v362_v43 = vpop.f32.mrf.mxu1 }
 0x772   :  { %v3979_v44 = vpop.eup %3978 }
 0x773   :  { %387 = vrot.lane.b32.xlu0 %v3979_v44, %s4327_s18 }
 0x774   :  { %v3981_v46 = vpop.eup %3980 }
 0x775   :  { %v368_v47 = vadd.f32 1.0, %v3981_v46 }
 0x777   :  { %3982 = vrcp.f32 %v368_v47  ;;  %v380_v53 = vand.u32 2147483648, %v368_v47  ;;  %vm374_vm2 = vweird.f32 %v368_v47  ;;  %v378_v54 = vand.u32 2147483647, %v368_v47 }
 0x779   :  { %v381_v56 = vor.u32 1.1754944e-38, %v380_v53  ;;  %vm379_vm4 = vcmp.eq.f32.partialorder %v378_v54, 8.507059e+37 }
 0x77d   :  { %v3983_v48 = vpop.eup %3982 }
 0x77e   :  { %v370_v49 = vmul.f32 %v3983_v48, %v368_v47  ;;  %vm375_vm15 = vweird.f32 %v3983_v48 }
 0x77f   :  { %vm376_vm3 = vmor %vm374_vm2, %vm375_vm15 }
 0x780   :  { %v371_v50 = vsub.f32 1.0, %v370_v49 }
 0x782   :  { %v372_v51 = vmul.f32 %v3983_v48, %v371_v50 }
 0x784   :  { %v373_v52 = vadd.f32 %v3983_v48, %v372_v51 }
 0x786   :  { %v377_v55 = vsel %vm376_vm3, %v3983_v48, %v373_v52 }
 0x787   :  { %v382_v58 = vsel %vm379_vm4, %v381_v56, %v377_v55 }
 0x788   :  { %v385_v60 = vmul.f32 %v382_v58, %v337_v32 }
 0x7e5   :  { %v388_v57 = vpop.permute.xlu0 %387 }
 0x7e6   :  { %v390_v59 = vmul.f32 %v388_v57, %v382_v58 }
 0x7e8   :  { %392 = vrot.lane.b32.xlu1 %v390_v59, %s4332_s30 }
 0x85a   :  { %v393_v61 = vpop.permute.xlu1 %392 }
 0x85b   :  { %v395_v62 = vadd.f32 %v393_v61, %v385_v60 }
 0x85d   :  { %3984 = vtanh.f32 %v395_v62 }
 0x863   :  { %v3985_v63 = vpop.eup %3984 }
 0x864   :  { %398 = vrot.lane.b32.xlu2 %v3985_v63, %s4327_s18  ;;  %v3921_v63 = vld [vmem:[#allocation5 + $0x8] sm:$0xff] }
 0x865   :  { %692 = vmatpush.bf16.msra.mxu3 %v3921_v63 }
 0x869   :  { %693 = vmatpush.bf16.msra.mxu3 %v3920_v0 }
 0x8be   :  { %v399_v4 = vpop.permute.xlu2 %398 }
 0x8bf   :  { %v4502_v6 = vmul.f32 %v399_v4, %v382_v58 }
 0x8c1   :  { %v402_v7 = vpack.c.bf16 %v4502_v6, %v4502_v6 }
 0x8c3   :  { %404 = vrot.lane.b32.xlu0 %v402_v7, %s4332_s30 }
 0x935   :  { %v405_v8 = vpop.permute.xlu0 %404 }
 0x936   :  { %3812 = vmatmul.msk.bf16.vlgmr.msrb.gmra.mxu2 %vm6048_vm6, %v405_v8 }
 0x9b9   :  { %v418_v12 = vpop.f32.mrf.mxu2 }
 0x9ba   :  { %v422_v13 = vadd.f32 %v418_v12, %v152_v11 }
 0x9bc   :  { %3986 = vtanh.f32 %v422_v13  ;;  %v3813_v16 = vmul.f32 -1.442695, %v422_v13 }
 0x9be   :  { %3988 = vpow2.f32 %v3813_v16 }
 0x9c1   :  { %v420_v14 = vpop.f32.mrf.mxu2 }
 0x9c2   :  { %v3987_v15 = vpop.eup %3986  ;;  %v4541_v14 = vld [vmem:[#allocation7 + $0x8] sm:$0xff] }
 0x9c3   :  { %445 = vrot.lane.b32.xlu1 %v3987_v15, %s4327_s18  ;;  %733 = vmatpush.bf16.msrb.mxu1 %v4541_v14  ;;  %v4544_v15 = vld [vmem:[#allocation7] sm:$0xff] }
 0x9c4   :  { %v3989_v17 = vpop.eup %3988  ;;  %791 = vmatpush.bf16.msrb.mxu2 %v4541_v14  ;;  %849 = vmatpush.bf16.msrb.mxu0 %v4541_v14 }
 0x9c5   :  { %v426_v18 = vadd.f32 1.0, %v3989_v17 }
 0x9c7   :  { %3990 = vrcp.f32 %v426_v18  ;;  %v438_v24 = vand.u32 2147483648, %v426_v18  ;;  %vm432_vm7 = vweird.f32 %v426_v18  ;;  %v436_v25 = vand.u32 2147483647, %v426_v18  ;;  %734 = vmatpush.bf16.msrb.mxu1 %v4544_v15 }
 0x9c8   :  { %792 = vmatpush.bf16.msrb.mxu2 %v4544_v15  ;;  %850 = vmatpush.bf16.msrb.mxu0 %v4544_v15 }
 0x9c9   :  { %v439_v27 = vor.u32 1.1754944e-38, %v438_v24  ;;  %vm437_vm9 = vcmp.eq.f32.partialorder %v436_v25, 8.507059e+37 }
 0x9cc   :  { %1023 = vmatpush.bf16.msra.mxu0 %v4541_v14 }
 0x9cd   :  { %v3991_v19 = vpop.eup %3990 }
 0x9ce   :  { %v428_v20 = vmul.f32 %v3991_v19, %v426_v18  ;;  %vm433_vm5 = vweird.f32 %v3991_v19 }
 0x9cf   :  { %vm434_vm8 = vmor %vm432_vm7, %vm433_vm5 }
 0x9d0   :  { %v429_v21 = vsub.f32 1.0, %v428_v20  ;;  %1024 = vmatpush.bf16.msra.mxu0 %v4544_v15 }
 0x9d2   :  { %v430_v22 = vmul.f32 %v3991_v19, %v429_v21 }
 0x9d4   :  { %v431_v23 = vadd.f32 %v3991_v19, %v430_v22 }
 0x9d6   :  { %v435_v26 = vsel %vm434_vm8, %v3991_v19, %v431_v23  ;;  %v4564_v23 = vld [vmem:[%s6037_s6] ss:$0 sm:$0xff] }
 0x9d7   :  { %v440_v29 = vsel %vm437_vm9, %v439_v27, %v435_v26 }
 0x9d8   :  { %v443_v31 = vmul.f32 %v440_v29, %v395_v62  ;;  %v634_v62 = vpack.c.bf16 %v4475_v5, %v4457_v36  ;;  %v100_v36 = vld [vmem:[%s6031_s0 + $0x30] sm:$0xff]  ;;  %v101_v5 = vld [vmem:[%s6031_s0 + $0x38] sm:$0xff] }
 0x9d9   :  { %v105_v10 = vpack.c.bf16 %v101_v5, %v100_v36 }
 0x9db   :  { %3796 = vmatmul.msk.bf16.gmra.mxu0 %vm6045_vm1, %v105_v10 }
 0xa35   :  { %v446_v28 = vpop.permute.xlu1 %445 }
 0xa36   :  { %v448_v30 = vmul.f32 %v446_v28, %v440_v29 }
 0xa38   :  { %450 = vrot.lane.b32.xlu2 %v448_v30, %s4332_s30 }
 0xa58   :  { %v156_v17 = vpop.f32.mrf.mxu0 }
 0xa59   :  { %v157_v18 = vadd.f32 %v4451_v9, %v156_v17 }
 0xa92   :  { %v451_v32 = vpop.permute.xlu2 %450 }
 0xa93   :  { %v453_v33 = vadd.f32 %v451_v32, %v443_v31 }
 0xa95   :  { %3992 = vtanh.f32 %v453_v33 }
 0xa9b   :  { %v3993_v34 = vpop.eup %3992 }
 0xa9c   :  { %456 = vrot.lane.b32.xlu0 %v3993_v34, %s4327_s18 }
 0xb0e   :  { %v457_v37 = vpop.permute.xlu0 %456 }
 0xb0f   :  { %v4512_v38 = vmul.f32 %v457_v37, %v440_v29 }
 0xb11   :  { %v460_v39 = vpack.c.bf16 %v4512_v38, %v4512_v38 }
 0xb13   :  { %462 = vrot.lane.b32.xlu1 %v460_v39, %s4332_s30 }
 0xb85   :  { %v463_v40 = vpop.permute.xlu1 %462 }
 0xb86   :  { %3814 = vmatmul.msk.bf16.vlgmr.msrb.gmra.mxu3 %vm6048_vm6, %v463_v40 }
 0xc09   :  { %v476_v43 = vpop.f32.mrf.mxu3 }
 0xc0a   :  { %v480_v44 = vadd.f32 %v476_v43, %v154_v42 }
 0xc0c   :  { %3994 = vtanh.f32 %v480_v44  ;;  %v3815_v47 = vmul.f32 -1.442695, %v480_v44 }
 0xc0e   :  { %3996 = vpow2.f32 %v3815_v47 }
 0xc11   :  { %v478_v45 = vpop.f32.mrf.mxu3 }
 0xc12   :  { %v3995_v46 = vpop.eup %3994 }
 0xc13   :  { %503 = vrot.lane.b32.xlu2 %v3995_v46, %s4327_s18 }
 0xc14   :  { %v3997_v48 = vpop.eup %3996 }
 0xc15   :  { %v484_v49 = vadd.f32 1.0, %v3997_v48 }
 0xc17   :  { %3998 = vrcp.f32 %v484_v49  ;;  %v496_v55 = vand.u32 2147483648, %v484_v49  ;;  %vm490_vm11 = vweird.f32 %v484_v49  ;;  %v494_v56 = vand.u32 2147483647, %v484_v49 }
 0xc19   :  { %v497_v58 = vor.u32 1.1754944e-38, %v496_v55  ;;  %vm495_vm13 = vcmp.eq.f32.partialorder %v494_v56, 8.507059e+37 }
 0xc1d   :  { %v3999_v50 = vpop.eup %3998 }
 0xc1e   :  { %v486_v51 = vmul.f32 %v3999_v50, %v484_v49  ;;  %vm491_vm10 = vweird.f32 %v3999_v50 }
 0xc1f   :  { %vm492_vm12 = vmor %vm490_vm11, %vm491_vm10 }
 0xc20   :  { %v487_v52 = vsub.f32 1.0, %v486_v51 }
 0xc22   :  { %v488_v53 = vmul.f32 %v3999_v50, %v487_v52 }
 0xc24   :  { %v489_v54 = vadd.f32 %v3999_v50, %v488_v53 }
 0xc26   :  { %v493_v57 = vsel %vm492_vm12, %v3999_v50, %v489_v54 }
 0xc27   :  { %v498_v60 = vsel %vm495_vm13, %v497_v58, %v493_v57 }
 0xc28   :  { %v501_v2 = vmul.f32 %v498_v60, %v453_v33 }
 0xc6d   :  { %v504_v59 = vpop.permute.xlu2 %503 }
 0xc6e   :  { %v506_v61 = vmul.f32 %v504_v59, %v498_v60 }
 0xc70   :  { %508 = vrot.lane.b32.xlu0 %v506_v61, %s4332_s30 }
 0xc78   :  { %654 = vrot.lane.b32.xlu0 %v634_v62, %s4332_s30 }
 0xce2   :  { %v509_v3 = vpop.permute.xlu0 %508 }
 0xce3   :  { %v4524_v4 = vadd.f32 %v509_v3, %v501_v2 }
 0xce5   :  { %4000 = vtanh.f32 %v4524_v4 }
 0xcea   :  { %v655_v7 = vpop.permute.xlu0 %654 }
 0xceb   :  { %v4001_v8 = vpop.eup %4000  ;;  %3828 = vmatmul.msk.bf16.vlgmr.msra.gmra.mxu3 %vm6048_vm6, %v655_v7 }
 0xcec   :  { %514 = vrot.lane.b32.xlu1 %v4001_v8, %s4327_s18 }
 0xd5e   :  { %v515_v11 = vpop.permute.xlu1 %514 }
 0xd5f   :  { %v4536_v12 = vmul.f32 %v515_v11, %v498_v60 }
 0xd61   :  { %v518_v13 = vpack.c.bf16 %v4536_v12, %v4536_v12 }
 0xd63   :  { %520 = vrot.lane.b32.xlu2 %v518_v13, %s4332_s30 }
 0xdbd   :  { %v521_v16 = vpop.permute.xlu2 %520 }
 0xdbe   :  { %3816 = vmatmul.msk.bf16.vlgmr.msra.gmra.mxu1 %vm6048_vm6, %v521_v16 }
 0xdbf   :  { %907 = vmatpush.bf16.msra.mxu1 %v4541_v14 }
 0xdc3   :  { %908 = vmatpush.bf16.msra.mxu1 %v4544_v15 }
 0xdce   :  { %735 = vmatmul.bf16.vlgmr.msrb.gmra.mxu1 %v4331_v1  ;;  %v695_v1 = vpop.f32.mrf.mxu3 }
 0xdcf   :  { %1081 = vmatpush.bf16.msrb.mxu1 %v4541_v14  ;;  %v696_v24 = vadd.f32 %v4564_v23, %v695_v1 }
 0xdd3   :  { %1082 = vmatpush.bf16.msrb.mxu1 %v4544_v15 }
 0xe3b   :  { %v534_v19 = vpop.f32.mrf.mxu1 }
 0xe3c   :  { %v538_v20 = vadd.f32 %v534_v19, %v157_v18 }
 0xe3e   :  { %4002 = vtanh.f32 %v538_v20  ;;  %v3817_v29 = vmul.f32 -1.442695, %v538_v20  ;;  %v697_v20 = vpop.f32.mrf.mxu3 }
 0xe43   :  { %v536_v21 = vpop.f32.mrf.mxu1 }
 0xe44   :  { %v4003_v22 = vpop.eup %4002  ;;  %v698_v21 = vadd.f32 %v4564_v23, %v697_v20 }
 0xe45   :  { %561 = vrot.lane.b32.xlu1 %v4003_v22, %s4327_s18 }
 0xe4b   :  { %v736_v25 = vpop.f32.mrf.mxu1 }
 0xe4c   :  { %v740_v26 = vadd.f32 %v736_v25, %v696_v24 }
 0xe4e   :  { %4004 = vtanh.f32 %v740_v26  ;;  %v3840_v28 = vmul.f32 -1.442695, %v740_v26  ;;  %v635_v26 = vpack.c.bf16 %v4502_v6, %v4485_v35 }
 0xe50   :  { %4006 = vpow2.f32 %v3840_v28 }
 0xe51   :  { %4008 = vpow2.f32 %v3817_v29 }
 0xe53   :  { %v738_v27 = vpop.f32.mrf.mxu1 }
 0xe54   :  { %v4005_v9 = vpop.eup %4004 }
 0xe55   :  { %763 = vrot.lane.b32.xlu2 %v4005_v9, %s4327_s18 }
 0xe56   :  { %v4007_v30 = vpop.eup %4006 }
 0xe57   :  { %v744_v31 = vadd.f32 1.0, %v4007_v30  ;;  %v4009_v32 = vpop.eup %4008 }
 0xe58   :  { %v542_v33 = vadd.f32 1.0, %v4009_v32 }
 0xe59   :  { %4010 = vrcp.f32 %v744_v31  ;;  %v756_v45 = vand.u32 2147483648, %v744_v31  ;;  %vm750_vm15 = vweird.f32 %v744_v31  ;;  %v754_v46 = vand.u32 2147483647, %v744_v31 }
 0xe5a   :  { %4012 = vrcp.f32 %v542_v33  ;;  %v554_v54 = vand.u32 2147483648, %v542_v33  ;;  %vm548_vm5 = vweird.f32 %v542_v33  ;;  %v552_v55 = vand.u32 2147483647, %v542_v33 }
 0xe5b   :  { %v757_v49 = vor.u32 1.1754944e-38, %v756_v45  ;;  %vm755_vm3 = vcmp.eq.f32.partialorder %v754_v46, 8.507059e+37 }
 0xe5c   :  { %v555_v57 = vor.u32 1.1754944e-38, %v554_v54  ;;  %vm553_vm8 = vcmp.eq.f32.partialorder %v552_v55, 8.507059e+37 }
 0xe5f   :  { %v4011_v34 = vpop.eup %4010 }
 0xe60   :  { %v746_v37 = vmul.f32 %v4011_v34, %v744_v31  ;;  %v4013_v40 = vpop.eup %4012  ;;  %vm751_vm14 = vweird.f32 %v4011_v34 }
 0xe61   :  { %v544_v42 = vmul.f32 %v4013_v40, %v542_v33  ;;  %vm752_vm2 = vmor %vm750_vm15, %vm751_vm14  ;;  %vm549_vm4 = vweird.f32 %v4013_v40 }
 0xe62   :  { %v747_v39 = vsub.f32 1.0, %v746_v37  ;;  %vm550_vm7 = vmor %vm548_vm5, %vm549_vm4 }
 0xe63   :  { %v545_v44 = vsub.f32 1.0, %v544_v42 }
 0xe64   :  { %v748_v41 = vmul.f32 %v4011_v34, %v747_v39 }
 0xe65   :  { %v546_v48 = vmul.f32 %v4013_v40, %v545_v44 }
 0xe66   :  { %v749_v43 = vadd.f32 %v4011_v34, %v748_v41 }
 0xe67   :  { %v547_v53 = vadd.f32 %v4013_v40, %v546_v48 }
 0xe68   :  { %v753_v47 = vsel %vm752_vm2, %v4011_v34, %v749_v43 }
 0xe69   :  { %v758_v51 = vsel %vm755_vm3, %v757_v49, %v753_v47  ;;  %v551_v56 = vsel %vm550_vm7, %v4013_v40, %v547_v53  ;;  %v4608_v49 = vpop.f32.mrf.mxu0  ;;  %vm1367_vm3 = vcmask 1040384  }
 0xe6a   :  { %v556_v59 = vsel %vm553_vm8, %v555_v57, %v551_v56  ;;  %v761_v61 = vmul.f32 0.0, %v758_v51  ;;  %vm1384_vm8 = vcmask 1042432  }
 0xe6b   :  { %v559_v0 = vmul.f32 %v556_v59, %v4524_v4 }
 0xeaf   :  { %v764_v50 = vpop.permute.xlu2 %763 }
 0xeb0   :  { %v766_v52 = vmul.f32 %v764_v50, %v758_v51 }
 0xeb2   :  { %768 = vrot.lane.b32.xlu1 %v766_v52, %s4332_s30 }
 0xeb7   :  { %v562_v58 = vpop.permute.xlu1 %561 }
 0xeb8   :  { %v564_v60 = vmul.f32 %v562_v58, %v556_v59 }
 0xeba   :  { %566 = vrot.lane.b32.xlu0 %v564_v60, %s4332_s30 }
 0xf24   :  { %v769_v62 = vpop.permute.xlu1 %768 }
 0xf25   :  { %v771_v63 = vadd.f32 %v769_v62, %v761_v61 }
 0xf27   :  { %4014 = vtanh.f32 %v771_v63 }
 0xf2c   :  { %v567_v2 = vpop.permute.xlu0 %566 }
 0xf2d   :  { %v4015_v3 = vpop.eup %4014  ;;  %v4571_v7 = vadd.f32 %v567_v2, %v559_v0 }
 0xf2e   :  { %774 = vrot.lane.b32.xlu0 %v4015_v3, %s4327_s18 }
 0xf2f   :  { %4016 = vtanh.f32 %v4571_v7 }
 0xf35   :  { %v4017_v8 = vpop.eup %4016 }
 0xf36   :  { %572 = vrot.lane.b32.xlu2 %v4017_v8, %s4327_s18 }
 0xf90   :  { %v573_v36 = vpop.permute.xlu2 %572 }
 0xf91   :  { %v4576_v5 = vmul.f32 %v573_v36, %v556_v59 }
 0xf93   :  { %v576_v10 = vpack.c.bf16 %v4576_v5, %v4576_v5 }
 0xf95   :  { %578 = vrot.lane.b32.xlu1 %v576_v10, %s4332_s30 }
 0xfa0   :  { %v775_v4 = vpop.permute.xlu0 %774 }
 0xfa1   :  { %v4581_v11 = vmul.f32 %v775_v4, %v758_v51 }
 0xfa3   :  { %v778_v13 = vpack.c.bf16 %v4581_v11, %v4581_v11 }
 0xfa5   :  { %780 = vrot.lane.b32.xlu2 %v778_v13, %s4332_s30 }
 0xfff   :  { %v781_v17 = vpop.permute.xlu2 %780 }
0x1007   :  { %v579_v16 = vpop.permute.xlu1 %578 }
0x1008   :  { %3818 = vmatmul.msk.bf16.vlgmr.msra.gmra.mxu2 %vm6048_vm6, %v579_v16 }
0x1009   :  { %965 = vmatpush.bf16.msra.mxu2 %v4541_v14 }
0x100d   :  { %966 = vmatpush.bf16.msra.mxu2 %v4544_v15 }
0x1018   :  { %3841 = vmatmul.msk.bf16.vlgmr.msrb.gmra.mxu2 %vm6048_vm6, %v781_v17 }
0x1019   :  { %1139 = vmatpush.bf16.msrb.mxu2 %v4541_v14 }
0x101d   :  { %1140 = vmatpush.bf16.msrb.mxu2 %v4544_v15 }
0x108b   :  { %v4592_v18 = vpop.f32.mrf.mxu2 }
0x1093   :  { %v594_v19 = vpop.f32.mrf.mxu2 }
0x109b   :  { %v794_v22 = vpop.f32.mrf.mxu2 }
0x109c   :  { %v798_v1 = vadd.f32 %v794_v22, %v698_v21 }
0x109e   :  { %4018 = vtanh.f32 %v798_v1  ;;  %v3842_v14 = vmul.f32 -1.442695, %v798_v1 }
0x10a0   :  { %4020 = vpow2.f32 %v3842_v14 }
0x10a3   :  { %v796_v24 = vpop.f32.mrf.mxu2 }
0x10a4   :  { %v4019_v25 = vpop.eup %4018 }
0x10a5   :  { %821 = vrot.lane.b32.xlu0 %v4019_v25, %s4327_s18 }
0x10a6   :  { %v4021_v15 = vpop.eup %4020 }
0x10a7   :  { %v802_v27 = vadd.f32 1.0, %v4021_v15 }
0x10a9   :  { %4022 = vrcp.f32 %v802_v27  ;;  %v814_v32 = vand.u32 2147483648, %v802_v27  ;;  %vm808_vm10 = vweird.f32 %v802_v27  ;;  %v812_v33 = vand.u32 2147483647, %v802_v27 }
0x10ab   :  { %v815_v37 = vor.u32 1.1754944e-38, %v814_v32  ;;  %vm813_vm12 = vcmp.eq.f32.partialorder %v812_v33, 8.507059e+37  ;;  %v1185_v32 = vrot.slane %v4581_v11, 1  ;;  %v1187_v33 = vrot.slane %v4581_v11, 3 }
0x10ad   :  { %656 = vrot.lane.b32.xlu0 %v635_v26, %s4332_s30 }
0x10af   :  { %v4023_v9 = vpop.eup %4022 }
0x10b0   :  { %v804_v28 = vmul.f32 %v4023_v9, %v802_v27  ;;  %vm809_vm9 = vweird.f32 %v4023_v9 }
0x10b1   :  { %vm810_vm11 = vmor %vm808_vm10, %vm809_vm9 }
0x10b2   :  { %v805_v29 = vsub.f32 1.0, %v804_v28 }
0x10b4   :  { %v806_v30 = vmul.f32 %v4023_v9, %v805_v29 }
0x10b6   :  { %v807_v31 = vadd.f32 %v4023_v9, %v806_v30 }
0x10b8   :  { %v811_v34 = vsel %vm810_vm11, %v4023_v9, %v807_v31  ;;  %v1186_v31 = vrot.slane %v4581_v11, 2 }
0x10b9   :  { %v816_v6 = vsel %vm813_vm12, %v815_v37, %v811_v34  ;;  %v1189_v34 = vrot.slane %v4581_v11, 5 }
0x10ba   :  { %v819_v41 = vmul.f32 %v816_v6, %v771_v63 }
0x1117   :  { %v822_v35 = vpop.permute.xlu0 %821 }
0x1118   :  { %v824_v39 = vmul.f32 %v822_v35, %v816_v6 }
0x111a   :  { %826 = vrot.lane.b32.xlu1 %v824_v39, %s4332_s30  ;;  %v1190_v39 = vrot.slane %v4581_v11, 6 }
0x111f   :  { %v657_v40 = vpop.permute.xlu0 %656 }
0x1120   :  { %3829 = vmatmul.msk.bf16.gmra.mxu3 %vm6048_vm6, %v657_v40  ;;  %v1191_v40 = vrot.slane %v4581_v11, 7 }
0x118c   :  { %v827_v42 = vpop.permute.xlu1 %826 }
0x118d   :  { %v829_v43 = vadd.f32 %v827_v42, %v819_v41 }
0x118f   :  { %4024 = vtanh.f32 %v829_v43 }
0x1195   :  { %v4025_v44 = vpop.eup %4024 }
0x1196   :  { %832 = vrot.lane.b32.xlu2 %v4025_v44, %s4327_s18 }
0x11a3   :  { %v700_v50 = vpop.f32.mrf.mxu3 }
0x11a4   :  { %v701_v51 = vadd.f32 %v4564_v23, %v700_v50 }
0x11f0   :  { %v833_v45 = vpop.permute.xlu2 %832 }
0x11f1   :  { %v4602_v46 = vmul.f32 %v833_v45, %v816_v6  ;;  %v1188_v6 = vrot.slane %v4581_v11, 4 }
0x11f3   :  { %v836_v47 = vpack.c.bf16 %v4602_v46, %v4602_v46  ;;  %v1201_v20 = vrot.slane %v4602_v46, 2  ;;  %v1200_v21 = vrot.slane %v4602_v46, 1  ;;  %v1202_v22 = vrot.slane %v4602_v46, 3 }
0x11f4   :  { %v1204_v1 = vrot.slane %v4602_v46, 5  ;;  %v1203_v24 = vrot.slane %v4602_v46, 4  ;;  %v1205_v25 = vrot.slane %v4602_v46, 6  ;;  %v1255_v26 = vperm.slane %v4602_v46, 0 }
0x11f5   :  { %838 = vrot.lane.b32.xlu1 %v836_v47, %s4332_s30  ;;  %v1257_v14 = vperm.slane %v1201_v20, 0  ;;  %v1256_v15 = vperm.slane %v1200_v21, 0  ;;  %v1206_v27 = vrot.slane %v4602_v46, 7  ;;  %v1258_v9 = vperm.slane %v1202_v22, 0  ;;  %v702_v21 = vpop.f32.mrf.mxu3 }
0x11f6   :  { %v1260_v28 = vperm.slane %v1204_v1, 0  ;;  %v1259_v29 = vperm.slane %v1203_v24, 0  ;;  %v1261_v30 = vperm.slane %v1205_v25, 0  ;;  %v1368_v35 = vsel %vm1367_vm3, %v4581_v11, %v1255_v26 }
0x11f7   :  { %v1370_v42 = vsel %vm1367_vm3, %v1186_v31, %v1257_v14  ;;  %v1262_v44 = vperm.slane %v1206_v27, 0  ;;  %v1371_v45 = vsel %vm1367_vm3, %v1187_v33, %v1258_v9  ;;  %v703_v22 = vadd.f32 %v4564_v23, %v702_v21 }
0x11f8   :  { %v1373_v46 = vsel %vm1367_vm3, %v1189_v34, %v1260_v28  ;;  %v1372_v47 = vsel %vm1367_vm3, %v1188_v6, %v1259_v29  ;;  %v636_v14 = vpack.c.bf16 %v4536_v12, %v4512_v38 }
0x1267   :  { %v839_v48 = vpop.permute.xlu1 %838 }
0x1268   :  { %3843 = vmatmul.msk.bf16.vlgmr.msrb.gmra.mxu0 %vm6048_vm6, %v839_v48  ;;  %v1374_v48 = vsel %vm1367_vm3, %v1190_v39, %v1261_v30 }
0x12e5   :  { %v852_v52 = vpop.f32.mrf.mxu0 }
0x12e6   :  { %v856_v53 = vadd.f32 %v852_v52, %v701_v51 }
0x12e8   :  { %4026 = vtanh.f32 %v856_v53  ;;  %v3844_v56 = vmul.f32 -1.442695, %v856_v53 }
0x12ea   :  { %4028 = vpow2.f32 %v3844_v56 }
0x12ed   :  { %v854_v54 = vpop.f32.mrf.mxu0 }
0x12ee   :  { %v4027_v55 = vpop.eup %4026 }
0x12ef   :  { %879 = vrot.lane.b32.xlu2 %v4027_v55, %s4327_s18 }
0x12f0   :  { %v4029_v57 = vpop.eup %4028 }
0x12f1   :  { %v860_v58 = vadd.f32 1.0, %v4029_v57 }
0x12f3   :  { %4030 = vrcp.f32 %v860_v58  ;;  %v872_v0 = vand.u32 2147483648, %v860_v58  ;;  %vm866_vm14 = vweird.f32 %v860_v58  ;;  %v870_v2 = vand.u32 2147483647, %v860_v58 }
0x12f5   :  { %v873_v8 = vor.u32 1.1754944e-38, %v872_v0  ;;  %vm871_vm2 = vcmp.eq.f32.partialorder %v870_v2, 8.507059e+37 }
0x12f9   :  { %v4031_v59 = vpop.eup %4030 }
0x12fa   :  { %v862_v60 = vmul.f32 %v4031_v59, %v860_v58  ;;  %vm867_vm13 = vweird.f32 %v4031_v59 }
0x12fb   :  { %vm868_vm15 = vmor %vm866_vm14, %vm867_vm13 }
0x12fc   :  { %v863_v61 = vsub.f32 1.0, %v862_v60 }
0x12fe   :  { %v864_v62 = vmul.f32 %v4031_v59, %v863_v61 }
0x1300   :  { %v865_v63 = vadd.f32 %v4031_v59, %v864_v62 }
0x1302   :  { %v869_v3 = vsel %vm868_vm15, %v4031_v59, %v865_v63  ;;  %vm1393_vm15 = vcmask 1043456  }
0x1303   :  { %v874_v10 = vsel %vm871_vm2, %v873_v8, %v869_v3 }
0x1304   :  { %v877_v13 = vmul.f32 %v874_v10, %v829_v43  ;;  %v1369_v43 = vsel %vm1367_vm3, %v1185_v32, %v1256_v15 }
0x1349   :  { %v880_v36 = vpop.permute.xlu2 %879 }
0x134a   :  { %v882_v4 = vmul.f32 %v880_v36, %v874_v10  ;;  %v1375_v36 = vsel %vm1367_vm3, %v1191_v40, %v1262_v44 }
0x134c   :  { %884 = vrot.lane.b32.xlu0 %v882_v4, %s4332_s30 }
0x13be   :  { %v885_v16 = vpop.permute.xlu0 %884 }
0x13bf   :  { %v4613_v17 = vadd.f32 %v885_v16, %v877_v13 }
0x13c1   :  { %4032 = vtanh.f32 %v4613_v17 }
0x13c7   :  { %v4033_v19 = vpop.eup %4032 }
0x13c8   :  { %890 = vrot.lane.b32.xlu1 %v4033_v19, %s4327_s18 }
0x143a   :  { %v891_v37 = vpop.permute.xlu1 %890 }
0x143b   :  { %v893_v41 = vmul.f32 %v891_v37, %v874_v10 }
0x143d   :  { %v894_v50 = vpack.c.bf16 %v893_v41, %v893_v41  ;;  %v1271_v51 = vperm.slane %v893_v41, 0  ;;  %v1209_v52 = vrot.slane %v893_v41, 2  ;;  %v1208_v53 = vrot.slane %v893_v41, 1 }
0x143e   :  { %v1210_v54 = vrot.slane %v893_v41, 3  ;;  %v1212_v11 = vrot.slane %v893_v41, 5  ;;  %v1211_v55 = vrot.slane %v893_v41, 4  ;;  %v1213_v56 = vrot.slane %v893_v41, 6 }
0x143f   :  { %896 = vrot.lane.b32.xlu2 %v894_v50, %s4332_s30  ;;  %v4642_v57 = vsel %vm128_vm0, %v1368_v35, %v1271_v51  ;;  %v1273_v58 = vperm.slane %v1209_v52, 0  ;;  %v1272_v59 = vperm.slane %v1208_v53, 0  ;;  %v1214_v60 = vrot.slane %v893_v41, 7 }
0x1440   :  { %v1274_v61 = vperm.slane %v1210_v54, 0  ;;  %v1276_v62 = vperm.slane %v1212_v11, 0  ;;  %v1275_v63 = vperm.slane %v1211_v55, 0  ;;  %v1277_v0 = vperm.slane %v1213_v56, 0 }
0x1441   :  { %v4645_v2 = vsel %vm128_vm0, %v1370_v42, %v1273_v58  ;;  %v4648_v3 = vsel %vm128_vm0, %v1369_v43, %v1272_v59  ;;  %v1278_v8 = vperm.slane %v1214_v60, 0 }
0x1442   :  { %v4652_v10 = vsel %vm128_vm0, %v1371_v45, %v1274_v61  ;;  %v4655_v4 = vsel %vm128_vm0, %v1373_v46, %v1276_v62  ;;  %v4658_v13 = vsel %vm128_vm0, %v1372_v47, %v1275_v63  ;;  %v4661_v16 = vsel %vm128_vm0, %v1374_v48, %v1277_v0 }
0x1443   :  { %v4664_v19 = vsel %vm128_vm0, %v1375_v36, %v1278_v8 }
0x1499   :  { %v897_v20 = vpop.permute.xlu2 %896 }
0x149a   :  { %3845 = vmatmul.msk.bf16.vlgmr.msra.gmra.mxu1 %vm6048_vm6, %v897_v20 }
0x1517   :  { %v910_v1 = vpop.f32.mrf.mxu1 }
0x1518   :  { %v914_v24 = vadd.f32 %v910_v1, %v703_v22 }
0x151a   :  { %4034 = vtanh.f32 %v914_v24  ;;  %v3846_v15 = vmul.f32 -1.442695, %v914_v24 }
0x151c   :  { %4036 = vpow2.f32 %v3846_v15 }
0x151f   :  { %v912_v25 = vpop.f32.mrf.mxu1 }
0x1520   :  { %v4035_v26 = vpop.eup %4034 }
0x1521   :  { %937 = vrot.lane.b32.xlu0 %v4035_v26, %s4327_s18 }
0x1522   :  { %v4037_v27 = vpop.eup %4036 }
0x1523   :  { %v918_v9 = vadd.f32 1.0, %v4037_v27 }
0x1525   :  { %4038 = vrcp.f32 %v918_v9  ;;  %v930_v33 = vand.u32 2147483648, %v918_v9  ;;  %vm924_vm4 = vweird.f32 %v918_v9  ;;  %v928_v34 = vand.u32 2147483647, %v918_v9 }
0x1527   :  { %v931_v35 = vor.u32 1.1754944e-38, %v930_v33  ;;  %vm929_vm7 = vcmp.eq.f32.partialorder %v928_v34, 8.507059e+37 }
0x1529   :  { %658 = vrot.lane.b32.xlu0 %v636_v14, %s4332_s30 }
0x152b   :  { %v4039_v28 = vpop.eup %4038 }
0x152c   :  { %v920_v29 = vmul.f32 %v4039_v28, %v918_v9  ;;  %vm925_vm0 = vweird.f32 %v4039_v28 }
0x152d   :  { %vm926_vm5 = vmor %vm924_vm4, %vm925_vm0 }
0x152e   :  { %v921_v30 = vsub.f32 1.0, %v920_v29 }
0x1530   :  { %v922_v31 = vmul.f32 %v4039_v28, %v921_v30  ;;  %v4242_v30 = vld [vmem:[%s6034_s3] ss:$0 sm:$0xff] }
0x1532   :  { %v923_v32 = vadd.f32 %v4039_v28, %v922_v31  ;;  %v159_v31 = vadd.f32 %v4242_v30, %v4608_v49 }
0x1534   :  { %v927_v37 = vsel %vm926_vm5, %v4039_v28, %v923_v32  ;;  %v596_v33 = vadd.f32 %v4592_v18, %v159_v31 }
0x1535   :  { %v932_v12 = vsel %vm929_vm7, %v931_v35, %v927_v37 }
0x1536   :  { %v935_v40 = vmul.f32 %v932_v12, %v4613_v17  ;;  %v3819_v18 = vmul.f32 -1.442695, %v596_v33 }
0x1593   :  { %v938_v38 = vpop.permute.xlu0 %937 }
0x1594   :  { %v940_v6 = vmul.f32 %v938_v38, %v932_v12 }
0x1596   :  { %942 = vrot.lane.b32.xlu1 %v940_v6, %s4332_s30 }
0x159b   :  { %v659_v39 = vpop.permute.xlu0 %658 }
0x159c   :  { %3830 = vmatmul.msk.bf16.gmra.mxu3 %vm6048_vm6, %v659_v39 }
0x1608   :  { %v943_v41 = vpop.permute.xlu1 %942 }
0x1609   :  { %v4675_v42 = vadd.f32 %v943_v41, %v935_v40 }
0x160b   :  { %4040 = vtanh.f32 %v4675_v42 }
0x1611   :  { %v4041_v43 = vpop.eup %4040 }
0x1612   :  { %948 = vrot.lane.b32.xlu2 %v4041_v43, %s4327_s18 }
0x166c   :  { %v949_v44 = vpop.permute.xlu2 %948 }
0x166d   :  { %v951_v45 = vmul.f32 %v949_v44, %v932_v12 }
0x166f   :  { %v952_v46 = vpack.c.bf16 %v951_v45, %v951_v45  ;;  %v1287_v47 = vperm.slane %v951_v45, 0  ;;  %v1217_v48 = vrot.slane %v951_v45, 2  ;;  %v1216_v50 = vrot.slane %v951_v45, 1 }
0x1670   :  { %v1218_v51 = vrot.slane %v951_v45, 3  ;;  %v1220_v52 = vrot.slane %v951_v45, 5  ;;  %v1219_v53 = vrot.slane %v951_v45, 4  ;;  %v1221_v54 = vrot.slane %v951_v45, 6 }
0x1671   :  { %954 = vrot.lane.b32.xlu1 %v952_v46, %s4332_s30  ;;  %v4682_v17 = vsel %vm1384_vm8, %v4642_v57, %v1287_v47  ;;  %v1289_v11 = vperm.slane %v1217_v48, 0  ;;  %v1288_v55 = vperm.slane %v1216_v50, 0  ;;  %v1222_v56 = vrot.slane %v951_v45, 7 }
0x1672   :  { %v1290_v58 = vperm.slane %v1218_v51, 0  ;;  %v1292_v59 = vperm.slane %v1220_v52, 0  ;;  %v1291_v60 = vperm.slane %v1219_v53, 0  ;;  %v1293_v61 = vperm.slane %v1221_v54, 0 }
0x1673   :  { %v4686_v62 = vsel %vm1384_vm8, %v4645_v2, %v1289_v11  ;;  %v4690_v63 = vsel %vm1384_vm8, %v4648_v3, %v1288_v55  ;;  %v1294_v0 = vperm.slane %v1222_v56, 0 }
0x1674   :  { %v4694_v57 = vsel %vm1384_vm8, %v4652_v10, %v1290_v58  ;;  %v4698_v8 = vsel %vm1384_vm8, %v4655_v4, %v1292_v59  ;;  %v4702_v36 = vsel %vm1384_vm8, %v4658_v13, %v1291_v60  ;;  %v4706_v2 = vsel %vm1384_vm8, %v4661_v16, %v1293_v61  ;;  %v705_v10 = vpop.f32.mrf.mxu3 }
0x1675   :  { %v4710_v3 = vsel %vm1384_vm8, %v4664_v19, %v1294_v0  ;;  %v706_v21 = vadd.f32 %v4564_v23, %v705_v10  ;;  %vm1402_vm8 = vcmask 1044480  }
0x16e3   :  { %v955_v20 = vpop.permute.xlu1 %954 }
0x16e4   :  { %3847 = vmatmul.msk.bf16.vlgmr.msra.gmra.mxu2 %vm6048_vm6, %v955_v20 }
0x1767   :  { %v968_v4 = vpop.f32.mrf.mxu2 }
0x1768   :  { %v972_v22 = vadd.f32 %v968_v4, %v706_v21 }
0x176a   :  { %4042 = vtanh.f32 %v972_v22  ;;  %v3848_v24 = vmul.f32 -1.442695, %v972_v22 }
0x176c   :  { %4044 = vpow2.f32 %v3848_v24 }
0x176f   :  { %v970_v1 = vpop.f32.mrf.mxu2 }
0x1770   :  { %v4043_v13 = vpop.eup %4042 }
0x1771   :  { %995 = vrot.lane.b32.xlu2 %v4043_v13, %s4327_s18 }
0x1772   :  { %v4045_v16 = vpop.eup %4044 }
0x1773   :  { %v976_v25 = vadd.f32 1.0, %v4045_v16 }
0x1775   :  { %4046 = vrcp.f32 %v976_v25  ;;  %v988_v9 = vand.u32 2147483648, %v976_v25  ;;  %vm982_vm10 = vweird.f32 %v976_v25  ;;  %v986_v28 = vand.u32 2147483647, %v976_v25 }
0x1776   :  { %4048 = vtanh.f32 %v596_v33 }
0x1777   :  { %v989_v32 = vor.u32 1.1754944e-38, %v988_v9  ;;  %vm987_vm12 = vcmp.eq.f32.partialorder %v986_v28, 8.507059e+37 }
0x177b   :  { %v4047_v19 = vpop.eup %4046 }
0x177c   :  { %v978_v26 = vmul.f32 %v4047_v19, %v976_v25  ;;  %vm983_vm9 = vweird.f32 %v4047_v19  ;;  %v4049_v38 = vpop.eup %4048 }
0x177d   :  { %vm984_vm11 = vmor %vm982_vm10, %vm983_vm9 }
0x177e   :  { %v979_v14 = vsub.f32 1.0, %v978_v26 }
0x1780   :  { %v980_v15 = vmul.f32 %v4047_v19, %v979_v14 }
0x1782   :  { %v981_v27 = vadd.f32 %v4047_v19, %v980_v15 }
0x1784   :  { %v985_v29 = vsel %vm984_vm11, %v4047_v19, %v981_v27 }
0x1785   :  { %v990_v37 = vsel %vm987_vm12, %v989_v32, %v985_v29 }
0x1786   :  { %v993_v12 = vmul.f32 %v990_v37, %v4675_v42 }
0x17cb   :  { %v996_v34 = vpop.permute.xlu2 %995 }
0x17cc   :  { %v998_v35 = vmul.f32 %v996_v34, %v990_v37 }
0x17ce   :  { %1000 = vrot.lane.b32.xlu0 %v998_v35, %s4332_s30 }
0x17d6   :  { %619 = vrot.lane.b32.xlu0 %v4049_v38, %s4327_s18 }
0x1840   :  { %v1001_v6 = vpop.permute.xlu0 %1000 }
0x1841   :  { %v4723_v39 = vadd.f32 %v1001_v6, %v993_v12 }
0x1843   :  { %4050 = vtanh.f32 %v4723_v39 }
0x1844   :  { %4052 = vpow2.f32 %v3819_v18 }
0x1848   :  { %v620_v19 = vpop.permute.xlu0 %619 }
0x1849   :  { %v4051_v49 = vpop.eup %4050 }
0x184a   :  { %1006 = vrot.lane.b32.xlu1 %v4051_v49, %s4327_s18  ;;  %v4053_v40 = vpop.eup %4052 }
0x184b   :  { %v600_v41 = vadd.f32 1.0, %v4053_v40 }
0x184d   :  { %4054 = vrcp.f32 %v600_v41  ;;  %v612_v47 = vand.u32 2147483648, %v600_v41  ;;  %vm606_vm13 = vweird.f32 %v600_v41  ;;  %v610_v42 = vand.u32 2147483647, %v600_v41 }
0x184f   :  { %v613_v52 = vor.u32 1.1754944e-38, %v612_v47  ;;  %vm611_vm3 = vcmp.eq.f32.partialorder %v610_v42, 8.507059e+37 }
0x1853   :  { %v4055_v43 = vpop.eup %4054 }
0x1854   :  { %v602_v44 = vmul.f32 %v4055_v43, %v600_v41  ;;  %vm607_vm14 = vweird.f32 %v4055_v43 }
0x1855   :  { %vm4734_vm2 = vmor %vm606_vm13, %vm607_vm14  ;;  %vm1411_vm13 = vcmask 1045504  }
0x1856   :  { %v603_v45 = vsub.f32 1.0, %v602_v44 }
0x1858   :  { %v604_v46 = vmul.f32 %v4055_v43, %v603_v45 }
0x185a   :  { %v605_v51 = vadd.f32 %v4055_v43, %v604_v46 }
0x185c   :  { %v609_v24 = vsel %vm4734_vm2, %v4055_v43, %v605_v51 }
0x185d   :  { %v614_v27 = vsel %vm611_vm3, %v613_v52, %v609_v24 }
0x185e   :  { %v617_v30 = vmul.f32 %v614_v27, %v4571_v7 }
0x18bc   :  { %v1007_v48 = vpop.permute.xlu1 %1006 }
0x18bd   :  { %v1009_v50 = vmul.f32 %v1007_v48, %v990_v37 }
0x18bf   :  { %v1010_v53 = vpack.c.bf16 %v1009_v50, %v1009_v50  ;;  %v1303_v54 = vperm.slane %v1009_v50, 0  ;;  %v1225_v11 = vrot.slane %v1009_v50, 2  ;;  %v1224_v55 = vrot.slane %v1009_v50, 1 }
0x18c0   :  { %v1226_v56 = vrot.slane %v1009_v50, 3  ;;  %v1228_v58 = vrot.slane %v1009_v50, 5  ;;  %v1227_v59 = vrot.slane %v1009_v50, 4  ;;  %v1229_v60 = vrot.slane %v1009_v50, 6 }
0x18c1   :  { %1012 = vrot.lane.b32.xlu2 %v1010_v53, %s4332_s30  ;;  %v4730_v61 = vsel %vm1393_vm15, %v4682_v17, %v1303_v54  ;;  %v1305_v0 = vperm.slane %v1225_v11, 0  ;;  %v1304_v20 = vperm.slane %v1224_v55, 0  ;;  %v1230_v10 = vrot.slane %v1009_v50, 7 }
0x18c2   :  { %v1306_v4 = vperm.slane %v1226_v56, 0  ;;  %v1308_v22 = vperm.slane %v1228_v58, 0  ;;  %v1307_v1 = vperm.slane %v1227_v59, 0  ;;  %v1309_v13 = vperm.slane %v1229_v60, 0 }
0x18c3   :  { %v4742_v17 = vsel %vm1393_vm15, %v4686_v62, %v1305_v0  ;;  %v4746_v16 = vsel %vm1393_vm15, %v4690_v63, %v1304_v20  ;;  %v1310_v25 = vperm.slane %v1230_v10, 0 }
0x18c4   :  { %v4750_v26 = vsel %vm1393_vm15, %v4694_v57, %v1306_v4  ;;  %v4754_v14 = vsel %vm1393_vm15, %v4698_v8, %v1308_v22  ;;  %v4758_v15 = vsel %vm1393_vm15, %v4702_v36, %v1307_v1  ;;  %v4762_v62 = vsel %vm1393_vm15, %v4706_v2, %v1309_v13  ;;  %v707_v8 = vpop.f32.mrf.mxu3 }
0x18c5   :  { %v4766_v63 = vsel %vm1393_vm15, %v4710_v3, %v1310_v25  ;;  %v622_v57 = vmul.f32 %v620_v19, %v614_v27  ;;  %v708_v36 = vadd.f32 %v4564_v23, %v707_v8 }
0x18c9   :  { %624 = vrot.lane.b32.xlu2 %v622_v57, %s4332_s30 }
0x191b   :  { %v1013_v9 = vpop.permute.xlu2 %1012 }
0x191c   :  { %3849 = vmatmul.msk.bf16.vlgmr.msra.gmra.mxu0 %vm6048_vm6, %v1013_v9 }
0x1923   :  { %v625_v2 = vpop.permute.xlu2 %624 }
0x1924   :  { %v627_v31 = vadd.f32 %v625_v2, %v617_v30 }
0x1999   :  { %v1026_v28 = vpop.f32.mrf.mxu0 }
0x199a   :  { %v1030_v29 = vadd.f32 %v1026_v28, %v708_v36 }
0x199c   :  { %4056 = vtanh.f32 %v1030_v29  ;;  %v3850_v34 = vmul.f32 -1.442695, %v1030_v29 }
0x199d   :  { %4058 = vtanh.f32 %v627_v31 }
0x199e   :  { %4060 = vpow2.f32 %v3850_v34 }
0x19a1   :  { %v1028_v32 = vpop.f32.mrf.mxu0 }
0x19a2   :  { %v4057_v3 = vpop.eup %4056 }
0x19a3   :  { %1053 = vrot.lane.b32.xlu1 %v4057_v3, %s4327_s18  ;;  %v4059_v33 = vpop.eup %4058 }
0x19a4   :  { %v4061_v37 = vpop.eup %4060 }
0x19a5   :  { %v1034_v35 = vadd.f32 1.0, %v4061_v37 }
0x19a7   :  { %4062 = vrcp.f32 %v1034_v35  ;;  %v1046_v7 = vand.u32 2147483648, %v1034_v35  ;;  %vm1040_vm4 = vweird.f32 %v1034_v35  ;;  %v1044_v40 = vand.u32 2147483647, %v1034_v35 }
0x19a9   :  { %v1047_v43 = vor.u32 1.1754944e-38, %v1046_v7  ;;  %vm1045_vm7 = vcmp.eq.f32.partialorder %v1044_v40, 8.507059e+37 }
0x19ab   :  { %630 = vrot.lane.b32.xlu1 %v4059_v33, %s4327_s18 }
0x19ad   :  { %v4063_v38 = vpop.eup %4062 }
0x19ae   :  { %v1036_v12 = vmul.f32 %v4063_v38, %v1034_v35  ;;  %vm1041_vm0 = vweird.f32 %v4063_v38 }
0x19af   :  { %vm1042_vm5 = vmor %vm1040_vm4, %vm1041_vm0  ;;  %vm1420_vm0 = vcmask 1046528   ;;  %vm6047_vm4 = vcmask 523264  }
0x19b0   :  { %v1037_v6 = vsub.f32 1.0, %v1036_v12 }
0x19b2   :  { %v1038_v49 = vmul.f32 %v4063_v38, %v1037_v6 }
0x19b4   :  { %v1039_v18 = vadd.f32 %v4063_v38, %v1038_v49 }
0x19b6   :  { %v1043_v41 = vsel %vm1042_vm5, %v4063_v38, %v1039_v18 }
0x19b7   :  { %v1048_v45 = vsel %vm1045_vm7, %v1047_v43, %v1043_v41 }
0x19b8   :  { %v1051_v50 = vmul.f32 %v1048_v45, %v4723_v39 }
0x1a15   :  { %v1054_v44 = vpop.permute.xlu1 %1053 }
0x1a16   :  { %v1056_v46 = vmul.f32 %v1054_v44, %v1048_v45 }
0x1a18   :  { %1058 = vrot.lane.b32.xlu0 %v1056_v46, %s4332_s30 }
0x1a1d   :  { %v631_v47 = vpop.permute.xlu1 %630 }
0x1a1e   :  { %v633_v48 = vmul.f32 %v631_v47, %v614_v27 }
0x1a20   :  { %v637_v42 = vpack.c.bf16 %v633_v48, %v4576_v5 }
0x1a22   :  { %660 = vrot.lane.b32.xlu0 %v637_v42, %s4332_s30 }
0x1a8a   :  { %v1059_v51 = vpop.permute.xlu0 %1058 }
0x1a8b   :  { %v4778_v52 = vadd.f32 %v1059_v51, %v1051_v50 }
0x1a8d   :  { %4064 = vtanh.f32 %v4778_v52 }
0x1a93   :  { %v4065_v53 = vpop.eup %4064 }
0x1a94   :  { %1064 = vrot.lane.b32.xlu2 %v4065_v53, %s4327_s18  ;;  %v661_v54 = vpop.permute.xlu0 %660 }
0x1a95   :  { %3831 = vmatmul.msk.bf16.gmra.mxu3 %vm6048_vm6, %v661_v54 }
0x1aee   :  { %v1065_v11 = vpop.permute.xlu2 %1064 }
0x1aef   :  { %v1067_v55 = vmul.f32 %v1065_v11, %v1048_v45 }
0x1af1   :  { %v1068_v56 = vpack.c.bf16 %v1067_v55, %v1067_v55  ;;  %v1319_v5 = vperm.slane %v1067_v55, 0  ;;  %v1233_v58 = vrot.slane %v1067_v55, 2  ;;  %v1232_v59 = vrot.slane %v1067_v55, 1 }
0x1af2   :  { %v1234_v60 = vrot.slane %v1067_v55, 3  ;;  %v1236_v39 = vrot.slane %v1067_v55, 5  ;;  %v1235_v0 = vrot.slane %v1067_v55, 4  ;;  %v1237_v20 = vrot.slane %v1067_v55, 6 }
0x1af3   :  { %1070 = vrot.lane.b32.xlu1 %v1068_v56, %s4332_s30  ;;  %v4786_v10 = vsel %vm1402_vm8, %v4730_v61, %v1319_v5  ;;  %v1321_v21 = vperm.slane %v1233_v58, 0  ;;  %v1320_v4 = vperm.slane %v1232_v59, 0  ;;  %v1238_v22 = vrot.slane %v1067_v55, 7 }
0x1af4   :  { %v1322_v1 = vperm.slane %v1234_v60, 0  ;;  %v1324_v13 = vperm.slane %v1236_v39, 0  ;;  %v1323_v24 = vperm.slane %v1235_v0, 0  ;;  %v1325_v25 = vperm.slane %v1237_v20, 0 }
0x1af5   :  { %v4790_v19 = vsel %vm1402_vm8, %v4742_v17, %v1321_v21  ;;  %v4794_v27 = vsel %vm1402_vm8, %v4746_v16, %v1320_v4  ;;  %v1326_v57 = vperm.slane %v1238_v22, 0 }
0x1af6   :  { %v4798_v61 = vsel %vm1402_vm8, %v4750_v26, %v1322_v1  ;;  %v4802_v9 = vsel %vm1402_vm8, %v4754_v14, %v1324_v13  ;;  %v4806_v8 = vsel %vm1402_vm8, %v4758_v15, %v1323_v24  ;;  %v4810_v17 = vsel %vm1402_vm8, %v4762_v62, %v1325_v25  ;;  %v4243_v24 = vld [vmem:[%s6037_s6] ss:$0 sm:$0xff] }
0x1af7   :  { %v4814_v16 = vsel %vm1402_vm8, %v4766_v63, %v1326_v57 }
0x1b18   :  { %v710_v26 = vpop.f32.mrf.mxu3 }
0x1b19   :  { %v711_v28 = vadd.f32 %v4564_v23, %v710_v26 }
0x1b20   :  { %v712_v13 = vpop.f32.mrf.mxu3 }
0x1b21   :  { %v713_v25 = vadd.f32 %v4243_v24, %v712_v13 }
0x1b65   :  { %v1071_v36 = vpop.permute.xlu1 %1070 }
0x1b66   :  { %3851 = vmatmul.msk.bf16.vlgmr.msrb.gmra.mxu1 %vm6048_vm6, %v1071_v36 }
0x1be3   :  { %v1084_v14 = vpop.f32.mrf.mxu1 }
0x1be4   :  { %v1088_v29 = vadd.f32 %v1084_v14, %v711_v28 }
0x1be6   :  { %4066 = vtanh.f32 %v1088_v29  ;;  %v3852_v30 = vmul.f32 -1.442695, %v1088_v29 }
0x1be8   :  { %4068 = vpow2.f32 %v3852_v30 }
0x1beb   :  { %v1086_v2 = vpop.f32.mrf.mxu1 }
0x1bec   :  { %v4067_v15 = vpop.eup %4066 }
0x1bed   :  { %1111 = vrot.lane.b32.xlu2 %v4067_v15, %s4327_s18 }
0x1bee   :  { %v4069_v62 = vpop.eup %4068 }
0x1bef   :  { %v1092_v31 = vadd.f32 1.0, %v4069_v62 }
0x1bf1   :  { %4070 = vrcp.f32 %v1092_v31  ;;  %v1104_v37 = vand.u32 2147483648, %v1092_v31  ;;  %vm1098_vm10 = vweird.f32 %v1092_v31  ;;  %v1102_v23 = vand.u32 2147483647, %v1092_v31 }
0x1bf3   :  { %v1105_v38 = vor.u32 1.1754944e-38, %v1104_v37  ;;  %vm1103_vm12 = vcmp.eq.f32.partialorder %v1102_v23, 8.507059e+37  ;;  %v4872_v37 = vld [vmem:[%s6038_s7 + $0x18] sm:$0xff]  ;;  %v4878_v23 = vld [vmem:[%s6038_s7 + $0x10] sm:$0xff] }
0x1bf4   :  { %1492 = vmatpush.bf16.msrb.mxu0 %v4872_v37  ;;  %2113 = vmatpush.bf16.msrb.mxu3 %v4872_v37 }
0x1bf7   :  { %v4071_v63 = vpop.eup %4070 }
0x1bf8   :  { %v1094_v32 = vmul.f32 %v4071_v63, %v1092_v31  ;;  %vm1099_vm9 = vweird.f32 %v4071_v63  ;;  %1493 = vmatpush.bf16.msrb.mxu0 %v4878_v23  ;;  %2114 = vmatpush.bf16.msrb.mxu3 %v4878_v23 }
0x1bf9   :  { %vm1100_vm11 = vmor %vm1098_vm10, %vm1099_vm9  ;;  %vm1644_vm10 = vcmask 1041409  }
0x1bfa   :  { %v1095_v3 = vsub.f32 1.0, %v1094_v32 }
0x1bfc   :  { %v1096_v33 = vmul.f32 %v4071_v63, %v1095_v3 }
0x1bfe   :  { %v1097_v34 = vadd.f32 %v4071_v63, %v1096_v33 }
0x1c00   :  { %v1101_v35 = vsel %vm1100_vm11, %v4071_v63, %v1097_v34  ;;  %vm1646_vm11 = vcmask 1042434  }
0x1c01   :  { %v1106_v6 = vsel %vm1103_vm12, %v1105_v38, %v1101_v35  ;;  %v4885_v35 = vld [vmem:[%s6038_s7 + $0x8] sm:$0xff]  ;;  %v4892_v38 = vld [vmem:[%s6038_s7] sm:$0xff]  ;;  %vm1648_vm12 = vcmask 1043459  }
0x1c02   :  { %v1109_v18 = vmul.f32 %v1106_v6, %v4778_v52  ;;  %1494 = vmatpush.bf16.msrb.mxu0 %v4885_v35  ;;  %2115 = vmatpush.bf16.msrb.mxu3 %v4885_v35 }
0x1c06   :  { %1495 = vmatpush.bf16.msrb.mxu0 %v4892_v38  ;;  %2116 = vmatpush.bf16.msrb.mxu3 %v4892_v38 }
0x1c47   :  { %v1112_v12 = vpop.permute.xlu2 %1111 }
0x1c48   :  { %v1114_v49 = vmul.f32 %v1112_v12, %v1106_v6 }
0x1c4a   :  { %1116 = vrot.lane.b32.xlu0 %v1114_v49, %s4332_s30 }
0x1cbc   :  { %v1117_v7 = vpop.permute.xlu0 %1116 }
0x1cbd   :  { %v4821_v40 = vadd.f32 %v1117_v7, %v1109_v18 }
0x1cbf   :  { %4072 = vtanh.f32 %v4821_v40 }
0x1cc5   :  { %v4073_v41 = vpop.eup %4072 }
0x1cc6   :  { %1122 = vrot.lane.b32.xlu1 %v4073_v41, %s4327_s18 }
0x1d38   :  { %v1123_v43 = vpop.permute.xlu1 %1122 }
0x1d39   :  { %v1125_v44 = vmul.f32 %v1123_v43, %v1106_v6 }
0x1d3b   :  { %v1126_v45 = vpack.c.bf16 %v1125_v44, %v1125_v44  ;;  %v1335_v46 = vperm.slane %v1125_v44, 0  ;;  %v1241_v47 = vrot.slane %v1125_v44, 2  ;;  %v1240_v48 = vrot.slane %v1125_v44, 1 }
0x1d3c   :  { %v1242_v42 = vrot.slane %v1125_v44, 3  ;;  %v1244_v50 = vrot.slane %v1125_v44, 5  ;;  %v1243_v51 = vrot.slane %v1125_v44, 4  ;;  %v1245_v53 = vrot.slane %v1125_v44, 6 }
0x1d3d   :  { %1128 = vrot.lane.b32.xlu2 %v1126_v45, %s4332_s30  ;;  %v4828_v52 = vsel %vm1411_vm13, %v4786_v10, %v1335_v46  ;;  %v1337_v54 = vperm.slane %v1241_v47, 0  ;;  %v1336_v11 = vperm.slane %v1240_v48, 0  ;;  %v1246_v55 = vrot.slane %v1125_v44, 7 }
0x1d3e   :  { %v1338_v56 = vperm.slane %v1242_v42, 0  ;;  %v1340_v5 = vperm.slane %v1244_v50, 0  ;;  %v1339_v58 = vperm.slane %v1243_v51, 0  ;;  %v1341_v59 = vperm.slane %v1245_v53, 0 }
0x1d3f   :  { %v4832_v60 = vsel %vm1411_vm13, %v4790_v19, %v1337_v54  ;;  %v4836_v39 = vsel %vm1411_vm13, %v4794_v27, %v1336_v11  ;;  %v1342_v0 = vperm.slane %v1246_v55, 0 }
0x1d40   :  { %v4840_v20 = vsel %vm1411_vm13, %v4798_v61, %v1338_v56  ;;  %v4844_v10 = vsel %vm1411_vm13, %v4802_v9, %v1340_v5  ;;  %v4848_v21 = vsel %vm1411_vm13, %v4806_v8, %v1339_v58  ;;  %v4852_v4 = vsel %vm1411_vm13, %v4810_v17, %v1341_v59 }
0x1d41   :  { %v4856_v22 = vsel %vm1411_vm13, %v4814_v16, %v1342_v0  ;;  %vm1650_vm13 = vcmask 1044484  }
0x1d97   :  { %v1129_v1 = vpop.permute.xlu2 %1128 }
0x1d98   :  { %3853 = vmatmul.msk.bf16.vlgmr.msrb.gmra.mxu2 %vm6048_vm6, %v1129_v1 }
0x1e1b   :  { %v1142_v19 = vpop.f32.mrf.mxu2 }
0x1e1c   :  { %v1146_v27 = vadd.f32 %v1142_v19, %v713_v25 }
0x1e1e   :  { %4074 = vtanh.f32 %v1146_v27  ;;  %v3854_v9 = vmul.f32 -1.442695, %v1146_v27 }
0x1e20   :  { %4076 = vpow2.f32 %v3854_v9 }
0x1e23   :  { %v1144_v57 = vpop.f32.mrf.mxu2 }
0x1e24   :  { %v4075_v61 = vpop.eup %4074 }
0x1e25   :  { %1169 = vrot.lane.b32.xlu0 %v4075_v61, %s4327_s18 }
0x1e26   :  { %v4077_v8 = vpop.eup %4076 }
0x1e27   :  { %v1150_v17 = vadd.f32 1.0, %v4077_v8 }
0x1e29   :  { %4078 = vrcp.f32 %v1150_v17  ;;  %v1162_v29 = vand.u32 2147483648, %v1150_v17  ;;  %vm1156_vm15 = vweird.f32 %v1150_v17  ;;  %v1160_v2 = vand.u32 2147483647, %v1150_v17 }
0x1e2b   :  { %v1163_v30 = vor.u32 1.1754944e-38, %v1162_v29  ;;  %vm1161_vm3 = vcmp.eq.f32.partialorder %v1160_v2, 8.507059e+37 }
0x1e2f   :  { %v4079_v16 = vpop.eup %4078 }
0x1e30   :  { %v1152_v36 = vmul.f32 %v4079_v16, %v1150_v17  ;;  %vm1157_vm14 = vweird.f32 %v4079_v16 }
0x1e31   :  { %vm1158_vm2 = vmor %vm1156_vm15, %vm1157_vm14  ;;  %vm1652_vm14 = vcmask 1045509   ;;  %vm6050_vm15 = vcmask 1046534  }
0x1e32   :  { %v1153_v26 = vsub.f32 1.0, %v1152_v36 }
0x1e34   :  { %v1154_v28 = vmul.f32 %v4079_v16, %v1153_v26 }
0x1e36   :  { %v1155_v14 = vadd.f32 %v4079_v16, %v1154_v28 }
0x1e38   :  { %v1159_v15 = vsel %vm1158_vm2, %v4079_v16, %v1155_v14  ;;  %vm6049_vm2 = vcmask 1047559  }
0x1e39   :  { %v1164_v31 = vsel %vm1161_vm3, %v1163_v30, %v1159_v15  ;;  %vm6046_vm3 = vcmask 64512  }
0x1e3a   :  { %v1167_v32 = vmul.f32 %v1164_v31, %v4821_v40 }
0x1e97   :  { %v1170_v62 = vpop.permute.xlu0 %1169 }
0x1e98   :  { %v1172_v63 = vmul.f32 %v1170_v62, %v1164_v31 }
0x1e9a   :  { %1174 = vrot.lane.b32.xlu1 %v1172_v63, %s4332_s30 }
0x1f0c   :  { %v1175_v3 = vpop.permute.xlu1 %1174 }
0x1f0d   :  { %v4865_v33 = vadd.f32 %v1175_v3, %v1167_v32 }
0x1f0f   :  { %4080 = vtanh.f32 %v4865_v33 }
0x1f15   :  { %v4081_v34 = vpop.eup %4080 }
0x1f16   :  { %1180 = vrot.lane.b32.xlu2 %v4081_v34, %s4327_s18 }
0x1f70   :  { %v1181_v12 = vpop.permute.xlu2 %1180 }
0x1f71   :  { %v1183_v6 = vmul.f32 %v1181_v12, %v1164_v31 }
0x1f73   :  { %1452 = vrot.lane.b32.xlu1 %v1183_v6, %s4327_s18  ;;  %1449 = vrot.lane.b32.xlu0 %v1183_v6, %s4332_s30  ;;  %v1351_v49 = vperm.slane %v1183_v6, 0  ;;  %v1249_v18 = vrot.slane %v1183_v6, 2  ;;  %v1248_v7 = vrot.slane %v1183_v6, 1  ;;  %v1250_v40 = vrot.slane %v1183_v6, 3 }
0x1f74   :  { %v1252_v41 = vrot.slane %v1183_v6, 5  ;;  %v1251_v43 = vrot.slane %v1183_v6, 4  ;;  %v1253_v44 = vrot.slane %v1183_v6, 6  ;;  %v1254_v45 = vrot.slane %v1183_v6, 7 }
0x1f75   :  { %v4901_v46 = vsel %vm1420_vm0, %v4828_v52, %v1351_v49  ;;  %v1353_v47 = vperm.slane %v1249_v18, 0  ;;  %v1352_v48 = vperm.slane %v1248_v7, 0  ;;  %v1354_v42 = vperm.slane %v1250_v40, 0 }
0x1f76   :  { %v1356_v50 = vperm.slane %v1252_v41, 0  ;;  %v1355_v51 = vperm.slane %v1251_v43, 0  ;;  %v1357_v53 = vperm.slane %v1253_v44, 0  ;;  %v1358_v54 = vperm.slane %v1254_v45, 0 }
0x1f77   :  { %v4905_v11 = vsel %vm1420_vm0, %v4832_v60, %v1353_v47  ;;  %v4909_v55 = vsel %vm1420_vm0, %v4836_v39, %v1352_v48  ;;  %v4913_v56 = vsel %vm1420_vm0, %v4840_v20, %v1354_v42 }
0x1f78   :  { %v4917_v52 = vsel %vm1420_vm0, %v4844_v10, %v1356_v50  ;;  %v4921_v5 = vsel %vm1420_vm0, %v4848_v21, %v1355_v51  ;;  %v4925_v58 = vsel %vm1420_vm0, %v4852_v4, %v1357_v53  ;;  %v4929_v59 = vsel %vm1420_vm0, %v4856_v22, %v1358_v54  ;;  %v4936_v10 = vld [vmem:[%s6039_s8] ss:$0 sm:$0xff] }
0x1fe5   :  { %v1453_v60 = vpop.permute.xlu1 %1452  ;;  %v1450_v39 = vpop.permute.xlu0 %1449 }
0x1fe6   :  { %v1455_v0 = vsel %vm6048_vm6, %v1450_v39, %v1453_v60 }
0x1fe7   :  { %v1456_v20 = vpack.c.bf16 %v1455_v0, %v1455_v0 }
0x1fe9   :  { %3871 = vmatmul.msk.bf16.vlgmr.msrb.gmra.mxu0 %vm6047_vm4, %v1456_v20 }
0x2066   :  { %v1497_v21 = vpop.f32.mrf.mxu0 }
0x2067   :  { %v1498_v4 = vadd.f32 %v4936_v10, %v1497_v21 }
0x2069   :  { %4082 = vtanh.f32 %v1498_v4  ;;  %v3872_v13 = vmul.f32 -1.442695, %v1498_v4 }
0x206b   :  { %4084 = vpow2.f32 %v3872_v13 }
0x206e   :  { %v1499_v1 = vpop.f32.mrf.mxu0 }
0x206f   :  { %v4083_v22 = vpop.eup %4082 }
0x2070   :  { %1523 = vrot.lane.b32.xlu2 %v4083_v22, %s4327_s18 }
0x2071   :  { %v4085_v24 = vpop.eup %4084 }
0x2072   :  { %v1504_v25 = vadd.f32 1.0, %v4085_v24 }
0x2074   :  { %4086 = vrcp.f32 %v1504_v25  ;;  %v1516_v8 = vand.u32 2147483648, %v1504_v25  ;;  %vm1510_vm7 = vweird.f32 %v1504_v25  ;;  %v1514_v17 = vand.u32 2147483647, %v1504_v25 }
0x2076   :  { %v1517_v36 = vor.u32 1.1754944e-38, %v1516_v8  ;;  %vm1515_vm9 = vcmp.eq.f32.partialorder %v1514_v17, 8.507059e+37 }
0x207a   :  { %v4087_v19 = vpop.eup %4086 }
0x207b   :  { %v1506_v27 = vmul.f32 %v4087_v19, %v1504_v25  ;;  %vm1511_vm5 = vweird.f32 %v4087_v19 }
0x207c   :  { %vm1512_vm8 = vmor %vm1510_vm7, %vm1511_vm5 }
0x207d   :  { %v1507_v57 = vsub.f32 1.0, %v1506_v27 }
0x207f   :  { %v1508_v61 = vmul.f32 %v4087_v19, %v1507_v57 }
0x2081   :  { %v1509_v9 = vadd.f32 %v4087_v19, %v1508_v61 }
0x2083   :  { %v1513_v16 = vsel %vm1512_vm8, %v4087_v19, %v1509_v9 }
0x2084   :  { %v1518_v28 = vsel %vm1515_vm9, %v1517_v36, %v1513_v16  ;;  %v1634_v16 = vlaneseq }
0x2085   :  { %v1521_v29 = vmul.f32 %v1518_v28, %v4865_v33 }
0x20ca   :  { %v1524_v26 = vpop.permute.xlu2 %1523 }
0x20cb   :  { %v1526_v14 = vmul.f32 %v1524_v26, %v1518_v28  ;;  %v4980_v26 = vand.u32 127, %v1634_v16 }
0x20cd   :  { %1528 = vrot.lane.b32.xlu0 %v1526_v14, %s4332_s30 }
0x213f   :  { %v1529_v2 = vpop.permute.xlu0 %1528 }
0x2140   :  { %v4942_v15 = vadd.f32 %v1529_v2, %v1521_v29 }
0x2142   :  { %4088 = vtanh.f32 %v4942_v15 }
0x2148   :  { %v4089_v30 = vpop.eup %4088 }
0x2149   :  { %1534 = vrot.lane.b32.xlu1 %v4089_v30, %s4327_s18 }
0x21bb   :  { %v1535_v62 = vpop.permute.xlu1 %1534 }
0x21bc   :  { %v4946_v31 = vmul.f32 %v1535_v62, %v1518_v28 }
0x21be   :  { %v1546_v63 = vperm.slane %v4946_v31, 0  ;;  %v1540_v32 = vrot.slane %v4946_v31, 2  ;;  %v1539_v3 = vrot.slane %v4946_v31, 1  ;;  %v1541_v6 = vrot.slane %v4946_v31, 3 }
0x21bf   :  { %v1543_v7 = vrot.slane %v4946_v31, 5  ;;  %v1542_v40 = vrot.slane %v4946_v31, 4  ;;  %v1544_v47 = vrot.slane %v4946_v31, 6  ;;  %v1545_v50 = vrot.slane %v4946_v31, 7 }
0x21c0   :  { %v1562_v34 = vmul.f32 %v1546_v63, %v4901_v46  ;;  %v1548_v33 = vperm.slane %v1540_v32, 0  ;;  %v1547_v12 = vperm.slane %v1539_v3, 0  ;;  %v1549_v41 = vperm.slane %v1541_v6, 0 }
0x21c1   :  { %v1551_v43 = vperm.slane %v1543_v7, 0  ;;  %v1550_v44 = vperm.slane %v1542_v40, 0  ;;  %v1552_v51 = vperm.slane %v1544_v47, 0  ;;  %v1553_v53 = vperm.slane %v1545_v50, 0 }
0x21c2   :  { %1578 = vrot.lane.b32.xlu2 %v1562_v34, %s4332_s30  ;;  %v1564_v49 = vmul.f32 %v1548_v33, %v4905_v11  ;;  %v1563_v18 = vmul.f32 %v1547_v12, %v4909_v55  ;;  %v1565_v45 = vmul.f32 %v1549_v41, %v4913_v56 }
0x21c3   :  { %v1567_v48 = vmul.f32 %v1551_v43, %v4917_v52  ;;  %v1566_v42 = vmul.f32 %v1550_v44, %v4921_v5  ;;  %v1568_v54 = vmul.f32 %v1552_v51, %v4925_v58  ;;  %v1569_v60 = vmul.f32 %v1553_v53, %v4929_v59 }
0x21c4   :  { %1582 = vrot.lane.b32.xlu1 %v1564_v49, %s4332_s30  ;;  %1580 = vrot.lane.b32.xlu0 %v1563_v18, %s4332_s30 }
0x21ca   :  { %1584 = vrot.lane.b32.xlu2 %v1565_v45, %s4332_s30 }
0x21cc   :  { %1588 = vrot.lane.b32.xlu1 %v1567_v48, %s4332_s30  ;;  %1586 = vrot.lane.b32.xlu0 %v1566_v42, %s4332_s30 }
0x21d2   :  { %1590 = vrot.lane.b32.xlu2 %v1568_v54, %s4332_s30 }
0x21d4   :  { %1592 = vrot.lane.b32.xlu0 %v1569_v60, %s4332_s30 }
0x221c   :  { %v1579_v39 = vpop.permute.xlu2 %1578 }
0x221d   :  { %v1602_v0 = vsel %vm6048_vm6, %v1579_v39, 0.0 }
0x221e   :  { %1603 = vadd.xlane.f32.xlu1 %v1602_v0 }
0x2224   :  { %v1585_v20 = vpop.permute.xlu2 %1584 }
0x2225   :  { %v1611_v19 = vsel %vm6048_vm6, %v1585_v20, 0.0 }
0x222c   :  { %v1591_v13 = vpop.permute.xlu2 %1590 }
0x222d   :  { %v1620_v25 = vsel %vm6048_vm6, %v1591_v13, 0.0 }
0x2236   :  { %v1583_v21 = vpop.permute.xlu1 %1582  ;;  %v1581_v4 = vpop.permute.xlu0 %1580 }
0x2237   :  { %v1608_v1 = vsel %vm6048_vm6, %v1583_v21, 0.0  ;;  %v1605_v22 = vsel %vm6048_vm6, %v1581_v4, 0.0 }
0x2238   :  { %1609 = vadd.xlane.f32.xlu0 %v1608_v1  ;;  %1606 = vadd.xlane.f32.xlu2 %v1605_v22 }
0x223e   :  { %v1587_v24 = vpop.permute.xlu0 %1586  ;;  %v1589_v57 = vpop.permute.xlu1 %1588 }
0x223f   :  { %v1614_v27 = vsel %vm6048_vm6, %v1587_v24, 0.0  ;;  %v1617_v9 = vsel %vm6048_vm6, %v1589_v57, 0.0 }
0x2240   :  { %1621 = vadd.xlane.f32.xlu0 %v1620_v25  ;;  %1612 = vadd.xlane.f32.xlu2 %v1611_v19 }
0x2241   :  { %1615 = vadd.xlane.f32.xlu1 %v1614_v27 }
0x2246   :  { %v1593_v61 = vpop.permute.xlu0 %1592 }
0x2247   :  { %v1623_v8 = vsel %vm6048_vm6, %v1593_v61, 0.0 }
0x2248   :  { %1618 = vadd.xlane.f32.xlu2 %v1617_v9 }
0x2249   :  { %1624 = vadd.xlane.f32.xlu1 %v1623_v8 }
0x2291   :  { %v1604_v36 = vpop.xlane.xlu1 %1603 }
0x2292   :  { %v1636_v2 = vperm.slane %v1604_v36, %v4980_v26 }
0x22ab   :  { %v1607_v17 = vpop.xlane.xlu2 %1606  ;;  %v1610_v28 = vpop.xlane.xlu0 %1609 }
0x22ac   :  { %v1637_v14 = vperm.slane %v1607_v17, %v4980_v26  ;;  %v1638_v62 = vperm.slane %v1610_v28, %v4980_v26 }
0x22ae   :  { %v1645_v63 = vsel %vm1644_vm10, %v1637_v14, %v1636_v2 }
0x22af   :  { %v1647_v3 = vsel %vm1646_vm11, %v1638_v62, %v1645_v63 }
0x22b3   :  { %v1613_v29 = vpop.xlane.xlu2 %1612  ;;  %v1622_v12 = vpop.xlane.xlu0 %1621 }
0x22b4   :  { %v1616_v30 = vpop.xlane.xlu1 %1615  ;;  %v1639_v32 = vperm.slane %v1613_v29, %v4980_v26  ;;  %v1642_v40 = vperm.slane %v1622_v12, %v4980_v26 }
0x22b5   :  { %v1640_v34 = vperm.slane %v1616_v30, %v4980_v26 }
0x22b6   :  { %v1649_v33 = vsel %vm1648_vm12, %v1639_v32, %v1647_v3 }
0x22b7   :  { %v1651_v7 = vsel %vm1650_vm13, %v1640_v34, %v1649_v33 }
0x22bb   :  { %v1619_v6 = vpop.xlane.xlu2 %1618 }
0x22bc   :  { %v1641_v49 = vperm.slane %v1619_v6, %v4980_v26  ;;  %v1625_v18 = vpop.xlane.xlu1 %1624 }
0x22bd   :  { %v1643_v41 = vperm.slane %v1625_v18, %v4980_v26 }
0x22be   :  { %v1653_v43 = vsel %vm1652_vm14, %v1641_v49, %v1651_v7 }
0x22bf   :  { %v1655_v44 = vsel %vm6050_vm15, %v1642_v40, %v1653_v43 }
0x22c0   :  { %v1657_v45 = vsel %vm6049_vm2, %v1643_v41, %v1655_v44 }
0x22c1   :  { %v1660_v47 = vsel %vm6046_vm3, %v1657_v45, -inf }
0x22c2   :  { %1661 = vmax.xlane.f32.xlu2 %v1660_v47 }
0x2335   :  { %v1662_v48 = vpop.xlane.xlu2 %1661 }
0x2336   :  { %v1666_v42 = vperm.slane %v1662_v48, 2  ;;  %v1665_v50 = vperm.slane %v1662_v48, 1  ;;  %v1664_v51 = vperm.slane %v1662_v48, 0  ;;  %v1668_v39 = vperm.slane %v1662_v48, 4 }
0x2337   :  { %v1667_v0 = vperm.slane %v1662_v48, 3  ;;  %v1671_v20 = vperm.slane %v1662_v48, 7  ;;  %v1670_v19 = vperm.slane %v1662_v48, 6  ;;  %v1669_v57 = vperm.slane %v1662_v48, 5 }
0x2338   :  { %v1682_v53 = vsub.f32 %v1610_v28, %v1666_v42  ;;  %v1681_v54 = vsub.f32 %v1607_v17, %v1665_v50  ;;  %v1680_v60 = vsub.f32 %v1604_v36, %v1664_v51  ;;  %v1684_v22 = vsub.f32 %v1616_v30, %v1668_v39 }
0x2339   :  { %v1683_v13 = vsub.f32 %v1613_v29, %v1667_v0  ;;  %v1687_v24 = vsub.f32 %v1625_v18, %v1671_v20  ;;  %v1686_v16 = vsub.f32 %v1622_v12, %v1670_v19  ;;  %v1685_v36 = vsub.f32 %v1619_v6, %v1669_v57 }
0x233a   :  { %v1692_v21 = vmul.f32 1.442695, %v1682_v53  ;;  %v1690_v4 = vmul.f32 1.442695, %v1681_v54  ;;  %v1688_v1 = vmul.f32 1.442695, %v1680_v60 }
0x233b   :  { %v1696_v25 = vmul.f32 1.442695, %v1684_v22  ;;  %v1694_v27 = vmul.f32 1.442695, %v1683_v13  ;;  %v1702_v9 = vmul.f32 1.442695, %v1687_v24 }
0x233c   :  { %4090 = vpow2.f32 %v1692_v21  ;;  %v1700_v28 = vmul.f32 1.442695, %v1686_v16  ;;  %v1698_v14 = vmul.f32 1.442695, %v1685_v36 }
0x233d   :  { %4092 = vpow2.f32 %v1690_v4 }
0x233e   :  { %4094 = vpow2.f32 %v1688_v1 }
0x233f   :  { %4096 = vpow2.f32 %v1696_v25 }
0x2340   :  { %4098 = vpow2.f32 %v1694_v27 }
0x2341   :  { %4100 = vpow2.f32 %v1702_v9 }
0x2342   :  { %v4998_v61 = vpop.eup %4090  ;;  %4102 = vpow2.f32 %v1700_v28 }
0x2343   :  { %v5000_v8 = vpop.eup %4092  ;;  %1719 = vperm.xlu2 %3948, %v4998_v61   ;;  %4104 = vpow2.f32 %v1698_v14 }
0x2344   :  { %v5003_v17 = vpop.eup %4094  ;;  %1716 = vperm.xlu1 %3947, %v5000_v8  }
0x2345   :  { %1713 = vperm.xlu0 %3946, %v5003_v17   ;;  %v5007_v29 = vpop.eup %4096 }
0x2346   :  { %v5009_v2 = vpop.eup %4098 }
0x2347   :  { %v5012_v30 = vpop.eup %4100 }
0x2348   :  { %v5016_v62 = vpop.eup %4102 }
0x2349   :  { %v5018_v63 = vpop.eup %4104 }
0x234b   :  { %1725 = vperm.xlu2 %3948, %v5007_v29  }
0x234c   :  { %1722 = vperm.xlu1 %3947, %v5009_v2  }
0x234d   :  { %1734 = vperm.xlu0 %3946, %v5012_v30  }
0x2353   :  { %1731 = vperm.xlu2 %3948, %v5016_v62  }
0x2354   :  { %1728 = vperm.xlu1 %3947, %v5018_v63  }
0x239d   :  { %v1720_v32 = vpop.permute.xlu2 %1719 }
0x239e   :  { %v1738_v40 = vperm.slane %v1720_v32, %v4980_v26 }
0x23a5   :  { %v1726_v33 = vpop.permute.xlu2 %1725 }
0x23a6   :  { %v1740_v45 = vperm.slane %v1726_v33, %v4980_v26 }
0x23ad   :  { %v1732_v43 = vpop.permute.xlu2 %1731 }
0x23ae   :  { %v1742_v50 = vperm.slane %v1732_v43, %v4980_v26 }
0x23b6   :  { %v1717_v3 = vpop.permute.xlu1 %1716 }
0x23b7   :  { %v1714_v34 = vpop.permute.xlu0 %1713  ;;  %v1737_v12 = vperm.slane %v1717_v3, %v4980_v26 }
0x23b8   :  { %v1736_v6 = vperm.slane %v1714_v34, %v4980_v26 }
0x23ba   :  { %v1744_v18 = vsel %vm1644_vm10, %v1737_v12, %v1736_v6 }
0x23bb   :  { %v1745_v41 = vsel %vm1646_vm11, %v1738_v40, %v1744_v18 }
0x23be   :  { %v1723_v49 = vpop.permute.xlu1 %1722 }
0x23bf   :  { %v1739_v7 = vperm.slane %v1723_v49, %v4980_v26  ;;  %v1735_v47 = vpop.permute.xlu0 %1734 }
0x23c0   :  { %v1743_v53 = vperm.slane %v1735_v47, %v4980_v26 }
0x23c1   :  { %v1746_v44 = vsel %vm1648_vm12, %v1739_v7, %v1745_v41 }
0x23c2   :  { %v1747_v51 = vsel %vm1650_vm13, %v1740_v45, %v1746_v44 }
0x23c6   :  { %v1729_v48 = vpop.permute.xlu1 %1728 }
0x23c7   :  { %v1741_v42 = vperm.slane %v1729_v48, %v4980_v26 }
0x23c9   :  { %v1748_v54 = vsel %vm1652_vm14, %v1741_v42, %v1747_v51 }
0x23ca   :  { %v1749_v60 = vsel %vm6050_vm15, %v1742_v50, %v1748_v54 }
0x23cb   :  { %v1750_v39 = vsel %vm6049_vm2, %v1743_v53, %v1749_v60 }
0x23cc   :  { %v1752_v0 = vsel %vm6046_vm3, %v1750_v39, 0.0 }
0x23cd   :  { %1753 = vadd.xlane.f32.xlu1 %v1752_v0 }
0x2440   :  { %v1754_v20 = vpop.xlane.xlu1 %1753 }
0x2441   :  { %v1756_v21 = vperm.slane %v1754_v20, 0  ;;  %v1757_v4 = vperm.slane %v1754_v20, 1  ;;  %v5038_v1 = vperm.slane %v1754_v20, 2  ;;  %v5040_v22 = vperm.slane %v1754_v20, 3 }
0x2442   :  { %v5042_v13 = vperm.slane %v1754_v20, 4  ;;  %v5044_v24 = vperm.slane %v1754_v20, 5  ;;  %v5050_v9 = vperm.slane %v1754_v20, 7  ;;  %v5052_v28 = vperm.slane %v1754_v20, 6 }
0x2443   :  { %4106 = vrcp.f32 %v1756_v21  ;;  %v1796_v25 = vand.u32 2147483647, %v1757_v4  ;;  %v1798_v19 = vand.u32 2147483648, %v1757_v4  ;;  %v1781_v27 = vand.u32 2147483647, %v1756_v21 }
0x2444   :  { %4108 = vrcp.f32 %v1757_v4  ;;  %v1783_v16 = vand.u32 2147483648, %v1756_v21  ;;  %vm1792_vm0 = vweird.f32 %v1757_v4  ;;  %vm1777_vm7 = vweird.f32 %v1756_v21 }
0x2445   :  { %4110 = vrcp.f32 %v5038_v1  ;;  %vm5056_vm5 = vcmp.eq.f32.partialorder %v1796_v25, 8.507059e+37  ;;  %v1799_v12 = vor.u32 1.1754944e-38, %v1798_v19  ;;  %vm5062_vm8 = vcmp.eq.f32.partialorder %v1781_v27, 8.507059e+37 }
0x2446   :  { %4112 = vrcp.f32 %v5040_v22  ;;  %v1784_v41 = vor.u32 1.1754944e-38, %v1783_v16  ;;  %v1828_v54 = vand.u32 2147483648, %v5040_v22  ;;  %v1813_v39 = vand.u32 2147483648, %v5038_v1 }
0x2447   :  { %4114 = vrcp.f32 %v5042_v13 }
0x2448   :  { %4116 = vrcp.f32 %v5044_v24 }
0x2449   :  { %v4107_v57 = vpop.eup %4106  ;;  %4118 = vrcp.f32 %v5050_v9 }
0x244a   :  { %v4109_v36 = vpop.eup %4108  ;;  %v1773_v14 = vmul.f32 %v4107_v57, %v1756_v21  ;;  %vm1778_vm9 = vweird.f32 %v4107_v57  ;;  %4120 = vrcp.f32 %v5052_v28 }
0x244b   :  { %v5054_v32 = vpop.eup %4110  ;;  %v1788_v3 = vmul.f32 %v4109_v36, %v1757_v4  ;;  %vm1793_vm1 = vweird.f32 %v4109_v36  ;;  %vm1779_vm3 = vmor %vm1777_vm7, %vm1778_vm9  ;;  %vm1852_vm9 = vweird.f32 %v5044_v24 }
0x244c   :  { %v5060_v33 = vpop.eup %4112  ;;  %v1774_v6 = vsub.f32 1.0, %v1773_v14  ;;  %v1803_v18 = vmul.f32 %v5054_v32, %v5038_v1  ;;  %vm1808_vm4 = vweird.f32 %v5054_v32  ;;  %vm1794_vm6 = vmor %vm1792_vm0, %vm1793_vm1  ;;  %vm1807_vm1 = vweird.f32 %v5038_v1 }
0x244d   :  { %v5068_v7 = vpop.eup %4114  ;;  %v1789_v40 = vsub.f32 1.0, %v1788_v3  ;;  %v1818_v43 = vmul.f32 %v5060_v33, %v5040_v22  ;;  %vm1823_vm2 = vweird.f32 %v5060_v33 }
0x244e   :  { %v5073_v44 = vpop.eup %4116  ;;  %v1775_v45 = vmul.f32 %v4107_v57, %v1774_v6  ;;  %v1804_v47 = vsub.f32 1.0, %v1803_v18  ;;  %v1833_v48 = vmul.f32 %v5068_v7, %v5042_v13 }
0x244f   :  { %v1790_v42 = vmul.f32 %v4109_v36, %v1789_v40  ;;  %v1819_v50 = vsub.f32 1.0, %v1818_v43  ;;  %v1848_v51 = vmul.f32 %v5073_v44, %v5044_v24  ;;  %v5089_v16 = vpop.eup %4118  ;;  %vm1853_vm7 = vweird.f32 %v5073_v44 }
0x2450   :  { %v1776_v53 = vadd.f32 %v4107_v57, %v1775_v45  ;;  %v1805_v60 = vmul.f32 %v5054_v32, %v1804_v47  ;;  %v1834_v27 = vsub.f32 1.0, %v1833_v48  ;;  %v1858_v45 = vand.u32 2147483648, %v5044_v24 }
0x2451   :  { %v1791_v0 = vadd.f32 %v4109_v36, %v1790_v42  ;;  %v1820_v20 = vmul.f32 %v5060_v33, %v1819_v50  ;;  %v1849_v6 = vsub.f32 1.0, %v1848_v51  ;;  %v1843_v42 = vand.u32 2147483648, %v5042_v13 }
0x2452   :  { %v1780_v25 = vsel %vm1779_vm3, %v4107_v57, %v1776_v53  ;;  %v1806_v19 = vadd.f32 %v5054_v32, %v1805_v60  ;;  %v1811_v57 = vand.u32 2147483647, %v5038_v1  ;;  %vm1822_vm3 = vweird.f32 %v5040_v22 }
0x2453   :  { %v1795_v14 = vsel %vm1794_vm6, %v4109_v36, %v1791_v0  ;;  %v1785_v3 = vsel %vm5062_vm8, %v1784_v41, %v1780_v25  ;;  %v1821_v21 = vadd.f32 %v5060_v33, %v1820_v20  ;;  %v1826_v36 = vand.u32 2147483647, %v5040_v22  ;;  %vm1809_vm6 = vmor %vm1807_vm1, %vm1808_vm4 }
0x2454   :  { %v1800_v18 = vsel %vm5056_vm5, %v1799_v12, %v1795_v14  ;;  %v1786_v4 = vmul.f32 %v5003_v17, %v1785_v3  ;;  %vm1824_vm0 = vmor %vm1822_vm3, %vm1823_vm2  ;;  %v1810_v34 = vsel %vm1809_vm6, %v5054_v32, %v1806_v19  ;;  %v1835_v17 = vmul.f32 %v5068_v7, %v1834_v27  ;;  %v5108_v12 = vpop.eup %4120 }
0x2455   :  { %v1801_v40 = vmul.f32 %v5000_v8, %v1800_v18  ;;  %v1825_v8 = vsel %vm1824_vm0, %v5060_v33, %v1821_v21  ;;  %v1814_v1 = vor.u32 1.1754944e-38, %v1813_v39  ;;  %v1850_v49 = vmul.f32 %v5073_v44, %v1849_v6  ;;  %vm1854_vm3 = vmor %vm1852_vm9, %vm1853_vm7 }
0x2456   :  { %1894 = vperm.xlu2 %3948, %v1786_v4   ;;  %v1878_v22 = vmul.f32 %v5089_v16, %v5050_v9  ;;  %v1829_v41 = vor.u32 1.1754944e-38, %v1828_v54  ;;  %vm1812_vm4 = vcmp.eq.f32.partialorder %v1811_v57, 8.507059e+37  ;;  %vm1827_vm5 = vcmp.eq.f32.partialorder %v1826_v36, 8.507059e+37 }
0x2457   :  { %1899 = vperm.xlu0 %3946, %v1801_v40   ;;  %v1815_v43 = vsel %vm1812_vm4, %v1814_v1, %v1810_v34  ;;  %v1836_v47 = vadd.f32 %v5068_v7, %v1835_v17  ;;  %vm1838_vm2 = vweird.f32 %v5068_v7  ;;  %v1863_v33 = vmul.f32 %v5108_v12, %v5052_v28 }
0x2458   :  { %v1830_v32 = vsel %vm1827_vm5, %v1829_v41, %v1825_v8  ;;  %v1851_v48 = vadd.f32 %v5073_v44, %v1850_v49  ;;  %v1879_v50 = vsub.f32 1.0, %v1878_v22  ;;  %v1816_v51 = vmul.f32 %v4998_v61, %v1815_v43 }
0x2459   :  { %vm1837_vm8 = vweird.f32 %v5042_v13  ;;  %v1841_v53 = vand.u32 2147483647, %v5042_v13  ;;  %v1864_v54 = vsub.f32 1.0, %v1863_v33  ;;  %v1831_v60 = vmul.f32 %v5009_v2, %v1830_v32 }
0x245a   :  { %v1856_v39 = vand.u32 2147483647, %v5044_v24  ;;  %vm1839_vm1 = vmor %vm1837_vm8, %vm1838_vm2  ;;  %v1855_v61 = vsel %vm1854_vm3, %v5073_v44, %v1851_v48  ;;  %v1844_v25 = vor.u32 1.1754944e-38, %v1843_v42  ;;  %v1880_v13 = vmul.f32 %v5089_v16, %v1879_v50  ;;  %v3934_v50 = vld [vmem:[%s6040_s9 + $0x34] sm:$0xf] }
0x245b   :  { %v1840_v0 = vsel %vm1839_vm1, %v5068_v7, %v1836_v47  ;;  %v1865_v20 = vmul.f32 %v5108_v12, %v1864_v54  ;;  %v1859_v19 = vor.u32 1.1754944e-38, %v1858_v45  ;;  %vm1842_vm6 = vcmp.eq.f32.partialorder %v1841_v53, 8.507059e+37  ;;  %v3899_v53 = vld [vmem:[%s6040_s9 + $0x30] sm:$0xf] }
0x245c   :  { %vm1857_vm0 = vcmp.eq.f32.partialorder %v1856_v39, 8.507059e+37  ;;  %v1845_v2 = vsel %vm1842_vm6, %v1844_v25, %v1840_v0  ;;  %vm1868_vm4 = vweird.f32 %v5108_v12  ;;  %v1881_v14 = vadd.f32 %v5089_v16, %v1880_v13  ;;  %v3935_v0 = vld [vmem:[%s6040_s9 + $0x34] sm:$0xf0] }
0x245d   :  { %v1860_v27 = vsel %vm1857_vm0, %v1859_v19, %v1855_v61  ;;  %v1866_v24 = vadd.f32 %v5108_v12, %v1865_v20  ;;  %vm1883_vm5 = vweird.f32 %v5089_v16  ;;  %v1873_v7 = vand.u32 2147483648, %v5052_v28  ;;  %v3932_v20 = vld [vmem:[%s6040_s9 + $0x24] sm:$0xf]  ;;  %v3893_v61 = vld [vmem:[%s6040_s9 + $0x28] sm:$0xf0] }
0x245e   :  { %1904 = vperm.xlu2 %3948, %v1816_v51   ;;  %v1846_v44 = vmul.f32 %v5007_v29, %v1845_v2  ;;  %v1888_v3 = vand.u32 2147483648, %v5050_v9  ;;  %vm1867_vm2 = vweird.f32 %v5052_v28  ;;  %v1871_v21 = vand.u32 2147483647, %v5052_v28  ;;  %v3901_v51 = vld [vmem:[%s6040_s9 + $0x38] sm:$0xf0] }
0x245f   :  { %1909 = vperm.xlu0 %3946, %v1831_v60   ;;  %v1861_v6 = vmul.f32 %v5018_v63, %v1860_v27  ;;  %vm1882_vm7 = vweird.f32 %v5050_v9  ;;  %v1886_v18 = vand.u32 2147483647, %v5050_v9  ;;  %vm1869_vm8 = vmor %vm1867_vm2, %vm1868_vm4  ;;  %v1874_v57 = vor.u32 1.1754944e-38, %v1873_v7  ;;  %v3891_v19 = vld [vmem:[%s6040_s9 + $0x20] sm:$0xf] }
0x2460   :  { %vm1884_vm9 = vmor %vm1882_vm7, %vm1883_vm5  ;;  %v1870_v4 = vsel %vm1869_vm8, %v5108_v12, %v1866_v24  ;;  %v1889_v40 = vor.u32 1.1754944e-38, %v1888_v3  ;;  %vm1872_vm1 = vcmp.eq.f32.partialorder %v1871_v21, 8.507059e+37  ;;  %vm1940_vm6 = vcmask 1048320   ;;  %v3933_v2 = vld [vmem:[%s6040_s9 + $0x24] sm:$0xf0] }
0x2461   :  { %v1885_v29 = vsel %vm1884_vm9, %v5089_v16, %v1881_v14  ;;  %vm1887_vm3 = vcmp.eq.f32.partialorder %v1886_v18, 8.507059e+37  ;;  %v1875_v36 = vsel %vm1872_vm1, %v1874_v57, %v1870_v4  ;;  %v5169_v39 = vor.u32 %v3934_v50, %v3901_v51  ;;  %v3930_v21 = vld [vmem:[%s6040_s9 + $0x14] sm:$0xf]  ;;  %v3883_v57 = vld [vmem:[%s6040_s9 + $0x10] sm:$0xf] }
0x2462   :  { %v1890_v28 = vsel %vm1887_vm3, %v1889_v40, %v1885_v29  ;;  %v1876_v63 = vmul.f32 %v5016_v62, %v1875_v36  ;;  %v5181_v13 = vor.u32 %v3935_v0, %v3899_v53  ;;  %v5190_v7 = vor.u32 %v3932_v20, %v3893_v61  ;;  %v3931_v40 = vld [vmem:[%s6040_s9 + $0x14] sm:$0xf0] }
0x2463   :  { %v1891_v34 = vmul.f32 %v5012_v30, %v1890_v28  ;;  %2085 = vmatpush.bf16.msra.mxu2 %v5169_v39  ;;  %v5193_v3 = vor.u32 %v3933_v2, %v3891_v19  ;;  %vm6057_vm0 = vcmask 1047559   ;;  %vm6058_vm4 = vcmask 261120  }
0x2464   :  { %2072 = vmatpush.bf16.msra.mxu1 %v5181_v13  ;;  %2637 = vmatpush.bf16.msra.mxu0 %v5181_v13  ;;  %vm6059_vm5 = vcmask 523264   ;;  %vm6061_vm7 = vmmov %vm6058_vm4 }
0x2465   :  { %3196 = vmatpush.bf16.msra.mxu3 %v5181_v13  ;;  %vm6060_vm2 = vmmov %vm6059_vm5 }
0x2466   :  { %1914 = vperm.xlu2 %3948, %v1846_v44   ;;  %vm6062_vm8 = vmmov %vm6060_vm2 }
0x2467   :  { %1919 = vperm.xlu0 %3946, %v1861_v6   ;;  %v3885_v6 = vld [vmem:[%s6040_s9 + $0x18] sm:$0xf0]  ;;  %2086 = vmatpush.bf16.msra.mxu2 %v5190_v7 }
0x2468   :  { %2073 = vmatpush.bf16.msra.mxu1 %v5193_v3  ;;  %2638 = vmatpush.bf16.msra.mxu0 %v5193_v3 }
0x2469   :  { %3197 = vmatpush.bf16.msra.mxu3 %v5193_v3 }
0x246e   :  { %1924 = vperm.xlu2 %3948, %v1876_v63  }
0x246f   :  { %1929 = vperm.xlu0 %3946, %v1891_v34  }
0x2477   :  { %2015 = vrot.lane.b32.xlu0 %v4946_v31, %s4327_s18 }
0x24b0   :  { %v1895_v9 = vpop.permute.xlu2 %1894 }
0x24b1   :  { %v1932_v16 = vmul.f32 %v1895_v9, %v4901_v46  ;;  %v5211_v9 = vor.u32 %v3930_v21, %v3885_v6 }
0x24b3   :  { %v1941_v62 = vsel %vm1940_vm6, %v1932_v16, 0.0  ;;  %2087 = vmatpush.bf16.msra.mxu2 %v5211_v9 }
0x24b4   :  { %v1942_v43 = vrot.slane %v1941_v62, 4 }
0x24b6   :  { %v1943_v54 = vadd.f32 %v1942_v43, %v1941_v62 }
0x24b8   :  { %v1905_v17 = vpop.permute.xlu2 %1904  ;;  %v1944_v18 = vrot.slane %v1943_v54, 2 }
0x24b9   :  { %v1934_v1 = vmul.f32 %v1905_v17, %v4905_v11 }
0x24ba   :  { %v1945_v62 = vadd.f32 %v1944_v18, %v1943_v54 }
0x24bb   :  { %v1955_v31 = vsel %vm1940_vm6, %v1934_v1, 0.0  ;;  %v3928_v1 = vld [vmem:[%s6040_s9 + $0x4] sm:$0xf] }
0x24bc   :  { %v1956_v32 = vrot.slane %v1955_v31, 4 }
0x24be   :  { %v1957_v27 = vadd.f32 %v1956_v32, %v1955_v31 }
0x24c0   :  { %v1915_v12 = vpop.permute.xlu2 %1914  ;;  %v1958_v36 = vrot.slane %v1957_v27, 2 }
0x24c1   :  { %v1936_v22 = vmul.f32 %v1915_v12, %v4921_v5 }
0x24c3   :  { %v1969_v47 = vsel %vm1940_vm6, %v1936_v22, 0.0 }
0x24c4   :  { %v1970_v44 = vrot.slane %v1969_v47, 4 }
0x24c6   :  { %v1971_v17 = vadd.f32 %v1970_v44, %v1969_v47 }
0x24c8   :  { %v1925_v45 = vpop.permute.xlu2 %1924  ;;  %v1972_v32 = vrot.slane %v1971_v17, 2 }
0x24c9   :  { %v1900_v8 = vpop.permute.xlu0 %1899  ;;  %v1938_v60 = vmul.f32 %v1925_v45, %v4925_v58  ;;  %v1959_v45 = vadd.f32 %v1958_v36, %v1957_v27 }
0x24ca   :  { %v1933_v49 = vmul.f32 %v1900_v8, %v4909_v55  ;;  %v5215_v8 = vor.u32 %v3931_v40, %v3883_v57 }
0x24cb   :  { %v1983_v4 = vsel %vm1940_vm6, %v1938_v60, 0.0  ;;  %v1960_v54 = vrot.slane %v1959_v45, 1  ;;  %v1973_v60 = vadd.f32 %v1972_v32, %v1971_v17 }
0x24cc   :  { %v1948_v30 = vsel %vm1940_vm6, %v1933_v49, 0.0  ;;  %v1984_v12 = vrot.slane %v1983_v4, 4  ;;  %v3877_v49 = vld [vmem:[%s6040_s9 + $0x8] sm:$0xf0]  ;;  %2074 = vmatpush.bf16.msra.mxu1 %v5215_v8  ;;  %2639 = vmatpush.bf16.msra.mxu0 %v5215_v8 }
0x24cd   :  { %v1949_v41 = vrot.slane %v1948_v30, 4  ;;  %v3880_v43 = vor.u32 %v3928_v1, %v3877_v49  ;;  %3198 = vmatpush.bf16.msra.mxu3 %v5215_v8  ;;  %v1961_v44 = vadd.f32 %v1960_v54, %v1959_v45  ;;  %v1974_v21 = vrot.slane %v1973_v60, 1  ;;  %v3929_v49 = vld [vmem:[%s6040_s9 + $0x4] sm:$0xf0] }
0x24ce   :  { %v1985_v47 = vadd.f32 %v1984_v12, %v1983_v4 }
0x24cf   :  { %v1950_v33 = vadd.f32 %v1949_v41, %v1948_v30  ;;  %2088 = vmatpush.bf16.msra.mxu2 %v3880_v43  ;;  %v1975_v40 = vadd.f32 %v1974_v21, %v1973_v60 }
0x24d0   :  { %v1986_v0 = vrot.slane %v1985_v47, 2 }
0x24d1   :  { %v1910_v48 = vpop.permute.xlu0 %1909  ;;  %v1951_v24 = vrot.slane %v1950_v33, 2 }
0x24d2   :  { %v1935_v42 = vmul.f32 %v1910_v48, %v4913_v56  ;;  %v1987_v6 = vadd.f32 %v1986_v0, %v1985_v47 }
0x24d3   :  { %v1952_v28 = vadd.f32 %v1951_v24, %v1950_v33  ;;  %v1946_v33 = vrot.slane %v1945_v62, 1  ;;  %2672 = vmatpush.bf16.msrb.mxu2 %v4872_v37 }
0x24d4   :  { %v1962_v25 = vsel %vm1940_vm6, %v1935_v42, 0.0  ;;  %v1988_v36 = vrot.slane %v1987_v6, 1 }
0x24d5   :  { %v1963_v14 = vrot.slane %v1962_v25, 4  ;;  %v1953_v22 = vrot.slane %v1952_v28, 1  ;;  %v1947_v61 = vadd.f32 %v1946_v33, %v1945_v62 }
0x24d6   :  { %v1989_v12 = vadd.f32 %v1988_v36, %v1987_v6 }
0x24d7   :  { %v1964_v29 = vadd.f32 %v1963_v14, %v1962_v25  ;;  %v1954_v42 = vadd.f32 %v1953_v22, %v1952_v28  ;;  %2673 = vmatpush.bf16.msrb.mxu2 %v4878_v23 }
0x24d9   :  { %v1965_v63 = vrot.slane %v1964_v29, 2  ;;  %v1920_v34 = vpop.permute.xlu0 %1919  ;;  %v2005_v2 = vsel %vm1644_vm10, %v1954_v42, %v1947_v61 }
0x24da   :  { %v1937_v16 = vmul.f32 %v1920_v34, %v4917_v52  ;;  %v2006_v4 = vsel %vm1646_vm11, %v1961_v44, %v2005_v2 }
0x24db   :  { %v1966_v41 = vadd.f32 %v1965_v63, %v1964_v29  ;;  %2674 = vmatpush.bf16.msrb.mxu2 %v4885_v35  ;;  %v3875_v35 = vld [vmem:[%s6040_s9] sm:$0xf] }
0x24dc   :  { %v1976_v30 = vsel %vm1940_vm6, %v1937_v16, 0.0  ;;  %v3876_v62 = vor.u32 %v3929_v49, %v3875_v35 }
0x24dd   :  { %v1977_v31 = vrot.slane %v1976_v30, 4  ;;  %v1967_v50 = vrot.slane %v1966_v41, 1 }
0x24de   :  { %2075 = vmatpush.bf16.msra.mxu1 %v3876_v62  ;;  %2640 = vmatpush.bf16.msra.mxu0 %v3876_v62 }
0x24df   :  { %v1978_v48 = vadd.f32 %v1977_v31, %v1976_v30  ;;  %v1968_v27 = vadd.f32 %v1967_v50, %v1966_v41  ;;  %2675 = vmatpush.bf16.msrb.mxu2 %v4892_v38  ;;  %3199 = vmatpush.bf16.msra.mxu3 %v3876_v62  ;;  %v4247_v31 = vld [vmem:[%s6038_s7] sm:$0xff] }
0x24e1   :  { %v1979_v51 = vrot.slane %v1978_v48, 2  ;;  %v1930_v53 = vpop.permute.xlu0 %1929  ;;  %v2007_v37 = vsel %vm1648_vm12, %v1968_v27, %v2006_v4 }
0x24e2   :  { %v1939_v20 = vmul.f32 %v1930_v53, %v4929_v59  ;;  %v2008_v63 = vsel %vm1650_vm13, %v1975_v40, %v2007_v37  ;;  %2650 = vmatpush.bf16.msrb.mxu1 %v5169_v39  ;;  %3209 = vmatpush.bf16.msrb.mxu0 %v5169_v39  ;;  %v4244_v39 = vld [vmem:[%s6038_s7 + $0x18] sm:$0xff] }
0x24e3   :  { %v1980_v25 = vadd.f32 %v1979_v51, %v1978_v48 }
0x24e4   :  { %v1990_v19 = vsel %vm1940_vm6, %v1939_v20, 0.0 }
0x24e5   :  { %v1981_v24 = vrot.slane %v1980_v25, 1  ;;  %v1991_v14 = vrot.slane %v1990_v19, 4 }
0x24e6   :  { %2651 = vmatpush.bf16.msrb.mxu1 %v5190_v7  ;;  %3210 = vmatpush.bf16.msrb.mxu0 %v5190_v7  ;;  %v4245_v7 = vld [vmem:[%s6038_s7 + $0x10] sm:$0xff] }
0x24e7   :  { %v1992_v18 = vadd.f32 %v1991_v14, %v1990_v19  ;;  %v1982_v29 = vadd.f32 %v1981_v24, %v1980_v25 }
0x24e9   :  { %v1993_v57 = vrot.slane %v1992_v18, 2  ;;  %v2009_v17 = vsel %vm1652_vm14, %v1982_v29, %v2008_v63  ;;  %v2016_v38 = vpop.permute.xlu0 %2015 }
0x24ea   :  { %v2010_v16 = vsel %vm6050_vm15, %v1989_v12, %v2009_v17  ;;  %2652 = vmatpush.bf16.msrb.mxu1 %v5211_v9  ;;  %3211 = vmatpush.bf16.msrb.mxu0 %v5211_v9  ;;  %v4246_v9 = vld [vmem:[%s6038_s7 + $0x8] sm:$0xff] }
0x24eb   :  { %v1994_v28 = vadd.f32 %v1993_v57, %v1992_v18 }
0x24ed   :  { %v1995_v34 = vrot.slane %v1994_v28, 1 }
0x24ee   :  { %2653 = vmatpush.bf16.msrb.mxu1 %v3880_v43  ;;  %3212 = vmatpush.bf16.msrb.mxu0 %v3880_v43  ;;  %v1446_v43 = vld [vmem:[%s6041_s10] sm:$0x3] }
0x24ef   :  { %v1996_v23 = vadd.f32 %v1995_v34, %v1994_v28 }
0x24f1   :  { %v2011_v1 = vsel %vm6057_vm0, %v1996_v23, %v2010_v16 }
0x24f2   :  { %2012 = vrot.lane.b32.xlu2 %v2011_v1, %s4332_s30 }
0x254c   :  { %v2013_v30 = vpop.permute.xlu2 %2012 }
0x254d   :  { %v2018_v22 = vsel %vm6058_vm4, %v2013_v30, %v2016_v38 }
0x254e   :  { %v2019_v41 = vpack.c.bf16 %v2018_v22, %v2018_v22 }
0x2550   :  { %3905 = vmatmul.msk.bf16.vlgmr.msra.gmra.mxu1 %vm6059_vm5, %v2019_v41  ;;  %3906 = vmatmul.msk.bf16.vlgmr.msra.gmra.mxu2 %vm6060_vm2, %v2019_v41  ;;  %vm6063_vm5 = vmmov %vm6058_vm4 }
0x2551   :  { %3231 = vmatpush.bf16.msra.mxu1 %v4244_v39  ;;  %3755 = vmatpush.bf16.msra.mxu2 %v5181_v13  ;;  %vm6064_vm2 = vmmov %vm6058_vm4 }
0x2555   :  { %3232 = vmatpush.bf16.msra.mxu1 %v4245_v7  ;;  %3756 = vmatpush.bf16.msra.mxu2 %v5193_v3  ;;  %v5279_v3 = vperm.slane %v1446_v43, 1 }
0x2559   :  { %3233 = vmatpush.bf16.msra.mxu1 %v4246_v9  ;;  %3757 = vmatpush.bf16.msra.mxu2 %v5215_v8 }
0x255d   :  { %3234 = vmatpush.bf16.msra.mxu1 %v4247_v31  ;;  %3758 = vmatpush.bf16.msra.mxu2 %v3876_v62 }
0x25cd   :  { %v5274_v13 = vpop.f32.mrf.mxu1 }
0x25d3   :  { %v2090_v45 = vpop.f32.mrf.mxu2 }
0x25d4   :  { %v2091_v32 = vadd.f32 %v2090_v45, %v5279_v3 }
0x25d5   :  { %v2079_v47 = vpop.f32.mrf.mxu1 }
0x25d6   :  { %v2104_v8 = vsel %vm6061_vm7, %v2091_v32, %v2016_v38  ;;  %vm6065_vm7 = vmmov %vm6064_vm2 }
0x25d7   :  { %v2105_v33 = vpack.c.bf16 %v2104_v8, %v2104_v8 }
0x25d9   :  { %3907 = vmatmul.msk.bf16.vlgmr.msrb.gmra.mxu3 %vm6062_vm8, %v2105_v33  ;;  %vm6066_vm8 = vmmov %vm6064_vm2 }
0x25db   :  { %v2092_v48 = vpop.f32.mrf.mxu2 }
0x265c   :  { %v2118_v42 = vpop.f32.mrf.mxu3 }
0x265d   :  { %v2119_v50 = vadd.f32 %v4936_v10, %v2118_v42 }
0x265f   :  { %4122 = vtanh.f32 %v2119_v50  ;;  %v3908_v54 = vmul.f32 -1.442695, %v2119_v50 }
0x2661   :  { %4124 = vpow2.f32 %v3908_v54 }
0x2664   :  { %v2120_v51 = vpop.f32.mrf.mxu3 }
0x2665   :  { %v4123_v53 = vpop.eup %4122 }
0x2666   :  { %2144 = vrot.lane.b32.xlu1 %v4123_v53, %s4327_s18 }
0x2667   :  { %v4125_v60 = vpop.eup %4124 }
0x2668   :  { %v2125_v0 = vadd.f32 1.0, %v4125_v60 }
0x266a   :  { %4126 = vrcp.f32 %v2125_v0  ;;  %v2137_v27 = vand.u32 2147483648, %v2125_v0  ;;  %vm2131_vm1 = vweird.f32 %v2125_v0  ;;  %v2135_v24 = vand.u32 2147483647, %v2125_v0 }
0x266c   :  { %v2138_v14 = vor.u32 1.1754944e-38, %v2137_v27  ;;  %vm2136_vm0 = vcmp.eq.f32.partialorder %v2135_v24, 8.507059e+37 }
0x2670   :  { %v4127_v20 = vpop.eup %4126 }
0x2671   :  { %v2127_v61 = vmul.f32 %v4127_v20, %v2125_v0  ;;  %vm2132_vm9 = vweird.f32 %v4127_v20 }
0x2672   :  { %vm2133_vm3 = vmor %vm2131_vm1, %vm2132_vm9 }
0x2673   :  { %v2128_v25 = vsub.f32 1.0, %v2127_v61  ;;  %vm6067_vm9 = vmmov %vm6064_vm2 }
0x2674   :  { %vm6068_vm1 = vmmov %vm6064_vm2 }
0x2675   :  { %v2129_v19 = vmul.f32 %v4127_v20, %v2128_v25 }
0x2677   :  { %v2130_v2 = vadd.f32 %v4127_v20, %v2129_v19 }
0x2679   :  { %v2134_v10 = vsel %vm2133_vm3, %v4127_v20, %v2130_v2  ;;  %vm6069_vm3 = vmmov %vm6068_vm1 }
0x267a   :  { %v2139_v21 = vsel %vm2136_vm0, %v2138_v14, %v2134_v10  ;;  %vm6070_vm0 = vcmask 1047559  }
0x267b   :  { %v2142_v18 = vmul.f32 %v2139_v21, %v4942_v15 }
0x26d8   :  { %v2145_v44 = vpop.permute.xlu1 %2144 }
0x26d9   :  { %v2147_v6 = vmul.f32 %v2145_v44, %v2139_v21 }
0x26db   :  { %2149 = vrot.lane.b32.xlu2 %v2147_v6, %s4332_s30 }
0x2735   :  { %v2150_v4 = vpop.permute.xlu2 %2149 }
0x2736   :  { %v5288_v29 = vadd.f32 %v2150_v4, %v2142_v18 }
0x2738   :  { %4128 = vtanh.f32 %v5288_v29 }
0x273e   :  { %v4129_v57 = vpop.eup %4128 }
0x273f   :  { %2155 = vrot.lane.b32.xlu0 %v4129_v57, %s4327_s18 }
0x27b1   :  { %v2156_v37 = vpop.permute.xlu0 %2155 }
0x27b2   :  { %v5292_v40 = vmul.f32 %v2156_v37, %v2139_v21 }
0x27b4   :  { %v2167_v36 = vperm.slane %v5292_v40, 0  ;;  %v2163_v28 = vrot.slane %v5292_v40, 4  ;;  %v2160_v63 = vrot.slane %v5292_v40, 1  ;;  %v2161_v12 = vrot.slane %v5292_v40, 2 }
0x27b5   :  { %v2166_v1 = vrot.slane %v5292_v40, 7  ;;  %v2162_v35 = vrot.slane %v5292_v40, 3  ;;  %v2164_v22 = vrot.slane %v5292_v40, 5  ;;  %v2165_v7 = vrot.slane %v5292_v40, 6 }
0x27b6   :  { %v2183_v34 = vmul.f32 %v2167_v36, %v4901_v46  ;;  %v2171_v15 = vperm.slane %v2163_v28, 0  ;;  %v2168_v17 = vperm.slane %v2160_v63, 0  ;;  %v2169_v49 = vperm.slane %v2161_v12, 0 }
0x27b7   :  { %v2174_v62 = vperm.slane %v2166_v1, 0  ;;  %v2170_v38 = vperm.slane %v2162_v35, 0  ;;  %v2172_v9 = vperm.slane %v2164_v22, 0  ;;  %v2173_v31 = vperm.slane %v2165_v7, 0 }
0x27b8   :  { %2199 = vrot.lane.b32.xlu2 %v2183_v34, %s4332_s30  ;;  %v2187_v23 = vmul.f32 %v2171_v15, %v4921_v5  ;;  %v2184_v16 = vmul.f32 %v2168_v17, %v4909_v55  ;;  %v2185_v30 = vmul.f32 %v2169_v49, %v4905_v11 }
0x27b9   :  { %v2190_v41 = vmul.f32 %v2174_v62, %v4929_v59  ;;  %v2186_v39 = vmul.f32 %v2170_v38, %v4913_v56  ;;  %v2188_v43 = vmul.f32 %v2172_v9, %v4917_v52  ;;  %v2189_v45 = vmul.f32 %v2173_v31, %v4925_v58 }
0x27ba   :  { %2207 = vrot.lane.b32.xlu1 %v2187_v23, %s4332_s30  ;;  %2201 = vrot.lane.b32.xlu0 %v2184_v16, %s4332_s30 }
0x27c0   :  { %2203 = vrot.lane.b32.xlu2 %v2185_v30, %s4332_s30 }
0x27c2   :  { %2213 = vrot.lane.b32.xlu1 %v2190_v41, %s4332_s30  ;;  %2205 = vrot.lane.b32.xlu0 %v2186_v39, %s4332_s30 }
0x27c8   :  { %2209 = vrot.lane.b32.xlu2 %v2188_v43, %s4332_s30 }
0x27ca   :  { %2211 = vrot.lane.b32.xlu0 %v2189_v45, %s4332_s30 }
0x2812   :  { %v2200_v32 = vpop.permute.xlu2 %2199 }
0x2813   :  { %v2223_v47 = vsel %vm6058_vm4, %v2200_v32, 0.0  ;;  %vm6071_vm4 = vcmask 64512  }
0x2814   :  { %2224 = vadd.xlane.f32.xlu2 %v2223_v47 }
0x281a   :  { %v2204_v8 = vpop.permute.xlu2 %2203 }
0x281b   :  { %v2229_v33 = vsel %vm6063_vm5, %v2204_v8, 0.0  ;;  %vm6072_vm5 = vmmov %vm6070_vm0 }
0x281c   :  { %2230 = vadd.xlane.f32.xlu1 %v2229_v33 }
0x2822   :  { %v2210_v48 = vpop.permute.xlu2 %2209 }
0x2823   :  { %v2238_v42 = vsel %vm6064_vm2, %v2210_v48, 0.0  ;;  %vm6073_vm2 = vmmov %vm6071_vm4 }
0x2824   :  { %2239 = vadd.xlane.f32.xlu1 %v2238_v42 }
0x282c   :  { %v2202_v50 = vpop.permute.xlu0 %2201  ;;  %v2208_v53 = vpop.permute.xlu1 %2207 }
0x282d   :  { %v2226_v51 = vsel %vm6065_vm7, %v2202_v50, 0.0  ;;  %v2235_v60 = vsel %vm6066_vm8, %v2208_v53, 0.0 }
0x282e   :  { %2227 = vadd.xlane.f32.xlu0 %v2226_v51 }
0x2834   :  { %v2206_v54 = vpop.permute.xlu0 %2205  ;;  %v2214_v20 = vpop.permute.xlu1 %2213 }
0x2835   :  { %v2232_v0 = vsel %vm6067_vm9, %v2206_v54, 0.0  ;;  %v2244_v25 = vsel %vm6068_vm1, %v2214_v20, 0.0 }
0x2836   :  { %2236 = vadd.xlane.f32.xlu0 %v2235_v60  ;;  %2233 = vadd.xlane.f32.xlu2 %v2232_v0 }
0x283c   :  { %v2212_v61 = vpop.permute.xlu0 %2211 }
0x283d   :  { %v2241_v19 = vsel %vm6069_vm3, %v2212_v61, 0.0 }
0x283e   :  { %2245 = vadd.xlane.f32.xlu0 %v2244_v25  ;;  %2242 = vadd.xlane.f32.xlu2 %v2241_v19 }
0x2887   :  { %v2225_v2 = vpop.xlane.xlu2 %2224 }
0x2888   :  { %v2255_v14 = vperm.slane %v2225_v2, %v4980_v26 }
0x288f   :  { %v2231_v24 = vpop.xlane.xlu1 %2230 }
0x2890   :  { %v2257_v18 = vperm.slane %v2231_v24, %v4980_v26 }
0x2897   :  { %v2240_v28 = vpop.xlane.xlu1 %2239 }
0x2898   :  { %v2260_v34 = vperm.slane %v2240_v28, %v4980_v26 }
0x28a1   :  { %v2228_v27 = vpop.xlane.xlu0 %2227 }
0x28a2   :  { %v2256_v10 = vperm.slane %v2228_v27, %v4980_v26 }
0x28a4   :  { %v2263_v44 = vsel %vm1644_vm10, %v2256_v10, %v2255_v14 }
0x28a5   :  { %v2264_v57 = vsel %vm1646_vm11, %v2257_v18, %v2263_v44 }
0x28a9   :  { %v2234_v21 = vpop.xlane.xlu2 %2233  ;;  %v2237_v6 = vpop.xlane.xlu0 %2236 }
0x28aa   :  { %v2258_v4 = vperm.slane %v2234_v21, %v4980_v26  ;;  %v2259_v37 = vperm.slane %v2237_v6, %v4980_v26 }
0x28ac   :  { %v2265_v36 = vsel %vm1648_vm12, %v2258_v4, %v2264_v57 }
0x28ad   :  { %v2266_v63 = vsel %vm1650_vm13, %v2259_v37, %v2265_v36 }
0x28ae   :  { %v2267_v16 = vsel %vm1652_vm14, %v2260_v34, %v2266_v63 }
0x28b1   :  { %v2243_v15 = vpop.xlane.xlu2 %2242  ;;  %v2246_v17 = vpop.xlane.xlu0 %2245 }
0x28b2   :  { %v2261_v12 = vperm.slane %v2243_v15, %v4980_v26  ;;  %v2262_v23 = vperm.slane %v2246_v17, %v4980_v26 }
0x28b4   :  { %v2268_v1 = vsel %vm6050_vm15, %v2261_v12, %v2267_v16 }
0x28b5   :  { %v2269_v35 = vsel %vm6070_vm0, %v2262_v23, %v2268_v1 }
0x28b6   :  { %v2271_v49 = vsel %vm6071_vm4, %v2269_v35, -inf }
0x28b7   :  { %2272 = vmax.xlane.f32.xlu1 %v2271_v49 }
0x292a   :  { %v2273_v62 = vpop.xlane.xlu1 %2272 }
0x292b   :  { %v2277_v38 = vperm.slane %v2273_v62, 2  ;;  %v2276_v30 = vperm.slane %v2273_v62, 1  ;;  %v2275_v22 = vperm.slane %v2273_v62, 0  ;;  %v2281_v9 = vperm.slane %v2273_v62, 6 }
0x292c   :  { %v2278_v31 = vperm.slane %v2273_v62, 3  ;;  %v2279_v43 = vperm.slane %v2273_v62, 4  ;;  %v2280_v51 = vperm.slane %v2273_v62, 5  ;;  %v2282_v60 = vperm.slane %v2273_v62, 7 }
0x292d   :  { %v2293_v41 = vsub.f32 %v2231_v24, %v2277_v38  ;;  %v2292_v39 = vsub.f32 %v2228_v27, %v2276_v30  ;;  %v2291_v7 = vsub.f32 %v2225_v2, %v2275_v22  ;;  %v2297_v8 = vsub.f32 %v2243_v15, %v2281_v9 }
0x292e   :  { %v2294_v33 = vsub.f32 %v2234_v21, %v2278_v31  ;;  %v2295_v48 = vsub.f32 %v2237_v6, %v2279_v43  ;;  %v2296_v61 = vsub.f32 %v2240_v28, %v2280_v51  ;;  %v2298_v25 = vsub.f32 %v2246_v17, %v2282_v60 }
0x292f   :  { %v2303_v45 = vmul.f32 1.442695, %v2293_v41  ;;  %v2301_v32 = vmul.f32 1.442695, %v2292_v39  ;;  %v2299_v47 = vmul.f32 1.442695, %v2291_v7 }
0x2930   :  { %v2311_v42 = vmul.f32 1.442695, %v2297_v8  ;;  %v2305_v50 = vmul.f32 1.442695, %v2294_v33  ;;  %v2307_v54 = vmul.f32 1.442695, %v2295_v48 }
0x2931   :  { %4130 = vpow2.f32 %v2303_v45  ;;  %v2309_v19 = vmul.f32 1.442695, %v2296_v61  ;;  %v2313_v27 = vmul.f32 1.442695, %v2298_v25 }
0x2932   :  { %4132 = vpow2.f32 %v2301_v32 }
0x2933   :  { %4134 = vpow2.f32 %v2299_v47 }
0x2934   :  { %4136 = vpow2.f32 %v2311_v42 }
0x2935   :  { %4138 = vpow2.f32 %v2305_v50 }
0x2936   :  { %4140 = vpow2.f32 %v2307_v54 }
0x2937   :  { %v5342_v53 = vpop.eup %4130  ;;  %4142 = vpow2.f32 %v2309_v19 }
0x2938   :  { %v5344_v0 = vpop.eup %4132  ;;  %2330 = vperm.xlu1 %3947, %v5342_v53   ;;  %4144 = vpow2.f32 %v2313_v27 }
0x2939   :  { %v5347_v20 = vpop.eup %4134  ;;  %2327 = vperm.xlu0 %3946, %v5344_v0  }
0x293a   :  { %2324 = vperm.xlu2 %3948, %v5347_v20   ;;  %v5351_v2 = vpop.eup %4136 }
0x293b   :  { %v5353_v24 = vpop.eup %4138 }
0x293c   :  { %v5356_v10 = vpop.eup %4140 }
0x293d   :  { %v5360_v14 = vpop.eup %4142 }
0x293e   :  { %v5362_v44 = vpop.eup %4144 }
0x2940   :  { %2342 = vperm.xlu1 %3947, %v5351_v2  }
0x2941   :  { %2333 = vperm.xlu0 %3946, %v5353_v24  }
0x2942   :  { %2336 = vperm.xlu2 %3948, %v5356_v10  }
0x2949   :  { %2339 = vperm.xlu0 %3946, %v5360_v14  }
0x294a   :  { %2345 = vperm.xlu2 %3948, %v5362_v44  }
0x2994   :  { %v2325_v21 = vpop.permute.xlu2 %2324 }
0x2995   :  { %v2347_v36 = vperm.slane %v2325_v21, %v4980_v26 }
0x299c   :  { %v2337_v4 = vpop.permute.xlu2 %2336 }
0x299d   :  { %v2351_v23 = vperm.slane %v2337_v4, %v4980_v26 }
0x29a4   :  { %v2346_v16 = vpop.permute.xlu2 %2345 }
0x29a5   :  { %v2354_v38 = vperm.slane %v2346_v16, %v4980_v26 }
0x29aa   :  { %v2331_v18 = vpop.permute.xlu1 %2330 }
0x29ab   :  { %v2328_v6 = vpop.permute.xlu0 %2327  ;;  %v2349_v28 = vperm.slane %v2331_v18, %v4980_v26 }
0x29ac   :  { %v2348_v57 = vperm.slane %v2328_v6, %v4980_v26 }
0x29ae   :  { %v2355_v63 = vsel %vm1644_vm10, %v2348_v57, %v2347_v36 }
0x29af   :  { %v2356_v15 = vsel %vm1646_vm11, %v2349_v28, %v2355_v63 }
0x29b2   :  { %v2343_v17 = vpop.permute.xlu1 %2342 }
0x29b3   :  { %v2334_v37 = vpop.permute.xlu0 %2333  ;;  %v2353_v49 = vperm.slane %v2343_v17, %v4980_v26 }
0x29b4   :  { %v2350_v34 = vperm.slane %v2334_v37, %v4980_v26 }
0x29b6   :  { %v2357_v12 = vsel %vm1648_vm12, %v2350_v34, %v2356_v15 }
0x29b7   :  { %v2358_v62 = vsel %vm1650_vm13, %v2351_v23, %v2357_v12 }
0x29bb   :  { %v2340_v1 = vpop.permute.xlu0 %2339 }
0x29bc   :  { %v2352_v35 = vperm.slane %v2340_v1, %v4980_v26 }
0x29be   :  { %v2359_v30 = vsel %vm1652_vm14, %v2352_v35, %v2358_v62 }
0x29bf   :  { %v2360_v22 = vsel %vm6050_vm15, %v2353_v49, %v2359_v30 }
0x29c0   :  { %v2361_v41 = vsel %vm6072_vm5, %v2354_v38, %v2360_v22 }
0x29c1   :  { %v2363_v39 = vsel %vm6073_vm2, %v2361_v41, 0.0 }
0x29c2   :  { %2364 = vadd.xlane.f32.xlu0 %v2363_v39 }
0x2a35   :  { %v2365_v7 = vpop.xlane.xlu0 %2364 }
0x2a36   :  { %v2367_v9 = vperm.slane %v2365_v7, 0  ;;  %v2368_v31 = vperm.slane %v2365_v7, 1  ;;  %v5382_v43 = vperm.slane %v2365_v7, 2  ;;  %v5384_v45 = vperm.slane %v2365_v7, 3 }
0x2a37   :  { %v5386_v32 = vperm.slane %v2365_v7, 4  ;;  %v5388_v47 = vperm.slane %v2365_v7, 5  ;;  %v5394_v50 = vperm.slane %v2365_v7, 7  ;;  %v5396_v60 = vperm.slane %v2365_v7, 6 }
0x2a38   :  { %4146 = vrcp.f32 %v2367_v9  ;;  %v2407_v8 = vand.u32 2147483647, %v2368_v31  ;;  %v2409_v33 = vand.u32 2147483648, %v2368_v31  ;;  %v2392_v48 = vand.u32 2147483647, %v2367_v9 }
0x2a39   :  { %4148 = vrcp.f32 %v2368_v31  ;;  %v2394_v51 = vand.u32 2147483648, %v2367_v9  ;;  %vm2403_vm7 = vweird.f32 %v2368_v31  ;;  %vm2388_vm9 = vweird.f32 %v2367_v9 }
0x2a3a   :  { %4150 = vrcp.f32 %v5382_v43  ;;  %vm5400_vm8 = vcmp.eq.f32.partialorder %v2407_v8, 8.507059e+37  ;;  %v2410_v6 = vor.u32 1.1754944e-38, %v2409_v33  ;;  %vm5406_vm1 = vcmp.eq.f32.partialorder %v2392_v48, 8.507059e+37 }
0x2a3b   :  { %4152 = vrcp.f32 %v5384_v45  ;;  %v2395_v28 = vor.u32 1.1754944e-38, %v2394_v51  ;;  %v2439_v49 = vand.u32 2147483648, %v5384_v45  ;;  %v2424_v38 = vand.u32 2147483648, %v5382_v43 }
0x2a3c   :  { %4154 = vrcp.f32 %v5386_v32 }
0x2a3d   :  { %4156 = vrcp.f32 %v5388_v47  ;;  %v2440_v4 = vor.u32 1.1754944e-38, %v2439_v49 }
0x2a3e   :  { %v4147_v42 = vpop.eup %4146  ;;  %4158 = vrcp.f32 %v5394_v50 }
0x2a3f   :  { %v4149_v54 = vpop.eup %4148  ;;  %v2384_v61 = vmul.f32 %v4147_v42, %v2367_v9  ;;  %vm2389_vm3 = vweird.f32 %v4147_v42  ;;  %4160 = vrcp.f32 %v5396_v60 }
0x2a40   :  { %v5398_v25 = vpop.eup %4150  ;;  %v2399_v19 = vmul.f32 %v4149_v54, %v2368_v31  ;;  %vm2404_vm0 = vweird.f32 %v4149_v54  ;;  %vm2390_vm4 = vmor %vm2388_vm9, %vm2389_vm3  ;;  %vm2433_vm9 = vweird.f32 %v5384_v45 }
0x2a41   :  { %v5404_v21 = vpop.eup %4152  ;;  %v2385_v18 = vsub.f32 1.0, %v2384_v61  ;;  %v2414_v57 = vmul.f32 %v5398_v25, %v5382_v43  ;;  %vm2419_vm5 = vweird.f32 %v5398_v25  ;;  %vm2405_vm2 = vmor %vm2403_vm7, %vm2404_vm0  ;;  %vm2418_vm7 = vweird.f32 %v5382_v43 }
0x2a42   :  { %v5412_v37 = vpop.eup %4154  ;;  %v2400_v36 = vsub.f32 1.0, %v2399_v19  ;;  %v2429_v63 = vmul.f32 %v5404_v21, %v5384_v45  ;;  %vm2434_vm15 = vweird.f32 %v5404_v21 }
0x2a43   :  { %v5417_v34 = vpop.eup %4156  ;;  %v2386_v15 = vmul.f32 %v4147_v42, %v2385_v18  ;;  %v2415_v17 = vsub.f32 1.0, %v2414_v57  ;;  %v2444_v12 = vmul.f32 %v5412_v37, %v5386_v32  ;;  %vm2435_vm3 = vmor %vm2433_vm9, %vm2434_vm15  ;;  %vm2449_vm15 = vweird.f32 %v5412_v37 }
0x2a44   :  { %v2401_v23 = vmul.f32 %v4149_v54, %v2400_v36  ;;  %v2430_v16 = vsub.f32 1.0, %v2429_v63  ;;  %v2459_v1 = vmul.f32 %v5417_v34, %v5388_v47  ;;  %v5433_v8 = vpop.eup %4158  ;;  %v2469_v36 = vand.u32 2147483648, %v5388_v47 }
0x2a45   :  { %v2387_v35 = vadd.f32 %v4147_v42, %v2386_v15  ;;  %v2416_v62 = vmul.f32 %v5398_v25, %v2415_v17  ;;  %v2445_v7 = vsub.f32 1.0, %v2444_v12  ;;  %v2454_v15 = vand.u32 2147483648, %v5386_v32 }
0x2a46   :  { %v2402_v30 = vadd.f32 %v4149_v54, %v2401_v23  ;;  %v2431_v22 = vmul.f32 %v5404_v21, %v2430_v16  ;;  %v2460_v51 = vsub.f32 1.0, %v2459_v1  ;;  %v2452_v23 = vand.u32 2147483647, %v5386_v32 }
0x2a47   :  { %v2391_v41 = vsel %vm2390_vm4, %v4147_v42, %v2387_v35  ;;  %v2417_v39 = vadd.f32 %v5398_v25, %v2416_v62  ;;  %v2422_v42 = vand.u32 2147483647, %v5382_v43  ;;  %v2425_v43 = vor.u32 1.1754944e-38, %v2424_v38 }
0x2a48   :  { %v2406_v33 = vsel %vm2405_vm2, %v4149_v54, %v2402_v30  ;;  %v2396_v48 = vsel %vm5406_vm1, %v2395_v28, %v2391_v41  ;;  %v2432_v9 = vadd.f32 %v5404_v21, %v2431_v22  ;;  %v2437_v54 = vand.u32 2147483647, %v5384_v45  ;;  %vm2420_vm1 = vmor %vm2418_vm7, %vm2419_vm5 }
0x2a49   :  { %v2411_v61 = vsel %vm5400_vm8, %v2410_v6, %v2406_v33  ;;  %v2397_v31 = vmul.f32 %v5347_v20, %v2396_v48  ;;  %v2421_v27 = vsel %vm2420_vm1, %v5398_v25, %v2417_v39  ;;  %v2446_v20 = vmul.f32 %v5412_v37, %v2445_v7  ;;  %v5452_v6 = vpop.eup %4160 }
0x2a4a   :  { %v2412_v19 = vmul.f32 %v5344_v0, %v2411_v61  ;;  %v2436_v0 = vsel %vm2435_vm3, %v5404_v21, %v2432_v9  ;;  %v2461_v18 = vmul.f32 %v5417_v34, %v2460_v51  ;;  %v2489_v45 = vmul.f32 %v5433_v8, %v5394_v50 }
0x2a4b   :  { %2505 = vperm.xlu1 %3947, %v2397_v31   ;;  %vm2423_vm8 = vcmp.eq.f32.partialorder %v2422_v42, 8.507059e+37  ;;  %vm2438_vm0 = vcmp.eq.f32.partialorder %v2437_v54, 8.507059e+37  ;;  %v2447_v28 = vadd.f32 %v5412_v37, %v2446_v20  ;;  %v2474_v21 = vmul.f32 %v5452_v6, %v5396_v60 }
0x2a4c   :  { %2510 = vperm.xlu2 %3948, %v2412_v19   ;;  %v2426_v57 = vsel %vm2423_vm8, %v2425_v43, %v2421_v27  ;;  %v2441_v25 = vsel %vm2438_vm0, %v2440_v4, %v2436_v0  ;;  %v2462_v63 = vadd.f32 %v5417_v34, %v2461_v18  ;;  %vm2464_vm4 = vweird.f32 %v5417_v34 }
0x2a4d   :  { %v2490_v17 = vsub.f32 1.0, %v2489_v45  ;;  %v2427_v12 = vmul.f32 %v5342_v53, %v2426_v57  ;;  %vm2448_vm5 = vweird.f32 %v5386_v32  ;;  %v2475_v16 = vsub.f32 1.0, %v2474_v21 }
0x2a4e   :  { %v2442_v1 = vmul.f32 %v5353_v24, %v2441_v25  ;;  %vm2463_vm2 = vweird.f32 %v5388_v47  ;;  %v2467_v35 = vand.u32 2147483647, %v5388_v47  ;;  %vm2450_vm7 = vmor %vm2448_vm5, %vm2449_vm15  ;;  %v2455_v38 = vor.u32 1.1754944e-38, %v2454_v15 }
0x2a4f   :  { %vm2465_vm9 = vmor %vm2463_vm2, %vm2464_vm4  ;;  %v2451_v49 = vsel %vm2450_vm7, %v5412_v37, %v2447_v28  ;;  %v2476_v62 = vmul.f32 %v5452_v6, %v2475_v16  ;;  %v2491_v32 = vmul.f32 %v5433_v8, %v2490_v17  ;;  %v2470_v30 = vor.u32 1.1754944e-38, %v2469_v36 }
0x2a50   :  { %v2466_v53 = vsel %vm2465_vm9, %v5417_v34, %v2462_v63  ;;  %vm2453_vm1 = vcmp.eq.f32.partialorder %v2452_v23, 8.507059e+37  ;;  %vm2468_vm3 = vcmp.eq.f32.partialorder %v2467_v35, 8.507059e+37  ;;  %vm2479_vm8 = vweird.f32 %v5452_v6 }
0x2a51   :  { %v2456_v24 = vsel %vm2453_vm1, %v2455_v38, %v2451_v49  ;;  %v2471_v22 = vsel %vm2468_vm3, %v2470_v30, %v2466_v53  ;;  %v2477_v47 = vadd.f32 %v5452_v6, %v2476_v62  ;;  %v2492_v41 = vadd.f32 %v5433_v8, %v2491_v32 }
0x2a52   :  { %vm2494_vm0 = vweird.f32 %v5433_v8  ;;  %v2484_v37 = vand.u32 2147483648, %v5396_v60  ;;  %v2457_v34 = vmul.f32 %v5356_v10, %v2456_v24  ;;  %v2499_v39 = vand.u32 2147483648, %v5394_v50 }
0x2a53   :  { %2515 = vperm.xlu1 %3947, %v2427_v12   ;;  %vm2478_vm15 = vweird.f32 %v5396_v60  ;;  %v2482_v7 = vand.u32 2147483647, %v5396_v60  ;;  %v2472_v33 = vmul.f32 %v5360_v14, %v2471_v22  ;;  %vm2493_vm4 = vweird.f32 %v5394_v50 }
0x2a54   :  { %2520 = vperm.xlu2 %3948, %v2442_v1   ;;  %v2497_v48 = vand.u32 2147483647, %v5394_v50  ;;  %vm2480_vm5 = vmor %vm2478_vm15, %vm2479_vm8  ;;  %v2485_v51 = vor.u32 1.1754944e-38, %v2484_v37  ;;  %v2500_v61 = vor.u32 1.1754944e-38, %v2499_v39  ;;  %vm6078_vm1 = vcmask 1046534  }
0x2a55   :  { %vm2495_vm2 = vmor %vm2493_vm4, %vm2494_vm0  ;;  %v2481_v9 = vsel %vm2480_vm5, %v5452_v6, %v2477_v47  ;;  %vm2483_vm7 = vcmp.eq.f32.partialorder %v2482_v7, 8.507059e+37  ;;  %vm6079_vm3 = vcmask 1047559   ;;  %vm6080_vm8 = vcmask 261120  }
0x2a56   :  { %v2496_v10 = vsel %vm2495_vm2, %v5433_v8, %v2492_v41  ;;  %vm2498_vm9 = vcmp.eq.f32.partialorder %v2497_v48, 8.507059e+37  ;;  %v2486_v31 = vsel %vm2483_vm7, %v2485_v51, %v2481_v9  ;;  %vm6081_vm0 = vcmask 523264   ;;  %vm6083_vm4 = vmmov %vm6080_vm8 }
0x2a57   :  { %v2501_v60 = vsel %vm2498_vm9, %v2500_v61, %v2496_v10  ;;  %v2487_v14 = vmul.f32 %v5351_v2, %v2486_v31  ;;  %vm6082_vm15 = vmmov %vm6081_vm0 }
0x2a58   :  { %v2502_v42 = vmul.f32 %v5362_v44, %v2501_v60  ;;  %vm6084_vm5 = vmmov %vm6081_vm0 }
0x2a5b   :  { %2525 = vperm.xlu1 %3947, %v2457_v34  }
0x2a5c   :  { %2530 = vperm.xlu2 %3948, %v2472_v33  }
0x2a63   :  { %2535 = vperm.xlu1 %3947, %v2487_v14  }
0x2a64   :  { %2540 = vperm.xlu2 %3948, %v2502_v42  }
0x2a6c   :  { %2625 = vrot.lane.b32.xlu2 %v5292_v40, %s4327_s18 }
0x2aa6   :  { %v2511_v50 = vpop.permute.xlu2 %2510 }
0x2aa7   :  { %v2544_v20 = vmul.f32 %v2511_v50, %v4909_v55 }
0x2aa9   :  { %v2558_v0 = vsel %vm1940_vm6, %v2544_v20, 0.0 }
0x2aaa   :  { %v2559_v18 = vrot.slane %v2558_v0, 4 }
0x2aac   :  { %v2560_v63 = vadd.f32 %v2559_v18, %v2558_v0 }
0x2aae   :  { %v2521_v19 = vpop.permute.xlu2 %2520  ;;  %v2561_v49 = vrot.slane %v2560_v63, 2 }
0x2aaf   :  { %v2546_v2 = vmul.f32 %v2521_v19, %v4913_v56 }
0x2ab0   :  { %v2562_v41 = vadd.f32 %v2561_v49, %v2560_v63 }
0x2ab1   :  { %v2572_v4 = vsel %vm1940_vm6, %v2546_v2, 0.0 }
0x2ab2   :  { %v2573_v15 = vrot.slane %v2572_v4, 4  ;;  %v2563_v51 = vrot.slane %v2562_v41, 1 }
0x2ab4   :  { %v2574_v62 = vadd.f32 %v2573_v15, %v2572_v4  ;;  %v2564_v20 = vadd.f32 %v2563_v51, %v2562_v41 }
0x2ab6   :  { %v2531_v54 = vpop.permute.xlu2 %2530  ;;  %v2575_v37 = vrot.slane %v2574_v62, 2 }
0x2ab7   :  { %v2548_v57 = vmul.f32 %v2531_v54, %v4917_v52 }
0x2ab8   :  { %v2576_v61 = vadd.f32 %v2575_v37, %v2574_v62 }
0x2ab9   :  { %v2586_v17 = vsel %vm1940_vm6, %v2548_v57, 0.0 }
0x2aba   :  { %v2587_v53 = vrot.slane %v2586_v17, 4 }
0x2abc   :  { %v2588_v34 = vadd.f32 %v2587_v53, %v2586_v17 }
0x2abd   :  { %v2506_v27 = vpop.permute.xlu1 %2505 }
0x2abe   :  { %v2543_v8 = vmul.f32 %v2506_v27, %v4901_v46  ;;  %v2541_v45 = vpop.permute.xlu2 %2540  ;;  %v2589_v31 = vrot.slane %v2588_v34, 2 }
0x2abf   :  { %v2550_v28 = vmul.f32 %v2541_v45, %v4929_v59 }
0x2ac0   :  { %v2551_v6 = vsel %vm1940_vm6, %v2543_v8, 0.0  ;;  %v2590_v0 = vadd.f32 %v2589_v31, %v2588_v34  ;;  %v5529_v34 = vld [vmem:[%s6039_s8] ss:$0 sm:$0xff] }
0x2ac1   :  { %v2552_v44 = vrot.slane %v2551_v6, 4  ;;  %v2600_v16 = vsel %vm1940_vm6, %v2550_v28, 0.0 }
0x2ac2   :  { %v2601_v32 = vrot.slane %v2600_v16, 4  ;;  %v2591_v57 = vrot.slane %v2590_v0, 1 }
0x2ac3   :  { %v2553_v36 = vadd.f32 %v2552_v44, %v2551_v6  ;;  %v2577_v6 = vrot.slane %v2576_v61, 1 }
0x2ac4   :  { %v2602_v7 = vadd.f32 %v2601_v32, %v2600_v16  ;;  %v2592_v15 = vadd.f32 %v2591_v57, %v2590_v0 }
0x2ac5   :  { %v2516_v43 = vpop.permute.xlu1 %2515  ;;  %v2554_v23 = vrot.slane %v2553_v36, 2  ;;  %v2578_v4 = vadd.f32 %v2577_v6, %v2576_v61 }
0x2ac6   :  { %v2545_v40 = vmul.f32 %v2516_v43, %v4905_v11  ;;  %v2603_v42 = vrot.slane %v2602_v7, 2 }
0x2ac7   :  { %v2555_v30 = vadd.f32 %v2554_v23, %v2553_v36 }
0x2ac8   :  { %v2565_v25 = vsel %vm1940_vm6, %v2545_v40, 0.0  ;;  %v2604_v44 = vadd.f32 %v2603_v42, %v2602_v7 }
0x2ac9   :  { %v2566_v21 = vrot.slane %v2565_v25, 4  ;;  %v2556_v33 = vrot.slane %v2555_v30, 1 }
0x2acb   :  { %v2567_v12 = vadd.f32 %v2566_v21, %v2565_v25  ;;  %v2557_v50 = vadd.f32 %v2556_v33, %v2555_v30  ;;  %v2605_v25 = vrot.slane %v2604_v44, 1 }
0x2acd   :  { %v2568_v1 = vrot.slane %v2567_v12, 2  ;;  %v2526_v35 = vpop.permute.xlu1 %2525  ;;  %v2615_v43 = vsel %vm1644_vm10, %v2564_v20, %v2557_v50 }
0x2ace   :  { %v2547_v38 = vmul.f32 %v2526_v35, %v4921_v5  ;;  %v2626_v35 = vpop.permute.xlu2 %2625 }
0x2acf   :  { %v2569_v22 = vadd.f32 %v2568_v1, %v2567_v12  ;;  %v2606_v12 = vadd.f32 %v2605_v25, %v2604_v44 }
0x2ad0   :  { %v2579_v24 = vsel %vm1940_vm6, %v2547_v38, 0.0 }
0x2ad1   :  { %v2580_v47 = vrot.slane %v2579_v24, 4  ;;  %v2570_v48 = vrot.slane %v2569_v22, 1 }
0x2ad3   :  { %v2581_v39 = vadd.f32 %v2580_v47, %v2579_v24  ;;  %v2571_v54 = vadd.f32 %v2570_v48, %v2569_v22 }
0x2ad5   :  { %v2582_v9 = vrot.slane %v2581_v39, 2  ;;  %v2536_v10 = vpop.permute.xlu1 %2535  ;;  %v2616_v18 = vsel %vm1646_vm11, %v2571_v54, %v2615_v43 }
0x2ad6   :  { %v2549_v60 = vmul.f32 %v2536_v10, %v4925_v58  ;;  %v2617_v28 = vsel %vm1648_vm12, %v2578_v4, %v2616_v18 }
0x2ad7   :  { %v2583_v14 = vadd.f32 %v2582_v9, %v2581_v39 }
0x2ad8   :  { %v2593_v19 = vsel %vm1940_vm6, %v2549_v60, 0.0 }
0x2ad9   :  { %v2584_v27 = vrot.slane %v2583_v14, 1  ;;  %v2594_v8 = vrot.slane %v2593_v19, 4 }
0x2adb   :  { %v2595_v2 = vadd.f32 %v2594_v8, %v2593_v19  ;;  %v2585_v45 = vadd.f32 %v2584_v27, %v2583_v14 }
0x2add   :  { %v2596_v40 = vrot.slane %v2595_v2, 2  ;;  %v2618_v63 = vsel %vm1650_vm13, %v2585_v45, %v2617_v28 }
0x2ade   :  { %v2619_v23 = vsel %vm1652_vm14, %v2592_v15, %v2618_v63 }
0x2adf   :  { %v2597_v36 = vadd.f32 %v2596_v40, %v2595_v2 }
0x2ae1   :  { %v2598_v21 = vrot.slane %v2597_v36, 1 }
0x2ae3   :  { %v2599_v17 = vadd.f32 %v2598_v21, %v2597_v36 }
0x2ae5   :  { %v2620_v16 = vsel %vm6078_vm1, %v2599_v17, %v2619_v23 }
0x2ae6   :  { %v2621_v1 = vsel %vm6079_vm3, %v2606_v12, %v2620_v16  ;;  %vm6085_vm3 = vmmov %vm6083_vm4 }
0x2ae7   :  { %2622 = vrot.lane.b32.xlu1 %v2621_v1, %s4332_s30 }
0x2b59   :  { %v2623_v49 = vpop.permute.xlu1 %2622 }
0x2b5a   :  { %v2628_v62 = vsel %vm6080_vm8, %v2623_v49, %v2626_v35  ;;  %vm6086_vm8 = vmmov %vm6085_vm3 }
0x2b5b   :  { %v2629_v53 = vpack.c.bf16 %v2628_v62, %v2628_v62 }
0x2b5d   :  { %3909 = vmatmul.msk.bf16.vlgmr.msra.gmra.mxu0 %vm6081_vm0, %v2629_v53  ;;  %3910 = vmatmul.msk.bf16.vlgmr.msrb.gmra.mxu1 %vm6082_vm15, %v2629_v53  ;;  %vm6087_vm0 = vmmov %vm6085_vm3 }
0x2b5e   :  { %vm6088_vm15 = vmmov %vm6087_vm0 }
0x2bda   :  { %v5521_v38 = vpop.f32.mrf.mxu0  ;;  %v2655_v32 = vpop.f32.mrf.mxu1 }
0x2bdb   :  { %v2656_v30 = vadd.f32 %v2655_v32, %v5279_v3 }
0x2bdd   :  { %v2663_v24 = vsel %vm6083_vm4, %v2656_v30, %v2626_v35  ;;  %vm6089_vm4 = vmmov %vm6087_vm0 }
0x2bde   :  { %v2664_v22 = vpack.c.bf16 %v2663_v24, %v2663_v24 }
0x2be0   :  { %3911 = vmatmul.msk.bf16.vlgmr.msrb.gmra.mxu2 %vm6084_vm5, %v2664_v22  ;;  %vm6090_vm5 = vmmov %vm6087_vm0 }
0x2be2   :  { %v2644_v47 = vpop.f32.mrf.mxu0  ;;  %v2657_v41 = vpop.f32.mrf.mxu1 }
0x2c63   :  { %v2677_v37 = vpop.f32.mrf.mxu2 }
0x2c64   :  { %v2678_v39 = vadd.f32 %v5529_v34, %v2677_v37 }
0x2c66   :  { %4162 = vtanh.f32 %v2678_v39  ;;  %v3912_v48 = vmul.f32 -1.442695, %v2678_v39 }
0x2c68   :  { %4164 = vpow2.f32 %v3912_v48 }
0x2c6b   :  { %v2679_v7 = vpop.f32.mrf.mxu2 }
0x2c6c   :  { %v4163_v33 = vpop.eup %4162 }
0x2c6d   :  { %2703 = vrot.lane.b32.xlu1 %v4163_v33, %s4327_s18 }
0x2c6e   :  { %v4165_v9 = vpop.eup %4164 }
0x2c6f   :  { %v2684_v10 = vadd.f32 1.0, %v4165_v9 }
0x2c71   :  { %4166 = vrcp.f32 %v2684_v10  ;;  %v2696_v42 = vand.u32 2147483648, %v2684_v10  ;;  %vm2690_vm7 = vweird.f32 %v2684_v10  ;;  %v2694_v50 = vand.u32 2147483647, %v2684_v10 }
0x2c73   :  { %v2697_v54 = vor.u32 1.1754944e-38, %v2696_v42  ;;  %vm2695_vm1 = vcmp.eq.f32.partialorder %v2694_v50, 8.507059e+37 }
0x2c77   :  { %v4167_v51 = vpop.eup %4166 }
0x2c78   :  { %v2686_v61 = vmul.f32 %v4167_v51, %v2684_v10  ;;  %vm2691_vm2 = vweird.f32 %v4167_v51 }
0x2c79   :  { %vm2692_vm9 = vmor %vm2690_vm7, %vm2691_vm2 }
0x2c7a   :  { %v2687_v31 = vsub.f32 1.0, %v2686_v61  ;;  %vm6091_vm2 = vmmov %vm6087_vm0 }
0x2c7b   :  { %vm6092_vm7 = vmmov %vm6087_vm0 }
0x2c7c   :  { %v2688_v60 = vmul.f32 %v4167_v51, %v2687_v31 }
0x2c7e   :  { %v2689_v14 = vadd.f32 %v4167_v51, %v2688_v60 }
0x2c80   :  { %v2693_v19 = vsel %vm2692_vm9, %v4167_v51, %v2689_v14  ;;  %vm6093_vm9 = vcmask 1046534  }
0x2c81   :  { %v2698_v8 = vsel %vm2695_vm1, %v2697_v54, %v2693_v19  ;;  %vm6094_vm1 = vcmask 1047559  }
0x2c82   :  { %v2701_v6 = vmul.f32 %v2698_v8, %v5288_v29 }
0x2cdf   :  { %v2704_v27 = vpop.permute.xlu1 %2703 }
0x2ce0   :  { %v2706_v20 = vmul.f32 %v2704_v27, %v2698_v8 }
0x2ce2   :  { %2708 = vrot.lane.b32.xlu0 %v2706_v20, %s4332_s30 }
0x2d54   :  { %v2709_v0 = vpop.permute.xlu0 %2708 }
0x2d55   :  { %v5535_v2 = vadd.f32 %v2709_v0, %v2701_v6 }
0x2d57   :  { %4168 = vtanh.f32 %v5535_v2 }
0x2d5d   :  { %v4169_v44 = vpop.eup %4168 }
0x2d5e   :  { %2714 = vrot.lane.b32.xlu2 %v4169_v44, %s4327_s18 }
0x2db8   :  { %v2715_v43 = vpop.permute.xlu2 %2714 }
0x2db9   :  { %v5539_v18 = vmul.f32 %v2715_v43, %v2698_v8 }
0x2dbb   :  { %v2726_v45 = vperm.slane %v5539_v18, 0  ;;  %v2722_v40 = vrot.slane %v5539_v18, 4  ;;  %v2719_v4 = vrot.slane %v5539_v18, 1  ;;  %v2720_v25 = vrot.slane %v5539_v18, 2 }
0x2dbc   :  { %v2725_v63 = vrot.slane %v5539_v18, 7  ;;  %v2721_v15 = vrot.slane %v5539_v18, 3  ;;  %v2723_v1 = vrot.slane %v5539_v18, 5  ;;  %v2724_v62 = vrot.slane %v5539_v18, 6 }
0x2dbd   :  { %v2742_v57 = vmul.f32 %v2726_v45, %v4901_v46  ;;  %v2730_v29 = vperm.slane %v2722_v40, 0  ;;  %v2727_v36 = vperm.slane %v2719_v4, 0  ;;  %v2728_v17 = vperm.slane %v2720_v25, 0 }
0x2dbe   :  { %v2733_v12 = vperm.slane %v2725_v63, 0  ;;  %v2729_v23 = vperm.slane %v2721_v15, 0  ;;  %v2731_v53 = vperm.slane %v2723_v1, 0  ;;  %v2732_v32 = vperm.slane %v2724_v62, 0 }
0x2dbf   :  { %2758 = vrot.lane.b32.xlu1 %v2742_v57, %s4332_s30  ;;  %v2746_v28 = vmul.f32 %v2730_v29, %v4921_v5  ;;  %v2743_v21 = vmul.f32 %v2727_v36, %v4909_v55  ;;  %v2744_v16 = vmul.f32 %v2728_v17, %v4905_v11 }
0x2dc0   :  { %v2749_v35 = vmul.f32 %v2733_v12, %v4929_v59  ;;  %v2745_v49 = vmul.f32 %v2729_v23, %v4913_v56  ;;  %v2747_v30 = vmul.f32 %v2731_v53, %v4917_v52  ;;  %v2748_v24 = vmul.f32 %v2732_v32, %v4925_v58 }
0x2dc1   :  { %2766 = vrot.lane.b32.xlu0 %v2746_v28, %s4332_s30  ;;  %2760 = vrot.lane.b32.xlu2 %v2743_v21, %s4332_s30 }
0x2dc7   :  { %2762 = vrot.lane.b32.xlu1 %v2744_v16, %s4332_s30 }
0x2dc9   :  { %2772 = vrot.lane.b32.xlu0 %v2749_v35, %s4332_s30  ;;  %2764 = vrot.lane.b32.xlu2 %v2745_v49, %s4332_s30 }
0x2dcf   :  { %2768 = vrot.lane.b32.xlu1 %v2747_v30, %s4332_s30 }
0x2dd1   :  { %2770 = vrot.lane.b32.xlu2 %v2748_v24, %s4332_s30 }
0x2e1b   :  { %v2761_v22 = vpop.permute.xlu2 %2760 }
0x2e1c   :  { %v2785_v47 = vsel %vm6085_vm3, %v2761_v22, 0.0  ;;  %vm6095_vm3 = vcmask 64512  }
0x2e1d   :  { %2786 = vadd.xlane.f32.xlu2 %v2785_v47 }
0x2e23   :  { %v2765_v33 = vpop.permute.xlu2 %2764 }
0x2e24   :  { %v2791_v9 = vsel %vm6088_vm15, %v2765_v33, 0.0  ;;  %vm6098_vm15 = vmmov %vm6095_vm3 }
0x2e2b   :  { %v2771_v31 = vpop.permute.xlu2 %2770 }
0x2e2c   :  { %v2800_v14 = vsel %vm6091_vm2, %v2771_v31, 0.0 }
0x2e31   :  { %v2759_v41 = vpop.permute.xlu1 %2758 }
0x2e32   :  { %v2782_v37 = vsel %vm6086_vm8, %v2759_v41, 0.0  ;;  %vm6096_vm8 = vmmov %vm6093_vm9 }
0x2e33   :  { %v2767_v39 = vpop.permute.xlu0 %2766  ;;  %2783 = vadd.xlane.f32.xlu1 %v2782_v37 }
0x2e34   :  { %v2794_v7 = vsel %vm6087_vm0, %v2767_v39, 0.0  ;;  %vm6097_vm0 = vmmov %vm6094_vm1 }
0x2e35   :  { %2795 = vadd.xlane.f32.xlu2 %v2794_v7 }
0x2e39   :  { %v2763_v48 = vpop.permute.xlu1 %2762 }
0x2e3a   :  { %v2788_v10 = vsel %vm6089_vm4, %v2763_v48, 0.0 }
0x2e3b   :  { %v2773_v51 = vpop.permute.xlu0 %2772  ;;  %2789 = vadd.xlane.f32.xlu0 %v2788_v10  ;;  %2792 = vadd.xlane.f32.xlu1 %v2791_v9 }
0x2e3c   :  { %v2803_v61 = vsel %vm6090_vm5, %v2773_v51, 0.0 }
0x2e3d   :  { %2804 = vadd.xlane.f32.xlu2 %v2803_v61 }
0x2e41   :  { %v2769_v60 = vpop.permute.xlu1 %2768 }
0x2e42   :  { %v2797_v42 = vsel %vm6092_vm7, %v2769_v60, 0.0 }
0x2e43   :  { %2798 = vadd.xlane.f32.xlu0 %v2797_v42  ;;  %2801 = vadd.xlane.f32.xlu1 %v2800_v14 }
0x2e90   :  { %v2787_v50 = vpop.xlane.xlu2 %2786 }
0x2e91   :  { %v2815_v6 = vperm.slane %v2787_v50, %v4980_v26 }
0x2ea6   :  { %v2784_v19 = vpop.xlane.xlu1 %2783 }
0x2ea7   :  { %v2814_v27 = vperm.slane %v2784_v19, %v4980_v26 }
0x2ea8   :  { %v2796_v54 = vpop.xlane.xlu2 %2795 }
0x2ea9   :  { %v2822_v44 = vsel %vm1644_vm10, %v2815_v6, %v2814_v27  ;;  %v2818_v57 = vperm.slane %v2796_v54, %v4980_v26 }
0x2eae   :  { %v2790_v8 = vpop.xlane.xlu0 %2789  ;;  %v2793_v20 = vpop.xlane.xlu1 %2792 }
0x2eaf   :  { %v2816_v0 = vperm.slane %v2790_v8, %v4980_v26  ;;  %v2817_v43 = vperm.slane %v2793_v20, %v4980_v26 }
0x2eb0   :  { %v2805_v4 = vpop.xlane.xlu2 %2804 }
0x2eb1   :  { %v2823_v45 = vsel %vm1646_vm11, %v2816_v0, %v2822_v44  ;;  %v2821_v63 = vperm.slane %v2805_v4, %v4980_v26 }
0x2eb2   :  { %v2824_v40 = vsel %vm1648_vm12, %v2817_v43, %v2823_v45 }
0x2eb3   :  { %v2825_v21 = vsel %vm1650_vm13, %v2818_v57, %v2824_v40 }
0x2eb6   :  { %v2799_v29 = vpop.xlane.xlu0 %2798  ;;  %v2802_v36 = vpop.xlane.xlu1 %2801 }
0x2eb7   :  { %v2819_v25 = vperm.slane %v2799_v29, %v4980_v26  ;;  %v2820_v28 = vperm.slane %v2802_v36, %v4980_v26 }
0x2eb9   :  { %v2826_v15 = vsel %vm1652_vm14, %v2819_v25, %v2825_v21 }
0x2eba   :  { %v2827_v17 = vsel %vm6093_vm9, %v2820_v28, %v2826_v15 }
0x2ebb   :  { %v2828_v12 = vsel %vm6094_vm1, %v2821_v63, %v2827_v17 }
0x2ebc   :  { %v2830_v23 = vsel %vm6095_vm3, %v2828_v12, -inf }
0x2ebd   :  { %2831 = vmax.xlane.f32.xlu0 %v2830_v23 }
0x2f30   :  { %v2832_v16 = vpop.xlane.xlu0 %2831 }
0x2f31   :  { %v2834_v1 = vperm.slane %v2832_v16, 0  ;;  %v2835_v35 = vperm.slane %v2832_v16, 1  ;;  %v2836_v49 = vperm.slane %v2832_v16, 2  ;;  %v2839_v62 = vperm.slane %v2832_v16, 5 }
0x2f32   :  { %v2837_v24 = vperm.slane %v2832_v16, 3  ;;  %v2838_v22 = vperm.slane %v2832_v16, 4  ;;  %v2840_v9 = vperm.slane %v2832_v16, 6  ;;  %v2841_v61 = vperm.slane %v2832_v16, 7 }
0x2f33   :  { %v2850_v53 = vsub.f32 %v2784_v19, %v2834_v1  ;;  %v2851_v32 = vsub.f32 %v2787_v50, %v2835_v35  ;;  %v2852_v30 = vsub.f32 %v2790_v8, %v2836_v49  ;;  %v2855_v39 = vsub.f32 %v2799_v29, %v2839_v62 }
0x2f34   :  { %v2853_v7 = vsub.f32 %v2793_v20, %v2837_v24  ;;  %v2854_v33 = vsub.f32 %v2796_v54, %v2838_v22  ;;  %v2856_v42 = vsub.f32 %v2802_v36, %v2840_v9  ;;  %v2857_v50 = vsub.f32 %v2805_v4, %v2841_v61 }
0x2f35   :  { %v2858_v47 = vmul.f32 1.442695, %v2850_v53  ;;  %v2860_v41 = vmul.f32 1.442695, %v2851_v32  ;;  %v2862_v37 = vmul.f32 1.442695, %v2852_v30 }
0x2f36   :  { %v2868_v48 = vmul.f32 1.442695, %v2855_v39  ;;  %v2864_v10 = vmul.f32 1.442695, %v2853_v7  ;;  %v2866_v31 = vmul.f32 1.442695, %v2854_v33 }
0x2f37   :  { %4170 = vpow2.f32 %v2858_v47  ;;  %v2870_v19 = vmul.f32 1.442695, %v2856_v42  ;;  %v2872_v27 = vmul.f32 1.442695, %v2857_v50 }
0x2f38   :  { %4172 = vpow2.f32 %v2860_v41 }
0x2f39   :  { %4174 = vpow2.f32 %v2862_v37 }
0x2f3a   :  { %4176 = vpow2.f32 %v2868_v48 }
0x2f3b   :  { %4178 = vpow2.f32 %v2864_v10 }
0x2f3c   :  { %4180 = vpow2.f32 %v2866_v31 }
0x2f3d   :  { %v5589_v51 = vpop.eup %4170  ;;  %4182 = vpow2.f32 %v2870_v19 }
0x2f3e   :  { %v5591_v60 = vpop.eup %4172  ;;  %2883 = vperm.xlu1 %3947, %v5589_v51   ;;  %4184 = vpow2.f32 %v2872_v27 }
0x2f3f   :  { %v5594_v14 = vpop.eup %4174  ;;  %2886 = vperm.xlu2 %3948, %v5591_v60  }
0x2f40   :  { %2889 = vperm.xlu0 %3946, %v5594_v14   ;;  %v5598_v54 = vpop.eup %4176 }
0x2f41   :  { %v5600_v8 = vpop.eup %4178 }
0x2f42   :  { %v5603_v20 = vpop.eup %4180 }
0x2f43   :  { %v5607_v6 = vpop.eup %4182 }
0x2f44   :  { %v5609_v0 = vpop.eup %4184 }
0x2f46   :  { %2898 = vperm.xlu1 %3947, %v5598_v54  }
0x2f47   :  { %2892 = vperm.xlu2 %3948, %v5600_v8  }
0x2f48   :  { %2895 = vperm.xlu0 %3946, %v5603_v20  }
0x2f4f   :  { %2901 = vperm.xlu2 %3948, %v5607_v6  }
0x2f50   :  { %2904 = vperm.xlu0 %3946, %v5609_v0  }
0x2f99   :  { %v2887_v44 = vpop.permute.xlu2 %2886 }
0x2f9a   :  { %v2907_v4 = vperm.slane %v2887_v44, %v4980_v26 }
0x2fa1   :  { %v2893_v57 = vpop.permute.xlu2 %2892 }
0x2fa2   :  { %v2909_v63 = vperm.slane %v2893_v57, %v4980_v26 }
0x2fa9   :  { %v2902_v16 = vpop.permute.xlu2 %2901 }
0x2faa   :  { %v2912_v35 = vperm.slane %v2902_v16, %v4980_v26 }
0x2fb0   :  { %v2884_v43 = vpop.permute.xlu1 %2883 }
0x2fb1   :  { %v2906_v40 = vperm.slane %v2884_v43, %v4980_v26 }
0x2fb2   :  { %v2890_v45 = vpop.permute.xlu0 %2889 }
0x2fb3   :  { %v2908_v29 = vperm.slane %v2890_v45, %v4980_v26  ;;  %v2914_v36 = vsel %vm1644_vm10, %v2907_v4, %v2906_v40 }
0x2fb5   :  { %v2915_v25 = vsel %vm1646_vm11, %v2908_v29, %v2914_v36 }
0x2fb6   :  { %v2916_v17 = vsel %vm1648_vm12, %v2909_v63, %v2915_v25 }
0x2fb8   :  { %v2899_v21 = vpop.permute.xlu1 %2898 }
0x2fb9   :  { %v2911_v12 = vperm.slane %v2899_v21, %v4980_v26 }
0x2fba   :  { %v2896_v28 = vpop.permute.xlu0 %2895 }
0x2fbb   :  { %v2910_v15 = vperm.slane %v2896_v28, %v4980_v26 }
0x2fbd   :  { %v2917_v23 = vsel %vm1650_vm13, %v2910_v15, %v2916_v17 }
0x2fbe   :  { %v2918_v1 = vsel %vm1652_vm14, %v2911_v12, %v2917_v23 }
0x2fbf   :  { %v2919_v53 = vsel %vm6096_vm8, %v2912_v35, %v2918_v1 }
0x2fc2   :  { %v2905_v49 = vpop.permute.xlu0 %2904 }
0x2fc3   :  { %v2913_v62 = vperm.slane %v2905_v49, %v4980_v26 }
0x2fc5   :  { %v2920_v32 = vsel %vm6097_vm0, %v2913_v62, %v2919_v53 }
0x2fc6   :  { %v2922_v30 = vsel %vm6098_vm15, %v2920_v32, 0.0 }
0x2fc7   :  { %2923 = vadd.xlane.f32.xlu1 %v2922_v30 }
0x303a   :  { %v2924_v24 = vpop.xlane.xlu1 %2923 }
0x303b   :  { %v2926_v22 = vperm.slane %v2924_v24, 0  ;;  %v2927_v47 = vperm.slane %v2924_v24, 1  ;;  %v5629_v41 = vperm.slane %v2924_v24, 2  ;;  %v5631_v37 = vperm.slane %v2924_v24, 3 }
0x303c   :  { %v5633_v39 = vperm.slane %v2924_v24, 4  ;;  %v5635_v7 = vperm.slane %v2924_v24, 5  ;;  %v5641_v61 = vperm.slane %v2924_v24, 7  ;;  %v5643_v50 = vperm.slane %v2924_v24, 6 }
0x303d   :  { %4186 = vrcp.f32 %v2926_v22  ;;  %v2966_v33 = vand.u32 2147483647, %v2927_v47  ;;  %v2968_v48 = vand.u32 2147483648, %v2927_v47  ;;  %v2951_v9 = vand.u32 2147483647, %v2926_v22 }
0x303e   :  { %4188 = vrcp.f32 %v2927_v47  ;;  %v2953_v31 = vand.u32 2147483648, %v2926_v22  ;;  %vm2962_vm4 = vweird.f32 %v2927_v47  ;;  %vm2947_vm2 = vweird.f32 %v2926_v22 }
0x303f   :  { %4190 = vrcp.f32 %v5629_v41  ;;  %vm5647_vm5 = vcmp.eq.f32.partialorder %v2966_v33, 8.507059e+37  ;;  %v2969_v40 = vor.u32 1.1754944e-38, %v2968_v48  ;;  %vm5653_vm7 = vcmp.eq.f32.partialorder %v2951_v9, 8.507059e+37 }
0x3040   :  { %4192 = vrcp.f32 %v5631_v37  ;;  %v2954_v28 = vor.u32 1.1754944e-38, %v2953_v31  ;;  %v2998_v49 = vand.u32 2147483648, %v5631_v37  ;;  %v2983_v53 = vand.u32 2147483648, %v5629_v41 }
0x3041   :  { %4194 = vrcp.f32 %v5633_v39 }
0x3042   :  { %4196 = vrcp.f32 %v5635_v7 }
0x3043   :  { %v4187_v10 = vpop.eup %4186  ;;  %4198 = vrcp.f32 %v5641_v61 }
0x3044   :  { %v4189_v42 = vpop.eup %4188  ;;  %v2943_v19 = vmul.f32 %v4187_v10, %v2926_v22  ;;  %vm2948_vm9 = vweird.f32 %v4187_v10  ;;  %4200 = vrcp.f32 %v5643_v50 }
0x3045   :  { %v5645_v27 = vpop.eup %4190  ;;  %v2958_v44 = vmul.f32 %v4189_v42, %v2927_v47  ;;  %vm2963_vm1 = vweird.f32 %v4189_v42  ;;  %vm2949_vm3 = vmor %vm2947_vm2, %vm2948_vm9  ;;  %vm2992_vm2 = vweird.f32 %v5631_v37 }
0x3046   :  { %v5651_v45 = vpop.eup %4192  ;;  %v2944_v4 = vsub.f32 1.0, %v2943_v19  ;;  %v2973_v29 = vmul.f32 %v5645_v27, %v5629_v41  ;;  %vm2978_vm8 = vweird.f32 %v5645_v27  ;;  %vm2964_vm0 = vmor %vm2962_vm4, %vm2963_vm1  ;;  %vm2977_vm4 = vweird.f32 %v5629_v41 }
0x3047   :  { %v5659_v36 = vpop.eup %4194  ;;  %v2959_v25 = vsub.f32 1.0, %v2958_v44  ;;  %v2988_v21 = vmul.f32 %v5651_v45, %v5631_v37  ;;  %vm2993_vm15 = vweird.f32 %v5651_v45 }
0x3048   :  { %v5664_v63 = vpop.eup %4196  ;;  %v2945_v15 = vmul.f32 %v4187_v10, %v2944_v4  ;;  %v2974_v17 = vsub.f32 1.0, %v2973_v29  ;;  %v3003_v12 = vmul.f32 %v5659_v36, %v5633_v39  ;;  %vm2994_vm9 = vmor %vm2992_vm2, %vm2993_vm15  ;;  %vm3022_vm15 = vweird.f32 %v5635_v7 }
0x3049   :  { %v2960_v23 = vmul.f32 %v4189_v42, %v2959_v25  ;;  %v2989_v16 = vsub.f32 1.0, %v2988_v21  ;;  %v3018_v1 = vmul.f32 %v5664_v63, %v5635_v7  ;;  %v5680_v9 = vpop.eup %4198  ;;  %v2999_v25 = vor.u32 1.1754944e-38, %v2998_v49 }
0x304a   :  { %v2946_v35 = vadd.f32 %v4187_v10, %v2945_v15  ;;  %v2975_v62 = vmul.f32 %v5645_v27, %v2974_v17  ;;  %v3004_v48 = vsub.f32 1.0, %v3003_v12  ;;  %v3028_v21 = vand.u32 2147483648, %v5635_v7 }
0x304b   :  { %v2961_v32 = vadd.f32 %v4189_v42, %v2960_v23  ;;  %v2990_v30 = vmul.f32 %v5651_v45, %v2989_v16  ;;  %v3019_v44 = vsub.f32 1.0, %v3018_v1  ;;  %v3013_v12 = vand.u32 2147483648, %v5633_v39 }
0x304c   :  { %v2950_v24 = vsel %vm2949_vm3, %v4187_v10, %v2946_v35  ;;  %v2976_v33 = vadd.f32 %v5645_v27, %v2975_v62  ;;  %v2981_v10 = vand.u32 2147483647, %v5629_v41  ;;  %v2984_v41 = vor.u32 1.1754944e-38, %v2983_v53 }
0x304d   :  { %v2965_v31 = vsel %vm2964_vm0, %v4189_v42, %v2961_v32  ;;  %v2955_v19 = vsel %vm5653_vm7, %v2954_v28, %v2950_v24  ;;  %v2991_v22 = vadd.f32 %v5651_v45, %v2990_v30  ;;  %v2996_v42 = vand.u32 2147483647, %v5631_v37  ;;  %vm2979_vm7 = vmor %vm2977_vm4, %vm2978_vm8 }
0x304e   :  { %v2970_v4 = vsel %vm5647_vm5, %v2969_v40, %v2965_v31  ;;  %v2956_v47 = vmul.f32 %v5589_v51, %v2955_v19  ;;  %v2980_v43 = vsel %vm2979_vm7, %v5645_v27, %v2976_v33  ;;  %v3005_v51 = vmul.f32 %v5659_v36, %v3004_v48  ;;  %v5699_v40 = vpop.eup %4200 }
0x304f   :  { %v2971_v29 = vmul.f32 %v5591_v60, %v2970_v4  ;;  %v2995_v60 = vsel %vm2994_vm9, %v5651_v45, %v2991_v22  ;;  %v3020_v57 = vmul.f32 %v5664_v63, %v3019_v44  ;;  %v3048_v37 = vmul.f32 %v5680_v9, %v5641_v61 }
0x3050   :  { %3064 = vperm.xlu2 %3948, %v2956_v47   ;;  %vm2982_vm5 = vcmp.eq.f32.partialorder %v2981_v10, 8.507059e+37  ;;  %vm2997_vm1 = vcmp.eq.f32.partialorder %v2996_v42, 8.507059e+37  ;;  %v3006_v15 = vadd.f32 %v5659_v36, %v3005_v51  ;;  %vm3008_vm3 = vweird.f32 %v5659_v36 }
0x3051   :  { %3069 = vperm.xlu0 %3946, %v2971_v29   ;;  %v2985_v28 = vsel %vm2982_vm5, %v2984_v41, %v2980_v43  ;;  %v3000_v27 = vsel %vm2997_vm1, %v2999_v25, %v2995_v60  ;;  %v3033_v45 = vmul.f32 %v5699_v40, %v5643_v50  ;;  %v3021_v17 = vadd.f32 %v5664_v63, %v3020_v57 }
0x3052   :  { %vm3023_vm8 = vweird.f32 %v5664_v63  ;;  %v3049_v23 = vsub.f32 1.0, %v3048_v37  ;;  %v2986_v16 = vmul.f32 %v5594_v14, %v2985_v28  ;;  %vm3007_vm0 = vweird.f32 %v5633_v39 }
0x3053   :  { %v3011_v1 = vand.u32 2147483647, %v5633_v39  ;;  %v3034_v35 = vsub.f32 1.0, %v3033_v45  ;;  %v3001_v49 = vmul.f32 %v5600_v8, %v3000_v27  ;;  %v3026_v62 = vand.u32 2147483647, %v5635_v7  ;;  %vm3009_vm4 = vmor %vm3007_vm0, %vm3008_vm3 }
0x3054   :  { %vm3024_vm2 = vmor %vm3022_vm15, %vm3023_vm8  ;;  %v3010_v53 = vsel %vm3009_vm4, %v5659_v36, %v3006_v15  ;;  %v3014_v30 = vor.u32 1.1754944e-38, %v3013_v12  ;;  %v3050_v39 = vmul.f32 %v5680_v9, %v3049_v23  ;;  %v3029_v24 = vor.u32 1.1754944e-38, %v3028_v21 }
0x3055   :  { %v3035_v32 = vmul.f32 %v5699_v40, %v3034_v35  ;;  %v3025_v14 = vsel %vm3024_vm2, %v5664_v63, %v3021_v17  ;;  %vm3012_vm7 = vcmp.eq.f32.partialorder %v3011_v1, 8.507059e+37  ;;  %vm3027_vm9 = vcmp.eq.f32.partialorder %v3026_v62, 8.507059e+37 }
0x3056   :  { %v3015_v8 = vsel %vm3012_vm7, %v3014_v30, %v3010_v53  ;;  %v3030_v33 = vsel %vm3027_vm9, %v3029_v24, %v3025_v14  ;;  %vm3038_vm5 = vweird.f32 %v5699_v40  ;;  %v3051_v48 = vadd.f32 %v5680_v9, %v3050_v39 }
0x3057   :  { %v3036_v7 = vadd.f32 %v5699_v40, %v3035_v32  ;;  %vm3053_vm1 = vweird.f32 %v5680_v9  ;;  %v3043_v36 = vand.u32 2147483648, %v5643_v50  ;;  %v3016_v63 = vmul.f32 %v5603_v20, %v3015_v8 }
0x3058   :  { %3074 = vperm.xlu2 %3948, %v2986_v16   ;;  %v3058_v31 = vand.u32 2147483648, %v5641_v61  ;;  %vm3037_vm3 = vweird.f32 %v5643_v50  ;;  %v3041_v19 = vand.u32 2147483647, %v5643_v50  ;;  %v3031_v22 = vmul.f32 %v5598_v54, %v3030_v33 }
0x3059   :  { %3079 = vperm.xlu0 %3946, %v3001_v49   ;;  %vm3052_vm8 = vweird.f32 %v5641_v61  ;;  %v3056_v44 = vand.u32 2147483647, %v5641_v61  ;;  %vm3039_vm0 = vmor %vm3037_vm3, %vm3038_vm5  ;;  %v3044_v47 = vor.u32 1.1754944e-38, %v3043_v36  ;;  %vm6103_vm7 = vcmask 1046534  }
0x305a   :  { %vm3054_vm15 = vmor %vm3052_vm8, %vm3053_vm1  ;;  %v3040_v4 = vsel %vm3039_vm0, %v5699_v40, %v3036_v7  ;;  %v3059_v10 = vor.u32 1.1754944e-38, %v3058_v31  ;;  %vm3042_vm4 = vcmp.eq.f32.partialorder %v3041_v19, 8.507059e+37  ;;  %vm6104_vm9 = vcmask 1047559  }
0x305b   :  { %v3055_v20 = vsel %vm3054_vm15, %v5680_v9, %v3051_v48  ;;  %vm3057_vm2 = vcmp.eq.f32.partialorder %v3056_v44, 8.507059e+37  ;;  %v3045_v29 = vsel %vm3042_vm4, %v3044_v47, %v3040_v4  ;;  %vm6105_vm5 = vcmask 261120  }
0x305c   :  { %v3060_v50 = vsel %vm3057_vm2, %v3059_v10, %v3055_v20  ;;  %v3046_v54 = vmul.f32 %v5607_v6, %v3045_v29  ;;  %vm6106_vm1 = vcmask 523264   ;;  %vm6108_vm8 = vmmov %vm6105_vm5 }
0x305d   :  { %v3061_v42 = vmul.f32 %v5609_v0, %v3060_v50  ;;  %vm6107_vm3 = vmmov %vm6106_vm1 }
0x305e   :  { %vm6109_vm0 = vmmov %vm6106_vm1 }
0x3060   :  { %3084 = vperm.xlu2 %3948, %v3016_v63  }
0x3061   :  { %3089 = vperm.xlu0 %3946, %v3031_v22  }
0x3068   :  { %3094 = vperm.xlu2 %3948, %v3046_v54  }
0x3069   :  { %3099 = vperm.xlu0 %3946, %v3061_v42  }
0x3071   :  { %3184 = vrot.lane.b32.xlu0 %v5539_v18, %s4327_s18 }
0x30aa   :  { %v3065_v61 = vpop.permute.xlu2 %3064 }
0x30ab   :  { %v3102_v9 = vmul.f32 %v3065_v61, %v4901_v46 }
0x30ad   :  { %v3110_v57 = vsel %vm1940_vm6, %v3102_v9, 0.0 }
0x30ae   :  { %v3111_v37 = vrot.slane %v3110_v57, 4 }
0x30b0   :  { %v3112_v17 = vadd.f32 %v3111_v37, %v3110_v57 }
0x30b2   :  { %v3075_v43 = vpop.permute.xlu2 %3074  ;;  %v3113_v53 = vrot.slane %v3112_v17, 2 }
0x30b3   :  { %v3104_v41 = vmul.f32 %v3075_v43, %v4905_v11 }
0x30b4   :  { %v3114_v36 = vadd.f32 %v3113_v53, %v3112_v17 }
0x30b5   :  { %v3124_v25 = vsel %vm1940_vm6, %v3104_v41, 0.0 }
0x30b6   :  { %v3125_v15 = vrot.slane %v3124_v25, 4  ;;  %v3115_v47 = vrot.slane %v3114_v36, 1 }
0x30b8   :  { %v3126_v49 = vadd.f32 %v3125_v15, %v3124_v25 }
0x30ba   :  { %v3085_v51 = vpop.permute.xlu2 %3084  ;;  %v3127_v8 = vrot.slane %v3126_v49, 2 }
0x30bb   :  { %v3106_v18 = vmul.f32 %v3085_v51, %v4921_v5 }
0x30bc   :  { %v3128_v44 = vadd.f32 %v3127_v8, %v3126_v49 }
0x30bd   :  { %v3138_v12 = vsel %vm1940_vm6, %v3106_v18, 0.0 }
0x30be   :  { %v3139_v62 = vrot.slane %v3138_v12, 4  ;;  %v3129_v61 = vrot.slane %v3128_v44, 1 }
0x30c0   :  { %v3140_v33 = vadd.f32 %v3139_v62, %v3138_v12  ;;  %v3130_v25 = vadd.f32 %v3129_v61, %v3128_v44 }
0x30c2   :  { %v3095_v28 = vpop.permute.xlu2 %3094  ;;  %v3141_v4 = vrot.slane %v3140_v33, 2 }
0x30c3   :  { %v3070_v40 = vpop.permute.xlu0 %3069  ;;  %v3108_v23 = vmul.f32 %v3095_v28, %v4925_v58 }
0x30c4   :  { %v3103_v60 = vmul.f32 %v3070_v40, %v4909_v55  ;;  %v3142_v43 = vadd.f32 %v3141_v4, %v3140_v33  ;;  %v3116_v40 = vadd.f32 %v3115_v47, %v3114_v36 }
0x30c5   :  { %v3152_v32 = vsel %vm1940_vm6, %v3108_v23, 0.0 }
0x30c6   :  { %v3117_v6 = vsel %vm1940_vm6, %v3103_v60, 0.0  ;;  %v3153_v7 = vrot.slane %v3152_v32, 4  ;;  %v3143_v18 = vrot.slane %v3142_v43, 1 }
0x30c7   :  { %v3118_v0 = vrot.slane %v3117_v6, 4 }
0x30c8   :  { %v3154_v20 = vadd.f32 %v3153_v7, %v3152_v32  ;;  %v3144_v12 = vadd.f32 %v3143_v18, %v3142_v43 }
0x30c9   :  { %v3119_v21 = vadd.f32 %v3118_v0, %v3117_v6 }
0x30ca   :  { %v3155_v51 = vrot.slane %v3154_v20, 2 }
0x30cb   :  { %v3080_v27 = vpop.permute.xlu0 %3079  ;;  %v3120_v1 = vrot.slane %v3119_v21, 2 }
0x30cc   :  { %v3105_v45 = vmul.f32 %v3080_v27, %v4913_v56  ;;  %v3156_v28 = vadd.f32 %v3155_v51, %v3154_v20 }
0x30cd   :  { %v3121_v30 = vadd.f32 %v3120_v1, %v3119_v21 }
0x30ce   :  { %v3131_v16 = vsel %vm1940_vm6, %v3105_v45, 0.0  ;;  %v3157_v23 = vrot.slane %v3156_v28, 1 }
0x30cf   :  { %v3132_v35 = vrot.slane %v3131_v16, 4  ;;  %v3122_v31 = vrot.slane %v3121_v30, 1 }
0x30d0   :  { %v3158_v62 = vadd.f32 %v3157_v23, %v3156_v28 }
0x30d1   :  { %v3133_v14 = vadd.f32 %v3132_v35, %v3131_v16  ;;  %v3123_v29 = vadd.f32 %v3122_v31, %v3121_v30 }
0x30d3   :  { %v3134_v39 = vrot.slane %v3133_v14, 2  ;;  %v3090_v24 = vpop.permute.xlu0 %3089  ;;  %v3174_v57 = vsel %vm1644_vm10, %v3123_v29, %v3116_v40 }
0x30d4   :  { %v3107_v48 = vmul.f32 %v3090_v24, %v4917_v52  ;;  %v3175_v27 = vsel %vm1646_vm11, %v3130_v25, %v3174_v57 }
0x30d5   :  { %v3135_v19 = vadd.f32 %v3134_v39, %v3133_v14 }
0x30d6   :  { %v3145_v63 = vsel %vm1940_vm6, %v3107_v48, 0.0 }
0x30d7   :  { %v3146_v22 = vrot.slane %v3145_v63, 4  ;;  %v3136_v50 = vrot.slane %v3135_v19, 1 }
0x30d9   :  { %v3147_v10 = vadd.f32 %v3146_v22, %v3145_v63  ;;  %v3137_v6 = vadd.f32 %v3136_v50, %v3135_v19 }
0x30db   :  { %v3148_v54 = vrot.slane %v3147_v10, 2  ;;  %v3100_v42 = vpop.permute.xlu0 %3099  ;;  %v3176_v15 = vsel %vm1648_vm12, %v3137_v6, %v3175_v27 }
0x30dc   :  { %v3109_v9 = vmul.f32 %v3100_v42, %v4929_v59  ;;  %v3177_v1 = vsel %vm1650_vm13, %v3144_v12, %v3176_v15 }
0x30dd   :  { %v3149_v60 = vadd.f32 %v3148_v54, %v3147_v10 }
0x30de   :  { %v3159_v41 = vsel %vm1940_vm6, %v3109_v9, 0.0 }
0x30df   :  { %v3150_v0 = vrot.slane %v3149_v60, 1  ;;  %v3160_v37 = vrot.slane %v3159_v41, 4 }
0x30e1   :  { %v3161_v21 = vadd.f32 %v3160_v37, %v3159_v41  ;;  %v3151_v45 = vadd.f32 %v3150_v0, %v3149_v60 }
0x30e3   :  { %v3162_v17 = vrot.slane %v3161_v21, 2  ;;  %v3178_v49 = vsel %vm1652_vm14, %v3151_v45, %v3177_v1  ;;  %v3185_v30 = vpop.permute.xlu0 %3184 }
0x30e4   :  { %v3179_v32 = vsel %vm6103_vm7, %v3158_v62, %v3178_v49 }
0x30e5   :  { %v3163_v16 = vadd.f32 %v3162_v17, %v3161_v21 }
0x30e7   :  { %v3164_v35 = vrot.slane %v3163_v16, 1 }
0x30e9   :  { %v3165_v53 = vadd.f32 %v3164_v35, %v3163_v16 }
0x30eb   :  { %v3180_v14 = vsel %vm6104_vm9, %v3165_v53, %v3179_v32  ;;  %vm6110_vm9 = vmmov %vm6105_vm5 }
0x30ec   :  { %3181 = vrot.lane.b32.xlu2 %v3180_v14, %s4332_s30 }
0x3146   :  { %v3182_v39 = vpop.permute.xlu2 %3181 }
0x3147   :  { %v3187_v24 = vsel %vm6105_vm5, %v3182_v39, %v3185_v30 }
0x3148   :  { %v3188_v8 = vpack.c.bf16 %v3187_v24, %v3187_v24 }
0x314a   :  { %3913 = vmatmul.msk.bf16.vlgmr.msra.gmra.mxu3 %vm6106_vm1, %v3188_v8  ;;  %3914 = vmatmul.msk.bf16.vlgmr.msrb.gmra.mxu0 %vm6107_vm3, %v3188_v8  ;;  %vm6111_vm1 = vmmov %vm6105_vm5 }
0x314b   :  { %vm6112_vm3 = vmmov %vm6111_vm1 }
0x31c7   :  { %v3214_v33 = vpop.f32.mrf.mxu0 }
0x31c8   :  { %v3215_v7 = vadd.f32 %v3214_v33, %v5279_v3 }
0x31ca   :  { %v3222_v48 = vsel %vm6108_vm8, %v3215_v7, %v3185_v30  ;;  %vm6113_vm8 = vmmov %vm6111_vm1 }
0x31cb   :  { %v3223_v36 = vpack.c.bf16 %v3222_v48, %v3222_v48 }
0x31cd   :  { %v5770_v63 = vpop.f32.mrf.mxu3  ;;  %3915 = vmatmul.msk.bf16.vlgmr.msra.gmra.mxu1 %vm6109_vm0, %v3223_v36  ;;  %vm6114_vm0 = vmmov %vm6111_vm1 }
0x31cf   :  { %v3216_v31 = vpop.f32.mrf.mxu0 }
0x31d5   :  { %v3203_v19 = vpop.f32.mrf.mxu3 }
0x324a   :  { %v3236_v22 = vpop.f32.mrf.mxu1 }
0x324b   :  { %v3237_v44 = vadd.f32 %v5529_v34, %v3236_v22 }
0x324d   :  { %4202 = vtanh.f32 %v3237_v44  ;;  %v3916_v47 = vmul.f32 -1.442695, %v3237_v44 }
0x324f   :  { %4204 = vpow2.f32 %v3916_v47 }
0x3252   :  { %v3238_v4 = vpop.f32.mrf.mxu1 }
0x3253   :  { %v4203_v20 = vpop.eup %4202 }
0x3254   :  { %3262 = vrot.lane.b32.xlu1 %v4203_v20, %s4327_s18 }
0x3255   :  { %v4205_v3 = vpop.eup %4204 }
0x3256   :  { %v3243_v10 = vadd.f32 1.0, %v4205_v3 }
0x3258   :  { %4206 = vrcp.f32 %v3243_v10  ;;  %v3255_v43 = vand.u32 2147483648, %v3243_v10  ;;  %vm3249_vm4 = vweird.f32 %v3243_v10  ;;  %v3253_v51 = vand.u32 2147483647, %v3243_v10 }
0x325a   :  { %v3256_v9 = vor.u32 1.1754944e-38, %v3255_v43  ;;  %vm3254_vm7 = vcmp.eq.f32.partialorder %v3253_v51, 8.507059e+37 }
0x325e   :  { %v4207_v29 = vpop.eup %4206 }
0x325f   :  { %v3245_v50 = vmul.f32 %v4207_v29, %v3243_v10  ;;  %vm3250_vm15 = vweird.f32 %v4207_v29 }
0x3260   :  { %vm3251_vm2 = vmor %vm3249_vm4, %vm3250_vm15 }
0x3261   :  { %v3246_v54 = vsub.f32 1.0, %v3245_v50  ;;  %vm6115_vm15 = vmmov %vm6114_vm0 }
0x3262   :  { %vm6116_vm4 = vmmov %vm6114_vm0 }
0x3263   :  { %v3247_v42 = vmul.f32 %v4207_v29, %v3246_v54 }
0x3265   :  { %v3248_v61 = vadd.f32 %v4207_v29, %v3247_v42 }
0x3267   :  { %v3252_v34 = vsel %vm3251_vm2, %v4207_v29, %v3248_v61  ;;  %vm6117_vm2 = vcmask 1046534  }
0x3268   :  { %v3257_v60 = vsel %vm3254_vm7, %v3256_v9, %v3252_v34  ;;  %vm6118_vm7 = vcmask 1047559  }
0x3269   :  { %v3260_v57 = vmul.f32 %v3257_v60, %v5535_v2 }
0x32c6   :  { %v3263_v40 = vpop.permute.xlu1 %3262 }
0x32c7   :  { %v3265_v41 = vmul.f32 %v3263_v40, %v3257_v60 }
0x32c9   :  { %3267 = vrot.lane.b32.xlu2 %v3265_v41, %s4332_s30 }
0x3323   :  { %v3268_v6 = vpop.permute.xlu2 %3267 }
0x3324   :  { %v3270_v0 = vadd.f32 %v3268_v6, %v3260_v57 }
0x3326   :  { %4208 = vtanh.f32 %v3270_v0 }
0x332c   :  { %v4209_v37 = vpop.eup %4208 }
0x332d   :  { %3273 = vrot.lane.b32.xlu0 %v4209_v37, %s4327_s18 }
0x339f   :  { %v3274_v25 = vpop.permute.xlu0 %3273 }
0x33a0   :  { %v5778_v18 = vmul.f32 %v3274_v25, %v3257_v60 }
0x33a2   :  { %v3285_v28 = vperm.slane %v5778_v18, 0  ;;  %v3281_v21 = vrot.slane %v5778_v18, 4  ;;  %v3278_v27 = vrot.slane %v5778_v18, 1  ;;  %v3279_v2 = vrot.slane %v5778_v18, 2 }
0x33a3   :  { %v3284_v16 = vrot.slane %v5778_v18, 7  ;;  %v3280_v1 = vrot.slane %v5778_v18, 3  ;;  %v3282_v32 = vrot.slane %v5778_v18, 5  ;;  %v3283_v39 = vrot.slane %v5778_v18, 6 }
0x33a4   :  { %v3301_v15 = vmul.f32 %v3285_v28, %v4901_v46  ;;  %v3289_v45 = vperm.slane %v3281_v21, 0  ;;  %v3286_v17 = vperm.slane %v3278_v27, 0  ;;  %v3287_v35 = vperm.slane %v3279_v2, 0 }
0x33a5   :  { %v3292_v49 = vperm.slane %v3284_v16, 0  ;;  %v3288_v62 = vperm.slane %v3280_v1, 0  ;;  %v3290_v24 = vperm.slane %v3282_v32, 0  ;;  %v3291_v8 = vperm.slane %v3283_v39, 0 }
0x33a6   :  { %3317 = vrot.lane.b32.xlu2 %v3301_v15, %s4332_s30  ;;  %v3305_v12 = vmul.f32 %v3289_v45, %v4921_v5  ;;  %v3302_v23 = vmul.f32 %v3286_v17, %v4909_v55  ;;  %v3303_v53 = vmul.f32 %v3287_v35, %v4905_v11 }
0x33a7   :  { %v3308_v14 = vmul.f32 %v3292_v49, %v4929_v59  ;;  %v3304_v30 = vmul.f32 %v3288_v62, %v4913_v56  ;;  %v3306_v33 = vmul.f32 %v3290_v24, %v4917_v52  ;;  %v3307_v7 = vmul.f32 %v3291_v8, %v4925_v58 }
0x33a8   :  { %3325 = vrot.lane.b32.xlu1 %v3305_v12, %s4332_s30  ;;  %3319 = vrot.lane.b32.xlu0 %v3302_v23, %s4332_s30 }
0x33ae   :  { %3321 = vrot.lane.b32.xlu2 %v3303_v53, %s4332_s30 }
0x33b0   :  { %3331 = vrot.lane.b32.xlu1 %v3308_v14, %s4332_s30  ;;  %3323 = vrot.lane.b32.xlu0 %v3304_v30, %s4332_s30 }
0x33b6   :  { %3327 = vrot.lane.b32.xlu2 %v3306_v33, %s4332_s30 }
0x33b8   :  { %3329 = vrot.lane.b32.xlu0 %v3307_v7, %s4332_s30 }
0x3400   :  { %v3318_v48 = vpop.permute.xlu2 %3317 }
0x3401   :  { %v3341_v36 = vsel %vm6110_vm9, %v3318_v48, 0.0  ;;  %vm6119_vm9 = vcmask 64512  }
0x3402   :  { %3342 = vadd.xlane.f32.xlu2 %v3341_v36 }
0x3408   :  { %v3322_v31 = vpop.permute.xlu2 %3321 }
0x3409   :  { %v3347_v19 = vsel %vm6105_vm5, %v3322_v31, 0.0  ;;  %vm6120_vm5 = vmmov %vm6117_vm2 }
0x340a   :  { %3348 = vadd.xlane.f32.xlu1 %v3347_v19 }
0x3410   :  { %v3328_v22 = vpop.permute.xlu2 %3327 }
0x3411   :  { %v3356_v44 = vsel %vm6111_vm1, %v3328_v22, 0.0  ;;  %vm6121_vm1 = vmmov %vm6118_vm7 }
0x3412   :  { %3357 = vadd.xlane.f32.xlu1 %v3356_v44 }
0x341a   :  { %v3320_v4 = vpop.permute.xlu0 %3319  ;;  %v3326_v47 = vpop.permute.xlu1 %3325 }
0x341b   :  { %v3344_v20 = vsel %vm6112_vm3, %v3320_v4, 0.0  ;;  %v3353_v10 = vsel %vm6113_vm8, %v3326_v47, 0.0  ;;  %vm6122_vm3 = vmmov %vm6119_vm9 }
0x341c   :  { %3345 = vadd.xlane.f32.xlu0 %v3344_v20 }
0x3422   :  { %v3324_v3 = vpop.permute.xlu0 %3323  ;;  %v3332_v50 = vpop.permute.xlu1 %3331 }
0x3423   :  { %v3350_v29 = vsel %vm6114_vm0, %v3324_v3, 0.0  ;;  %v3362_v42 = vsel %vm6115_vm15, %v3332_v50, 0.0 }
0x3424   :  { %3354 = vadd.xlane.f32.xlu0 %v3353_v10  ;;  %3351 = vadd.xlane.f32.xlu2 %v3350_v29 }
0x342a   :  { %v3330_v54 = vpop.permute.xlu0 %3329 }
0x342b   :  { %v3359_v61 = vsel %vm6116_vm4, %v3330_v54, 0.0 }
0x342c   :  { %3363 = vadd.xlane.f32.xlu0 %v3362_v42  ;;  %3360 = vadd.xlane.f32.xlu2 %v3359_v61 }
0x3475   :  { %v3343_v43 = vpop.xlane.xlu2 %3342 }
0x3476   :  { %v3373_v40 = vperm.slane %v3343_v43, %v4980_v26 }
0x347d   :  { %v3349_v34 = vpop.xlane.xlu1 %3348 }
0x347e   :  { %v3375_v6 = vperm.slane %v3349_v34, %v4980_v26 }
0x3485   :  { %v3358_v21 = vpop.xlane.xlu1 %3357 }
0x3486   :  { %v3378_v15 = vperm.slane %v3358_v21, %v4980_v26 }
0x348f   :  { %v3346_v51 = vpop.xlane.xlu0 %3345 }
0x3490   :  { %v3374_v9 = vperm.slane %v3346_v51, %v4980_v26 }
0x3492   :  { %v3381_v60 = vsel %vm1644_vm10, %v3374_v9, %v3373_v40 }
0x3493   :  { %v3382_v37 = vsel %vm1646_vm11, %v3375_v6, %v3381_v60 }
0x3497   :  { %v3352_v41 = vpop.xlane.xlu2 %3351  ;;  %v3355_v57 = vpop.xlane.xlu0 %3354 }
0x3498   :  { %v3376_v0 = vperm.slane %v3352_v41, %v4980_v26  ;;  %v3377_v25 = vperm.slane %v3355_v57, %v4980_v26 }
0x349a   :  { %v3383_v28 = vsel %vm1648_vm12, %v3376_v0, %v3382_v37 }
0x349b   :  { %v3384_v27 = vsel %vm1650_vm13, %v3377_v25, %v3383_v28 }
0x349c   :  { %v3385_v23 = vsel %vm1652_vm14, %v3378_v15, %v3384_v27 }
0x349f   :  { %v3361_v45 = vpop.xlane.xlu2 %3360  ;;  %v3364_v17 = vpop.xlane.xlu0 %3363 }
0x34a0   :  { %v3379_v2 = vperm.slane %v3361_v45, %v4980_v26  ;;  %v3380_v12 = vperm.slane %v3364_v17, %v4980_v26 }
0x34a2   :  { %v3386_v16 = vsel %vm6117_vm2, %v3379_v2, %v3385_v23 }
0x34a3   :  { %v3387_v1 = vsel %vm6118_vm7, %v3380_v12, %v3386_v16 }
0x34a4   :  { %v3389_v35 = vsel %vm6119_vm9, %v3387_v1, -inf }
0x34a5   :  { %3390 = vmax.xlane.f32.xlu1 %v3389_v35 }
0x3518   :  { %v3391_v49 = vpop.xlane.xlu1 %3390 }
0x3519   :  { %v3393_v62 = vperm.slane %v3391_v49, 0  ;;  %v3394_v53 = vperm.slane %v3391_v49, 1  ;;  %v3395_v32 = vperm.slane %v3391_v49, 2  ;;  %v3397_v14 = vperm.slane %v3391_v49, 4 }
0x351a   :  { %v3396_v8 = vperm.slane %v3391_v49, 3  ;;  %v3399_v33 = vperm.slane %v3391_v49, 6  ;;  %v3400_v44 = vperm.slane %v3391_v49, 7  ;;  %v3398_v20 = vperm.slane %v3391_v49, 5 }
0x351b   :  { %v3409_v30 = vsub.f32 %v3343_v43, %v3393_v62  ;;  %v3410_v39 = vsub.f32 %v3346_v51, %v3394_v53  ;;  %v3411_v24 = vsub.f32 %v3349_v34, %v3395_v32  ;;  %v3413_v31 = vsub.f32 %v3355_v57, %v3397_v14 }
0x351c   :  { %v3412_v19 = vsub.f32 %v3352_v41, %v3396_v8  ;;  %v3415_v22 = vsub.f32 %v3361_v45, %v3399_v33  ;;  %v3416_v54 = vsub.f32 %v3364_v17, %v3400_v44  ;;  %v3414_v42 = vsub.f32 %v3358_v21, %v3398_v20 }
0x351d   :  { %v3417_v7 = vmul.f32 1.442695, %v3409_v30  ;;  %v3419_v48 = vmul.f32 1.442695, %v3410_v39  ;;  %v3421_v36 = vmul.f32 1.442695, %v3411_v24 }
0x351e   :  { %v3425_v4 = vmul.f32 1.442695, %v3413_v31  ;;  %v3423_v47 = vmul.f32 1.442695, %v3412_v19  ;;  %v3429_v10 = vmul.f32 1.442695, %v3415_v22 }
0x351f   :  { %4210 = vpow2.f32 %v3417_v7  ;;  %v3431_v61 = vmul.f32 1.442695, %v3416_v54  ;;  %v3427_v43 = vmul.f32 1.442695, %v3414_v42  ;;  %v4249_v39 = vld [vmem:[%s6041_s10] sm:$0x3] }
0x3520   :  { %4212 = vpow2.f32 %v3419_v48  ;;  %v5871_v24 = vperm.slane %v4249_v39, 0  ;;  %s4333_s10 = smov 1  }
0x3521   :  { %4214 = vpow2.f32 %v3421_v36 }
0x3522   :  { %4216 = vpow2.f32 %v3425_v4  ;;  %v3202_v8 = vadd.f32 %v5770_v63, %v5871_v24  ;;  %v2078_v7 = vadd.f32 %v5274_v13, %v5871_v24 }
0x3523   :  { %4218 = vpow2.f32 %v3423_v47 }
0x3524   :  { %4220 = vpow2.f32 %v3429_v10 }
0x3525   :  { %v5828_v3 = vpop.eup %4210  ;;  %4222 = vpow2.f32 %v3431_v61 }
0x3526   :  { %v5830_v29 = vpop.eup %4212  ;;  %3442 = vperm.xlu2 %3948, %v5828_v3   ;;  %4224 = vpow2.f32 %v3427_v43 }
0x3527   :  { %v5833_v50 = vpop.eup %4214  ;;  %3445 = vperm.xlu0 %3946, %v5830_v29  }
0x3528   :  { %3448 = vperm.xlu1 %3947, %v5833_v50   ;;  %v5837_v51 = vpop.eup %4216 }
0x3529   :  { %v5839_v34 = vpop.eup %4218 }
0x352a   :  { %v5842_v9 = vpop.eup %4220 }
0x352b   :  { %v5846_v40 = vpop.eup %4222 }
0x352c   :  { %v5848_v60 = vpop.eup %4224 }
0x352e   :  { %3454 = vperm.xlu2 %3948, %v5837_v51  }
0x352f   :  { %3451 = vperm.xlu0 %3946, %v5839_v34  }
0x3530   :  { %3460 = vperm.xlu1 %3947, %v5842_v9  }
0x3536   :  { %3463 = vperm.xlu2 %3948, %v5846_v40  }
0x3537   :  { %3457 = vperm.xlu0 %3946, %v5848_v60  }
0x3580   :  { %v3443_v41 = vpop.permute.xlu2 %3442 }
0x3581   :  { %v3465_v28 = vperm.slane %v3443_v41, %v4980_v26 }
0x3588   :  { %v3455_v0 = vpop.permute.xlu2 %3454 }
0x3589   :  { %v3469_v12 = vperm.slane %v3455_v0, %v4980_v26 }
0x3590   :  { %v3464_v23 = vpop.permute.xlu2 %3463 }
0x3591   :  { %v3472_v62 = vperm.slane %v3464_v23, %v4980_v26 }
0x3599   :  { %v3446_v57 = vpop.permute.xlu0 %3445 }
0x359a   :  { %v3449_v6 = vpop.permute.xlu1 %3448  ;;  %v3466_v37 = vperm.slane %v3446_v57, %v4980_v26 }
0x359b   :  { %v3467_v21 = vperm.slane %v3449_v6, %v4980_v26 }
0x359c   :  { %v3473_v27 = vsel %vm1644_vm10, %v3466_v37, %v3465_v28 }
0x359d   :  { %v3474_v45 = vsel %vm1646_vm11, %v3467_v21, %v3473_v27 }
0x35a1   :  { %v3452_v25 = vpop.permute.xlu0 %3451 }
0x35a2   :  { %v3468_v15 = vperm.slane %v3452_v25, %v4980_v26  ;;  %v3461_v17 = vpop.permute.xlu1 %3460 }
0x35a3   :  { %v3471_v35 = vperm.slane %v3461_v17, %v4980_v26 }
0x35a4   :  { %v3475_v2 = vsel %vm1648_vm12, %v3468_v15, %v3474_v45 }
0x35a5   :  { %v3476_v49 = vsel %vm1650_vm13, %v3469_v12, %v3475_v2 }
0x35a9   :  { %v3458_v16 = vpop.permute.xlu0 %3457 }
0x35aa   :  { %v3470_v1 = vperm.slane %v3458_v16, %v4980_v26  ;;  %v5878_v26 = vld [vmem:[%s6042_s11] ss:$0 sm:$0xff]  ;;  %s4334_s11 = smov 2  }
0x35ab   :  { %v3218_v33 = vmul.f32 %v5878_v26, %v3202_v8  ;;  %v2097_v48 = vmul.f32 %v5878_v26, %v2078_v7 }
0x35ac   :  { %v3477_v53 = vsel %vm1652_vm14, %v3470_v1, %v3476_v49 }
0x35ad   :  { %v3478_v32 = vsel %vm6120_vm5, %v3471_v35, %v3477_v53 }
0x35ae   :  { %v3479_v14 = vsel %vm6121_vm1, %v3472_v62, %v3478_v32 }
0x35af   :  { %v3481_v30 = vsel %vm6122_vm3, %v3479_v14, 0.0 }
0x35b0   :  { %3482 = vadd.xlane.f32.xlu0 %v3481_v30 }
0x35b8   :  { %3219 = vadd.xlane.f32.xlu0 %v3218_v33 }
0x35c0   :  { %2098 = vadd.xlane.f32.xlu0 %v2097_v48 }
0x3623   :  { %v3483_v36 = vpop.xlane.xlu0 %3482 }
0x3624   :  { %v3485_v31 = vperm.slane %v3483_v36, 0  ;;  %v3486_v19 = vperm.slane %v3483_v36, 1  ;;  %v5884_v22 = vperm.slane %v3483_v36, 2  ;;  %v5886_v63 = vperm.slane %v3483_v36, 3 }
0x3625   :  { %v5888_v44 = vperm.slane %v3483_v36, 4  ;;  %v5890_v4 = vperm.slane %v3483_v36, 5  ;;  %v5896_v54 = vperm.slane %v3483_v36, 7  ;;  %v5898_v43 = vperm.slane %v3483_v36, 6 }
0x3626   :  { %4226 = vrcp.f32 %v3485_v31  ;;  %v3525_v13 = vand.u32 2147483647, %v3486_v19  ;;  %v3527_v20 = vand.u32 2147483648, %v3486_v19  ;;  %v3510_v47 = vand.u32 2147483647, %v3485_v31 }
0x3627   :  { %4228 = vrcp.f32 %v3486_v19  ;;  %v3512_v42 = vand.u32 2147483648, %v3485_v31  ;;  %vm3521_vm8 = vweird.f32 %v3486_v19  ;;  %vm3506_vm15 = vweird.f32 %v3485_v31 }
0x3628   :  { %4230 = vrcp.f32 %v5884_v22  ;;  %vm5902_vm0 = vcmp.eq.f32.partialorder %v3525_v13, 8.507059e+37  ;;  %v3528_v25 = vor.u32 1.1754944e-38, %v3527_v20  ;;  %vm5908_vm4 = vcmp.eq.f32.partialorder %v3510_v47, 8.507059e+37 }
0x3629   :  { %4232 = vrcp.f32 %v5886_v63  ;;  %v3513_v17 = vor.u32 1.1754944e-38, %v3512_v42  ;;  %v3557_v32 = vand.u32 2147483648, %v5886_v63  ;;  %v3542_v30 = vand.u32 2147483648, %v5884_v22 }
0x362a   :  { %4234 = vrcp.f32 %v5888_v44 }
0x362b   :  { %4236 = vrcp.f32 %v5890_v4 }
0x362c   :  { %v4227_v10 = vpop.eup %4226  ;;  %4238 = vrcp.f32 %v5896_v54 }
0x362d   :  { %v4229_v61 = vpop.eup %4228  ;;  %v3502_v41 = vmul.f32 %v4227_v10, %v3485_v31  ;;  %vm3507_vm2 = vweird.f32 %v4227_v10  ;;  %4240 = vrcp.f32 %v5898_v43 }
0x362e   :  { %v5900_v57 = vpop.eup %4230  ;;  %v3517_v6 = vmul.f32 %v4229_v61, %v3486_v19  ;;  %vm3522_vm7 = vweird.f32 %v4229_v61  ;;  %vm3508_vm9 = vmor %vm3506_vm15, %vm3507_vm2  ;;  %vm3551_vm15 = vweird.f32 %v5886_v63 }
0x362f   :  { %v5906_v37 = vpop.eup %4232  ;;  %v3503_v28 = vsub.f32 1.0, %v3502_v41  ;;  %v3532_v27 = vmul.f32 %v5900_v57, %v5884_v22  ;;  %vm3537_vm5 = vweird.f32 %v5900_v57  ;;  %vm3523_vm1 = vmor %vm3521_vm8, %vm3522_vm7  ;;  %vm3536_vm8 = vweird.f32 %v5884_v22 }
0x3630   :  { %v5914_v15 = vpop.eup %4234  ;;  %v3518_v45 = vsub.f32 1.0, %v3517_v6  ;;  %v3547_v2 = vmul.f32 %v5906_v37, %v5886_v63  ;;  %vm3552_vm3 = vweird.f32 %v5906_v37 }
0x3631   :  { %v5919_v12 = vpop.eup %4236  ;;  %v3504_v23 = vmul.f32 %v4227_v10, %v3503_v28  ;;  %v3533_v16 = vsub.f32 1.0, %v3532_v27  ;;  %v3562_v1 = vmul.f32 %v5914_v15, %v5888_v44  ;;  %vm3553_vm2 = vmor %vm3551_vm15, %vm3552_vm3  ;;  %v3558_v28 = vor.u32 1.1754944e-38, %v3557_v32 }
0x3632   :  { %v3519_v35 = vmul.f32 %v4229_v61, %v3518_v45  ;;  %v3548_v49 = vsub.f32 1.0, %v3547_v2  ;;  %v3577_v62 = vmul.f32 %v5919_v12, %v5890_v4  ;;  %v5935_v36 = vpop.eup %4238  ;;  %v3587_v27 = vand.u32 2147483648, %v5890_v4 }
0x3633   :  { %v3505_v53 = vadd.f32 %v4227_v10, %v3504_v23  ;;  %v3534_v14 = vmul.f32 %v5900_v57, %v3533_v16  ;;  %v3563_v48 = vsub.f32 1.0, %v3562_v1  ;;  %v5954_v0 = vpop.eup %4240  ;;  %v3572_v2 = vand.u32 2147483648, %v5888_v44 }
0x3634   :  { %v3520_v39 = vadd.f32 %v4229_v61, %v3519_v35  ;;  %v3549_v8 = vmul.f32 %v5906_v37, %v3548_v49  ;;  %v3578_v47 = vsub.f32 1.0, %v3577_v62  ;;  %v3570_v1 = vand.u32 2147483647, %v5888_v44 }
0x3635   :  { %v3509_v33 = vsel %vm3508_vm9, %v4227_v10, %v3505_v53  ;;  %v3535_v7 = vadd.f32 %v5900_v57, %v3534_v14  ;;  %v3540_v10 = vand.u32 2147483647, %v5884_v22  ;;  %v3543_v22 = vor.u32 1.1754944e-38, %v3542_v30 }
0x3636   :  { %v3524_v13 = vsel %vm3523_vm1, %v4229_v61, %v3520_v39  ;;  %v3514_v20 = vsel %vm5908_vm4, %v3513_v17, %v3509_v33  ;;  %v3550_v31 = vadd.f32 %v5906_v37, %v3549_v8  ;;  %v3555_v61 = vand.u32 2147483647, %v5886_v63  ;;  %vm3538_vm4 = vmor %vm3536_vm8, %vm3537_vm5 }
0x3637   :  { %v3529_v42 = vsel %vm5902_vm0, %v3528_v25, %v3524_v13  ;;  %v3515_v19 = vmul.f32 %v5828_v3, %v3514_v20  ;;  %v3539_v6 = vsel %vm3538_vm4, %v5900_v57, %v3535_v7  ;;  %v3564_v3 = vmul.f32 %v5914_v15, %v3563_v48 }
0x3638   :  { %v3530_v41 = vmul.f32 %v5830_v29, %v3529_v42  ;;  %v3554_v29 = vsel %vm3553_vm2, %v5906_v37, %v3550_v31  ;;  %v3579_v25 = vmul.f32 %v5919_v12, %v3578_v47  ;;  %v3607_v63 = vmul.f32 %v5935_v36, %v5896_v54 }
0x3639   :  { %3623 = vperm.xlu1 %3947, %v3515_v19   ;;  %vm3541_vm0 = vcmp.eq.f32.partialorder %v3540_v10, 8.507059e+37  ;;  %vm3556_vm7 = vcmp.eq.f32.partialorder %v3555_v61, 8.507059e+37  ;;  %v3565_v45 = vadd.f32 %v5914_v15, %v3564_v3  ;;  %vm3567_vm9 = vweird.f32 %v5914_v15 }
0x363a   :  { %3628 = vperm.xlu2 %3948, %v3530_v41   ;;  %v3544_v21 = vsel %vm3541_vm0, %v3543_v22, %v3539_v6  ;;  %v3559_v57 = vsel %vm3556_vm7, %v3558_v28, %v3554_v29  ;;  %v3592_v37 = vmul.f32 %v5954_v0, %v5898_v43  ;;  %v3580_v17 = vadd.f32 %v5919_v12, %v3579_v25 }
0x363b   :  { %vm3582_vm5 = vweird.f32 %v5919_v12  ;;  %v3608_v23 = vsub.f32 1.0, %v3607_v63  ;;  %v3545_v16 = vmul.f32 %v5833_v50, %v3544_v21  ;;  %vm3566_vm1 = vweird.f32 %v5888_v44 }
0x363c   :  { %v3593_v35 = vsub.f32 1.0, %v3592_v37  ;;  %v3560_v49 = vmul.f32 %v5839_v34, %v3559_v57  ;;  %vm3581_vm3 = vweird.f32 %v5890_v4  ;;  %v3585_v62 = vand.u32 2147483647, %v5890_v4  ;;  %vm3568_vm8 = vmor %vm3566_vm1, %vm3567_vm9 }
0x363d   :  { %vm3583_vm15 = vmor %vm3581_vm3, %vm3582_vm5  ;;  %v3569_v53 = vsel %vm3568_vm8, %v5914_v15, %v3565_v45  ;;  %v3573_v14 = vor.u32 1.1754944e-38, %v3572_v2  ;;  %v3609_v44 = vmul.f32 %v5935_v36, %v3608_v23  ;;  %v3588_v30 = vor.u32 1.1754944e-38, %v3587_v27 }
0x363e   :  { %v3594_v32 = vmul.f32 %v5954_v0, %v3593_v35  ;;  %v3584_v50 = vsel %vm3583_vm15, %v5919_v12, %v3580_v17  ;;  %vm3571_vm4 = vcmp.eq.f32.partialorder %v3570_v1, 8.507059e+37  ;;  %vm3586_vm2 = vcmp.eq.f32.partialorder %v3585_v62, 8.507059e+37 }
0x363f   :  { %v3574_v34 = vsel %vm3571_vm4, %v3573_v14, %v3569_v53  ;;  %v3589_v39 = vsel %vm3586_vm2, %v3588_v30, %v3584_v50  ;;  %vm3597_vm0 = vweird.f32 %v5954_v0  ;;  %v3610_v8 = vadd.f32 %v5935_v36, %v3609_v44 }
0x3640   :  { %v3595_v4 = vadd.f32 %v5954_v0, %v3594_v32  ;;  %vm3612_vm7 = vweird.f32 %v5935_v36  ;;  %v3602_v15 = vand.u32 2147483648, %v5898_v43  ;;  %v3575_v12 = vmul.f32 %v5837_v51, %v3574_v34 }
0x3641   :  { %3633 = vperm.xlu1 %3947, %v3545_v16   ;;  %v3617_v33 = vand.u32 2147483648, %v5896_v54  ;;  %vm3596_vm9 = vweird.f32 %v5898_v43  ;;  %v3600_v7 = vand.u32 2147483647, %v5898_v43  ;;  %v3590_v48 = vmul.f32 %v5848_v60, %v3589_v39 }
0x3642   :  { %3638 = vperm.xlu2 %3948, %v3560_v49   ;;  %vm3611_vm5 = vweird.f32 %v5896_v54  ;;  %v3615_v13 = vand.u32 2147483647, %v5896_v54  ;;  %vm3598_vm1 = vmor %vm3596_vm9, %vm3597_vm0  ;;  %v3603_v31 = vor.u32 1.1754944e-38, %v3602_v15  ;;  %vm3784_vm4 = vcmask 23552  }
0x3643   :  { %vm3613_vm3 = vmor %vm3611_vm5, %vm3612_vm7  ;;  %v3599_v20 = vsel %vm3598_vm1, %v5954_v0, %v3595_v4  ;;  %v3618_v47 = vor.u32 1.1754944e-38, %v3617_v33  ;;  %vm3601_vm8 = vcmp.eq.f32.partialorder %v3600_v7, 8.507059e+37  ;;  %vm6131_vm2 = vcmask 31744  }
0x3644   :  { %v3614_v51 = vsel %vm3613_vm3, %v5935_v36, %v3610_v8  ;;  %vm3616_vm15 = vcmp.eq.f32.partialorder %v3615_v13, 8.507059e+37  ;;  %v3604_v42 = vsel %vm3601_vm8, %v3603_v31, %v3599_v20 }
0x3645   :  { %v3619_v43 = vsel %vm3616_vm15, %v3618_v47, %v3614_v51  ;;  %v3605_v60 = vmul.f32 %v5842_v9, %v3604_v42 }
0x3646   :  { %v3620_v19 = vmul.f32 %v5846_v40, %v3619_v43 }
0x3649   :  { %3643 = vperm.xlu1 %3947, %v3575_v12  }
0x364a   :  { %3648 = vperm.xlu2 %3948, %v3590_v48  }
0x3651   :  { %3653 = vperm.xlu1 %3947, %v3605_v60  }
0x3652   :  { %3658 = vperm.xlu2 %3948, %v3620_v19  }
0x365a   :  { %3743 = vrot.lane.b32.xlu2 %v5778_v18, %s4327_s18  ;;  %s4335_s18 = smov 3  }
0x3694   :  { %v3629_v54 = vpop.permute.xlu2 %3628 }
0x3695   :  { %v3662_v6 = vmul.f32 %v3629_v54, %v4909_v55 }
0x3697   :  { %v3676_v0 = vsel %vm1940_vm6, %v3662_v6, 0.0 }
0x3698   :  { %v3677_v22 = vrot.slane %v3676_v0, 4 }
0x369a   :  { %v3678_v57 = vadd.f32 %v3677_v22, %v3676_v0 }
0x369c   :  { %v3639_v10 = vpop.permute.xlu2 %3638  ;;  %v3679_v16 = vrot.slane %v3678_v57, 2 }
0x369d   :  { %v3664_v9 = vmul.f32 %v3639_v10, %v4913_v56 }
0x369e   :  { %v3680_v50 = vadd.f32 %v3679_v16, %v3678_v57 }
0x369f   :  { %v3690_v63 = vsel %vm1940_vm6, %v3664_v9, 0.0 }
0x36a0   :  { %v3691_v45 = vrot.slane %v3690_v63, 4  ;;  %v3681_v12 = vrot.slane %v3680_v50, 1 }
0x36a2   :  { %v3692_v1 = vadd.f32 %v3691_v45, %v3690_v63  ;;  %v3682_v43 = vadd.f32 %v3681_v12, %v3680_v50 }
0x36a4   :  { %v3649_v41 = vpop.permute.xlu2 %3648  ;;  %v3693_v14 = vrot.slane %v3692_v1, 2 }
0x36a5   :  { %v3666_v28 = vmul.f32 %v3649_v41, %v4917_v52 }
0x36a6   :  { %v3694_v33 = vadd.f32 %v3693_v14, %v3692_v1 }
0x36a7   :  { %v3704_v56 = vsel %vm1940_vm6, %v3666_v28, 0.0 }
0x36a8   :  { %v3705_v35 = vrot.slane %v3704_v56, 4  ;;  %v3695_v60 = vrot.slane %v3694_v33, 1 }
0x36aa   :  { %v3706_v44 = vadd.f32 %v3705_v35, %v3704_v56 }
0x36ab   :  { %v3624_v61 = vpop.permute.xlu1 %3623 }
0x36ac   :  { %v3661_v36 = vmul.f32 %v3624_v61, %v4901_v46  ;;  %v3659_v25 = vpop.permute.xlu2 %3658  ;;  %v3707_v7 = vrot.slane %v3706_v44, 2 }
0x36ad   :  { %v3668_v55 = vmul.f32 %v3659_v25, %v4929_v59 }
0x36ae   :  { %v3669_v3 = vsel %vm1940_vm6, %v3661_v36, 0.0  ;;  %v3708_v19 = vadd.f32 %v3707_v7, %v3706_v44 }
0x36af   :  { %v3670_v40 = vrot.slane %v3669_v3, 4  ;;  %v3718_v2 = vsel %vm1940_vm6, %v3668_v55, 0.0  ;;  %v2643_v55 = vadd.f32 %v5521_v38, %v5871_v24 }
0x36b0   :  { %v3719_v49 = vrot.slane %v3718_v2, 4 }
0x36b1   :  { %v3671_v21 = vadd.f32 %v3670_v40, %v3669_v3  ;;  %v3709_v3 = vrot.slane %v3708_v19, 1 }
0x36b2   :  { %v3720_v34 = vadd.f32 %v3719_v49, %v3718_v2 }
0x36b3   :  { %v3634_v29 = vpop.permute.xlu1 %3633  ;;  %v3672_v17 = vrot.slane %v3671_v21, 2  ;;  %v3710_v25 = vadd.f32 %v3709_v3, %v3708_v19 }
0x36b4   :  { %v3663_v18 = vmul.f32 %v3634_v29, %v4905_v11  ;;  %v3721_v13 = vrot.slane %v3720_v34, 2  ;;  %v3744_v57 = vpop.permute.xlu2 %3743 }
0x36b5   :  { %v3673_v62 = vadd.f32 %v3672_v17, %v3671_v21  ;;  %v3953_v17 = vld [vmem:[#allocation2] ss:$0 sm:$0xff] }
0x36b6   :  { %v3683_v46 = vsel %vm1940_vm6, %v3663_v18, 0.0  ;;  %v3722_v10 = vadd.f32 %v3721_v13, %v3720_v34 }
0x36b7   :  { %v3684_v27 = vrot.slane %v3683_v46, 4  ;;  %v3674_v39 = vrot.slane %v3673_v62, 1 }
0x36b8   :  { %v3723_v9 = vrot.slane %v3722_v10, 1 }
0x36b9   :  { %v3685_v37 = vadd.f32 %v3684_v27, %v3683_v46  ;;  %v3675_v20 = vadd.f32 %v3674_v39, %v3673_v62  ;;  %v2659_v27 = vmul.f32 %v5878_v26, %v2643_v55 }
0x36ba   :  { %v3724_v63 = vadd.f32 %v3723_v9, %v3722_v10 }
0x36bb   :  { %v3686_v23 = vrot.slane %v3685_v37, 2  ;;  %v3644_v11 = vpop.permute.xlu1 %3643  ;;  %v3733_v41 = vsel %vm1644_vm10, %v3682_v43, %v3675_v20  ;;  %vm6128_vm10 = vcmask 1047559  }
0x36bc   :  { %v3665_v52 = vmul.f32 %v3644_v11, %v4921_v5  ;;  %v3220_v11 = vpop.xlane.xlu0 %3219 }
0x36bd   :  { %v3687_v53 = vadd.f32 %v3686_v23, %v3685_v37  ;;  %v3221_v16 = vadd.f32 %v3953_v17, %v3220_v11 }
0x36be   :  { %v3697_v59 = vsel %vm1940_vm6, %v3665_v52, 0.0 }
0x36bf   :  { %v3698_v32 = vrot.slane %v3697_v59, 4  ;;  %v3688_v4 = vrot.slane %v3687_v53, 1 }
0x36c1   :  { %v3699_v30 = vadd.f32 %v3698_v32, %v3697_v59  ;;  %v3689_v31 = vadd.f32 %v3688_v4, %v3687_v53 }
0x36c3   :  { %v3700_v8 = vrot.slane %v3699_v30, 2  ;;  %v3654_v15 = vpop.permute.xlu1 %3653  ;;  %v3734_v61 = vsel %vm1646_vm11, %v3689_v31, %v3733_v41  ;;  %vm6129_vm11 = vcmask 261120  }
0x36c4   :  { %v3667_v5 = vmul.f32 %v3654_v15, %v4925_v58  ;;  %v3696_v58 = vadd.f32 %v3695_v60, %v3694_v33  ;;  %v2099_v59 = vpop.xlane.xlu0 %2098 }
0x36c5   :  { %v3701_v48 = vadd.f32 %v3700_v8, %v3699_v30  ;;  %v2103_v32 = vadd.f32 %v3953_v17, %v2099_v59 }
0x36c6   :  { %v3711_v51 = vsel %vm1940_vm6, %v3667_v5, 0.0  ;;  %v3735_v40 = vsel %vm1648_vm12, %v3696_v58, %v3734_v61  ;;  %vm6127_vm6 = vcmask 1046534   ;;  %vm6130_vm12 = vcmask 523264  }
0x36c7   :  { %v3702_v47 = vrot.slane %v3701_v48, 1  ;;  %v3712_v42 = vrot.slane %v3711_v51, 4 }
0x36c9   :  { %v3713_v54 = vadd.f32 %v3712_v42, %v3711_v51  ;;  %v3703_v36 = vadd.f32 %v3702_v47, %v3701_v48 }
0x36cb   :  { %v3714_v6 = vrot.slane %v3713_v54, 2  ;;  %v3736_v22 = vsel %vm1650_vm13, %v3703_v36, %v3735_v40  ;;  %vm3780_vm13 = vcmask 7168  }
0x36cc   :  { %v3737_v28 = vsel %vm1652_vm14, %v3710_v25, %v3736_v22  ;;  %vm3782_vm14 = vcmask 15360  }
0x36cd   :  { %v3715_v0 = vadd.f32 %v3714_v6, %v3713_v54 }
0x36cf   :  { %v3716_v29 = vrot.slane %v3715_v0, 1 }
0x36d1   :  { %v3717_v18 = vadd.f32 %v3716_v29, %v3715_v0 }
0x36d3   :  { %v3738_v21 = vsel %vm6127_vm6, %v3717_v18, %v3737_v28 }
0x36d4   :  { %v3739_v46 = vsel %vm6128_vm10, %v3724_v63, %v3738_v21 }
0x36d5   :  { %3740 = vrot.lane.b32.xlu1 %v3739_v46, %s4332_s30 }
0x36ff   :  { %2660 = vadd.xlane.f32.xlu1 %v2659_v27 }
0x3747   :  { %v3741_v45 = vpop.permute.xlu1 %3740 }
0x3748   :  { %v3746_v56 = vsel %vm6129_vm11, %v3741_v45, %v3744_v57 }
0x3749   :  { %v3747_v37 = vpack.c.bf16 %v3746_v56, %v3746_v56 }
0x374b   :  { %3917 = vmatmul.msk.bf16.vlgmr.msra.gmra.mxu2 %vm6130_vm12, %v3747_v37 }
0x3772   :  { %v2661_v2 = vpop.xlane.xlu1 %2660 }
0x3773   :  { %v2662_v23 = vadd.f32 %v3953_v17, %v2661_v2 }
0x3775   :  { %3769 = vrot.lane.b32.xlu0 %v2662_v23, %s4333_s10 }
0x377d   :  { %3773 = vrot.lane.b32.xlu0 %v3221_v16, %s4334_s11 }
0x37ce   :  { %v3760_v38 = vpop.f32.mrf.mxu2 }
0x37cf   :  { %v3761_v1 = vadd.f32 %v3760_v38, %v5871_v24 }
0x37d1   :  { %v3764_v35 = vmul.f32 %v5878_v26, %v3761_v1 }
0x37d3   :  { %3765 = vadd.xlane.f32.xlu2 %v3764_v35 }
0x37d6   :  { %v3762_v52 = vpop.f32.mrf.mxu2 }
0x37e7   :  { %v3770_v53 = vpop.permute.xlu0 %3769 }
0x37e8   :  { %v3781_v14 = vsel %vm3780_vm13, %v2103_v32, %v3770_v53 }
0x37ef   :  { %v3774_v50 = vpop.permute.xlu0 %3773 }
0x37f0   :  { %v3783_v44 = vsel %vm3782_vm14, %v3781_v14, %v3774_v50 }
0x3846   :  { %v3766_v49 = vpop.xlane.xlu2 %3765 }
0x3847   :  { %v3767_v62 = vadd.f32 %v3953_v17, %v3766_v49 }
0x3849   :  { %3777 = vrot.lane.b32.xlu1 %v3767_v62, %s4335_s18 }
0x38bb   :  { %v3778_v30 = vpop.permute.xlu1 %3777 }
0x38bc   :  { %v3785_v34 = vsel %vm3784_vm4, %v3783_v44, %v3778_v30 }
0x38bd   :  { %3786 = vst.msk [vmem:[%s6044_s13] sm:$0xff] %vm6131_vm2, %v3785_v34 }
0x38be   :  { %3791 = vsyncpa [#allocation4], 1 }
0x38bf   :  { %3792 = vsyncpa [#allocation6], 1 }

</bundles_post_ra>
